<compile_context>
chip_gen: v7x
topology: tpu7x:2x2x1
jax: 0.10.0
libtpu: 0.0.40
codegen_flags: <defaults>
</compile_context>

<pallas_src>
import numpy as np
import jax
import jax.numpy as jnp
from jax.experimental import pallas as pl
from jax.experimental.pallas import tpu as pltpu

M = 10.0          # tanh scale, same as the PyTorch global M
Z = 3             # number of "csv files" (assets) -- synthetic small setting
BATCH = 4         # B >= 2 required: training-mode BatchNorm degenerates at B=1
N_HEADS = 8


def get_slice_array1(i, z):
    temp = np.tile(np.arange(i + 1), z)
    return temp + np.repeat(np.arange(z), i + 1) * 8


# ---------------------------------------------------------------------------
# Fused kernel: BN + 8 per-head MLPs (stacked weights) + fused output assembly.
# ---------------------------------------------------------------------------
def _fused_kernel(x_ref, w1_ref, b1_ref, w2_ref, b2_ref, w3_ref, b3_ref,
                  w4_ref, b4_ref, d0_ref, o_ref):
    B = x_ref.shape[0]
    n_heads = w1_ref.shape[0]

    # BatchNorm1d, training-mode forward (biased batch statistics, eps=1e-5),
    # gamma=1 / beta=0 (fresh-init).  Per-column standardization of x is
    # identical to standardizing each head's gathered slice.
    x = x_ref[...].astype(jnp.float32)                        # [B, 8z]
    mean = jnp.mean(x, axis=0, keepdims=True)
    var = jnp.mean((x - mean) ** 2, axis=0, keepdims=True)
    xn = ((x - mean) * jax.lax.rsqrt(var + 1e-5)).astype(jnp.bfloat16)

    def dense(h_bf16, w_bf16, b_f32):
        # bf16 MXU operands, f32 accumulation, f32 bias.
        return jnp.dot(h_bf16, w_bf16, preferred_element_type=jnp.float32) + b_f32

    # Layers 1-3: unrolled per-head loop over stacked weights (no dense
    # block-diagonal matrices -> ~8x less weight DMA & VMEM).
    h3_list = []
    for i in range(n_heads):
        h = jnp.maximum(dense(xn, w1_ref[i], b1_ref[i]), 0.0).astype(jnp.bfloat16)
        h = jnp.maximum(dense(h, w2_ref[i], b2_ref[i]), 0.0).astype(jnp.bfloat16)
        h = jnp.maximum(dense(h, w3_ref[i], b3_ref[i]), 0.0).astype(jnp.bfloat16)
        h3_list.append(h)                                     # [B, 128z] bf16
    h3 = jnp.concatenate(h3_list, axis=1)                     # [B, 8*128z] (lane-aligned)

    # Layer 4 + output assembly fused:
    #   w4_ref is asset-major with z all-zero delta0 columns (zero bias there,
    #   so M*tanh(0)=0); d0_ref adds delta0_s into those slots post-tanh.
    pre = jnp.dot(h3, w4_ref[...], preferred_element_type=jnp.float32) + b4_ref[...]
    out = M * jnp.tanh(pre) + d0_ref[...]                     # [B, 9z] f32

    # Single unmasked, lane-dense store (pad columns 9z..127 with zeros; the
    # wrapper slices them off).
    pad = o_ref.shape[1] - out.shape[1]
    if pad > 0:
        out = jnp.concatenate([out, jnp.zeros((B, pad), jnp.float32)], axis=1)
    o_ref[...] = out


# ---------------------------------------------------------------------------
# Parameter construction (per-head nn.Linear-style init, then packing).
# Returns both the packed kernel params and the raw per-head params (for the
# un-packed reference check).
# ---------------------------------------------------------------------------
def init_params(key, z):
    H1, H2, H3 = 32 * z, 64 * z, 128 * z

    w1_stack = np.zeros((N_HEADS, 8 * z, H1), np.float32)   # gather folded per head
    b1_stack = np.zeros((N_HEADS, 1, H1), np.float32)
    w2_stack = np.zeros((N_HEADS, H1, H2), np.float32)
    b2_stack = np.zeros((N_HEADS, 1, H2), np.float32)
    w3_stack = np.zeros((N_HEADS, H2, H3), np.float32)
    b3_stack = np.zeros((N_HEADS, 1, H3), np.float32)
    w4_asm = np.zeros((N_HEADS * H3, 9 * z), np.float32)    # asset-major + delta0 cols
    b4_asm = np.zeros((1, 9 * z), np.float32)

    heads = []  # per-head (weights bf16, biases f32) for the reference forward

    for i in range(N_HEADS):
        d_in = z * (i + 1)
        dims = [(d_in, H1), (H1, H2), (H2, H3), (H3, z)]
        ws, bs = [], []
        for fan_in, fan_out in dims:
            key, kw, kb = jax.random.split(key, 3)
            bound = 1.0 / np.sqrt(fan_in)                    # ~ nn.Linear default init
            w = np.asarray(jax.random.uniform(kw, (fan_in, fan_out), jnp.float32,
                                              -bound, bound))
            b = np.asarray(jax.random.uniform(kb, (1, fan_out), jnp.float32,
                                              -bound, bound))
            # Round weights through bf16 once so kernel and reference share the
            # exact same weight values (tight correctness check).
            w = np.asarray(jnp.asarray(w, jnp.bfloat16).astype(jnp.float32))
            ws.append(w)
            bs.append(b)

        idx = get_slice_array1(i, z)                         # monotonic, no dups
        w1_stack[i, idx, :] = ws[0]
        b1_stack[i] = bs[0]
        w2_stack[i] = ws[1]; b2_stack[i] = bs[1]
        w3_stack[i] = ws[2]; b3_stack[i] = bs[2]
        # head i, asset j -> output column j*9 + 1 + i  (column j*9 is delta0_s[j])
        for j in range(z):
            w4_asm[i * H3:(i + 1) * H3, j * 9 + 1 + i] = ws[3][:, j]
            b4_asm[0, j * 9 + 1 + i] = bs[3][0, j]

        heads.append(([jnp.asarray(w, jnp.bfloat16) for w in ws],
                      [jnp.asarray(b, jnp.float32) for b in bs]))

    packed = dict(
        w1=jnp.asarray(w1_stack, jnp.bfloat16), b1=jnp.asarray(b1_stack, jnp.float32),
        w2=jnp.asarray(w2_stack, jnp.bfloat16), b2=jnp.asarray(b2_stack, jnp.float32),
        w3=jnp.asarray(w3_stack, jnp.bfloat16), b3=jnp.asarray(b3_stack, jnp.float32),
        w4=jnp.asarray(w4_asm, jnp.bfloat16), b4=jnp.asarray(b4_asm, jnp.float32),
    )
    c = jnp.zeros((1,), jnp.float32)                         # nn.Parameter c = [0.]
    delta0_s = jnp.zeros((z,), jnp.float32)                  # nn.Parameter delta0_s
    return packed, heads, delta0_s, c


# ---------------------------------------------------------------------------
# Forward (single jit, single pallas_call).
# ---------------------------------------------------------------------------
@jax.jit
def net_independent_forward(x, packed, delta0_s, c):
    """Reproduces Net_independent.forward: returns ([z tensors [B, 9]], c)."""
    B = x.shape[0]
    z = delta0_s.shape[0]
    out_w = max(128, ((9 * z + 127) // 128) * 128)           # lane-dense output slab

    # Post-tanh additive bias: delta0_s[j] in column j*9, zeros in head slots.
    d0_bias = jnp.concatenate(
        [delta0_s[:, None], jnp.zeros((z, 8), jnp.float32)], axis=1
    ).reshape(1, 9 * z)

    vmem = pl.BlockSpec(memory_space=pltpu.MemorySpace.VMEM)
    slab = pl.pallas_call(
        _fused_kernel,
        out_shape=jax.ShapeDtypeStruct((B, out_w), jnp.float32),
        in_specs=[vmem] * 10,
        out_specs=vmem,
        compiler_params=pltpu.CompilerParams(
            vmem_limit_bytes=8 * 1024 * 1024),                # right-sized (~2.6 MiB used)
    )(x, packed["w1"], packed["b1"], packed["w2"], packed["b2"],
      packed["w3"], packed["b3"], packed["w4"], packed["b4"], d0_bias)

    slab = slab[:, :9 * z]                                    # drop lane padding (once)
    outs = [slab[:, j * 9:(j + 1) * 9] for j in range(z)]     # sliced inside the jit
    return outs, c


# ---------------------------------------------------------------------------
# Un-packed per-head reference mirroring the original PyTorch forward
# (gather -> BN -> 4 linears -> M*tanh -> column-interleave -> delta0 prepend),
# using the same bf16-rounded weights as the kernel.
# ---------------------------------------------------------------------------
def reference_forward(x, heads, delta0_s, z):
    B = x.shape[0]
    x = x.astype(jnp.float32)
    deltas = []
    for i in range(N_HEADS):
        ws, bs = heads[i]
        xi = x[:, get_slice_array1(i, z)]
        mean = jnp.mean(xi, axis=0, keepdims=True)
        var = jnp.mean((xi - mean) ** 2, axis=0, keepdims=True)
        h = ((xi - mean) * jax.lax.rsqrt(var + 1e-5)).astype(jnp.bfloat16)
        for layer in range(3):
            h = jnp.maximum(
                jnp.dot(h, ws[layer], preferred_element_type=jnp.float32) + bs[layer],
                0.0).astype(jnp.bfloat16)
        d = M * jnp.tanh(jnp.dot(h, ws[3], preferred_element_type=jnp.float32) + bs[3])
        deltas.append(d)                                      # [B, z]
    outs = []
    for j in range(z):
        cols = jnp.concatenate([d[:, j:j + 1] for d in deltas], axis=1)   # [B, 8]
        d0 = jnp.full((B, 1), delta0_s[j], jnp.float32)
        outs.append(jnp.concatenate([d0, cols], axis=1))                   # [B, 9]
    return outs


if __name__ == "__main__":
    key = jax.random.PRNGKey(0)
    key, kx = jax.random.split(key)
    x = jax.random.normal(kx, (BATCH, 8 * Z), jnp.float32)    # [B, 8*z]

    packed, heads, delta0_s, c = init_params(key, Z)

    outs, c_out = net_independent_forward(x, packed, delta0_s, c)
    outs = [jax.block_until_ready(o) for o in outs]
    c_out = jax.block_until_ready(c_out)

    assert len(outs) == Z
    ref_outs = reference_forward(x, heads, delta0_s, Z)
    for o, r in zip(outs, ref_outs):
        assert o.shape == (BATCH, 9), o.shape
        assert bool(jnp.all(jnp.isfinite(o)))
        np.testing.assert_allclose(np.asarray(o, np.float32),
                                   np.asarray(r, np.float32),
                                   atol=2e-2, rtol=2e-2)
    print("KERNEL_OK")
</pallas_src>

<mosaic_0001>
module attributes {stable_mosaic.version = 11 : i64} {
  func.func @_fused_kernel(%arg0: memref<4x24xf32, #tpu.memory_space<vmem>>, %arg1: memref<8x24x96xbf16, #tpu.memory_space<vmem>>, %arg2: memref<8x1x96xf32, #tpu.memory_space<vmem>>, %arg3: memref<8x96x192xbf16, #tpu.memory_space<vmem>>, %arg4: memref<8x1x192xf32, #tpu.memory_space<vmem>>, %arg5: memref<8x192x384xbf16, #tpu.memory_space<vmem>>, %arg6: memref<8x1x384xf32, #tpu.memory_space<vmem>>, %arg7: memref<3072x27xbf16, #tpu.memory_space<vmem>>, %arg8: memref<1x27xf32, #tpu.memory_space<vmem>>, %arg9: memref<1x27xf32, #tpu.memory_space<vmem>>, %arg10: memref<4x128xf32, #tpu.memory_space<vmem>>) attributes {dimension_semantics = [], scalar_prefetch = 0 : i64, scratch_operands = 0 : i64, tpu.core_type = #tpu.core_type<tc>} {
    %c0 = arith.constant 0 : index
    %c0_0 = arith.constant 0 : index
    %0 = vector.load %arg0[%c0, %c0_0] : memref<4x24xf32, #tpu.memory_space<vmem>>, vector<4x24xf32>
    %cst = arith.constant dense<0.000000e+00> : vector<24xf32>
    %1 = vector.multi_reduction <add>, %0, %cst [0] : vector<4x24xf32> to vector<24xf32>
    %2 = vector.shape_cast %1 : vector<24xf32> to vector<1x24xf32>
    %cst_1 = arith.constant 4.000000e+00 : f32
    %3 = vector.broadcast %cst_1 : f32 to vector<1x24xf32>
    %4 = arith.divf %2, %3 : vector<1x24xf32>
    %5 = vector.broadcast %4 : vector<1x24xf32> to vector<4x24xf32>
    %6 = arith.subf %0, %5 : vector<4x24xf32>
    %7 = arith.mulf %6, %6 : vector<4x24xf32>
    %cst_2 = arith.constant dense<0.000000e+00> : vector<24xf32>
    %8 = vector.multi_reduction <add>, %7, %cst_2 [0] : vector<4x24xf32> to vector<24xf32>
    %9 = vector.shape_cast %8 : vector<24xf32> to vector<1x24xf32>
    %cst_3 = arith.constant 4.000000e+00 : f32
    %10 = vector.broadcast %cst_3 : f32 to vector<1x24xf32>
    %11 = arith.divf %9, %10 : vector<1x24xf32>
    %12 = vector.broadcast %4 : vector<1x24xf32> to vector<4x24xf32>
    %13 = arith.subf %0, %12 : vector<4x24xf32>
    %cst_4 = arith.constant 9.99999974E-6 : f32
    %14 = vector.broadcast %cst_4 : f32 to vector<1x24xf32>
    %15 = arith.addf %11, %14 : vector<1x24xf32>
    %16 = math.rsqrt %15 : vector<1x24xf32>
    %17 = vector.broadcast %16 : vector<1x24xf32> to vector<4x24xf32>
    %18 = arith.mulf %13, %17 : vector<4x24xf32>
    %19 = arith.truncf %18 : vector<4x24xf32> to vector<4x24xbf16>
    %c0_5 = arith.constant 0 : index
    %c0_6 = arith.constant 0 : index
    %c0_7 = arith.constant 0 : index
    %20 = vector.load %arg1[%c0_5, %c0_6, %c0_7] : memref<8x24x96xbf16, #tpu.memory_space<vmem>>, vector<1x24x96xbf16>
    %21 = vector.shape_cast %20 : vector<1x24x96xbf16> to vector<24x96xbf16>
    %c0_8 = arith.constant 0 : index
    %c0_9 = arith.constant 0 : index
    %c0_10 = arith.constant 0 : index
    %22 = vector.load %arg2[%c0_8, %c0_9, %c0_10] : memref<8x1x96xf32, #tpu.memory_space<vmem>>, vector<1x1x96xf32>
    %23 = vector.shape_cast %22 : vector<1x1x96xf32> to vector<1x96xf32>
    %cst_11 = arith.constant dense<0.000000e+00> : vector<4x96xf32>
    %24 = tpu.matmul %19, %21, %cst_11 {dimension_numbers = #tpu.dot_dimension_numbers<[1], [0], [0], [1], [0, 0, 1, 1], [], []>} : vector<4x24xbf16>, vector<24x96xbf16>, vector<4x96xf32> -> vector<4x96xf32>
    %25 = vector.broadcast %23 : vector<1x96xf32> to vector<4x96xf32>
    %26 = arith.addf %24, %25 : vector<4x96xf32>
    %cst_12 = arith.constant 0.000000e+00 : f32
    %27 = vector.broadcast %cst_12 : f32 to vector<4x96xf32>
    %28 = arith.maximumf %26, %27 : vector<4x96xf32>
    %29 = arith.truncf %28 : vector<4x96xf32> to vector<4x96xbf16>
    %c0_13 = arith.constant 0 : index
    %c0_14 = arith.constant 0 : index
    %c0_15 = arith.constant 0 : index
    %30 = vector.load %arg3[%c0_13, %c0_14, %c0_15] : memref<8x96x192xbf16, #tpu.memory_space<vmem>>, vector<1x96x192xbf16>
    %31 = vector.shape_cast %30 : vector<1x96x192xbf16> to vector<96x192xbf16>
    %c0_16 = arith.constant 0 : index
    %c0_17 = arith.constant 0 : index
    %c0_18 = arith.constant 0 : index
    %32 = vector.load %arg4[%c0_16, %c0_17, %c0_18] : memref<8x1x192xf32, #tpu.memory_space<vmem>>, vector<1x1x192xf32>
    %33 = vector.shape_cast %32 : vector<1x1x192xf32> to vector<1x192xf32>
    %cst_19 = arith.constant dense<0.000000e+00> : vector<4x192xf32>
    %34 = tpu.matmul %29, %31, %cst_19 {dimension_numbers = #tpu.dot_dimension_numbers<[1], [0], [0], [1], [0, 0, 1, 1], [], []>} : vector<4x96xbf16>, vector<96x192xbf16>, vector<4x192xf32> -> vector<4x192xf32>
    %35 = vector.broadcast %33 : vector<1x192xf32> to vector<4x192xf32>
    %36 = arith.addf %34, %35 : vector<4x192xf32>
    %cst_20 = arith.constant 0.000000e+00 : f32
    %37 = vector.broadcast %cst_20 : f32 to vector<4x192xf32>
    %38 = arith.maximumf %36, %37 : vector<4x192xf32>
    %39 = arith.truncf %38 : vector<4x192xf32> to vector<4x192xbf16>
    %c0_21 = arith.constant 0 : index
    %c0_22 = arith.constant 0 : index
    %c0_23 = arith.constant 0 : index
    %40 = vector.load %arg5[%c0_21, %c0_22, %c0_23] : memref<8x192x384xbf16, #tpu.memory_space<vmem>>, vector<1x192x384xbf16>
    %41 = vector.shape_cast %40 : vector<1x192x384xbf16> to vector<192x384xbf16>
    %c0_24 = arith.constant 0 : index
    %c0_25 = arith.constant 0 : index
    %c0_26 = arith.constant 0 : index
    %42 = vector.load %arg6[%c0_24, %c0_25, %c0_26] : memref<8x1x384xf32, #tpu.memory_space<vmem>>, vector<1x1x384xf32>
    %43 = vector.shape_cast %42 : vector<1x1x384xf32> to vector<1x384xf32>
    %cst_27 = arith.constant dense<0.000000e+00> : vector<4x384xf32>
    %44 = tpu.matmul %39, %41, %cst_27 {dimension_numbers = #tpu.dot_dimension_numbers<[1], [0], [0], [1], [0, 0, 1, 1], [], []>} : vector<4x192xbf16>, vector<192x384xbf16>, vector<4x384xf32> -> vector<4x384xf32>
    %45 = vector.broadcast %43 : vector<1x384xf32> to vector<4x384xf32>
    %46 = arith.addf %44, %45 : vector<4x384xf32>
    %cst_28 = arith.constant 0.000000e+00 : f32
    %47 = vector.broadcast %cst_28 : f32 to vector<4x384xf32>
    %48 = arith.maximumf %46, %47 : vector<4x384xf32>
    %49 = arith.truncf %48 : vector<4x384xf32> to vector<4x384xbf16>
    %c1 = arith.constant 1 : index
    %c0_29 = arith.constant 0 : index
    %c0_30 = arith.constant 0 : index
    %50 = vector.load %arg1[%c1, %c0_29, %c0_30] : memref<8x24x96xbf16, #tpu.memory_space<vmem>>, vector<1x24x96xbf16>
    %51 = vector.shape_cast %50 : vector<1x24x96xbf16> to vector<24x96xbf16>
    %c1_31 = arith.constant 1 : index
    %c0_32 = arith.constant 0 : index
    %c0_33 = arith.constant 0 : index
    %52 = vector.load %arg2[%c1_31, %c0_32, %c0_33] : memref<8x1x96xf32, #tpu.memory_space<vmem>>, vector<1x1x96xf32>
    %53 = vector.shape_cast %52 : vector<1x1x96xf32> to vector<1x96xf32>
    %cst_34 = arith.constant dense<0.000000e+00> : vector<4x96xf32>
    %54 = tpu.matmul %19, %51, %cst_34 {dimension_numbers = #tpu.dot_dimension_numbers<[1], [0], [0], [1], [0, 0, 1, 1], [], []>} : vector<4x24xbf16>, vector<24x96xbf16>, vector<4x96xf32> -> vector<4x96xf32>
    %55 = vector.broadcast %53 : vector<1x96xf32> to vector<4x96xf32>
    %56 = arith.addf %54, %55 : vector<4x96xf32>
    %cst_35 = arith.constant 0.000000e+00 : f32
    %57 = vector.broadcast %cst_35 : f32 to vector<4x96xf32>
    %58 = arith.maximumf %56, %57 : vector<4x96xf32>
    %59 = arith.truncf %58 : vector<4x96xf32> to vector<4x96xbf16>
    %c1_36 = arith.constant 1 : index
    %c0_37 = arith.constant 0 : index
    %c0_38 = arith.constant 0 : index
    %60 = vector.load %arg3[%c1_36, %c0_37, %c0_38] : memref<8x96x192xbf16, #tpu.memory_space<vmem>>, vector<1x96x192xbf16>
    %61 = vector.shape_cast %60 : vector<1x96x192xbf16> to vector<96x192xbf16>
    %c1_39 = arith.constant 1 : index
    %c0_40 = arith.constant 0 : index
    %c0_41 = arith.constant 0 : index
    %62 = vector.load %arg4[%c1_39, %c0_40, %c0_41] : memref<8x1x192xf32, #tpu.memory_space<vmem>>, vector<1x1x192xf32>
    %63 = vector.shape_cast %62 : vector<1x1x192xf32> to vector<1x192xf32>
    %cst_42 = arith.constant dense<0.000000e+00> : vector<4x192xf32>
    %64 = tpu.matmul %59, %61, %cst_42 {dimension_numbers = #tpu.dot_dimension_numbers<[1], [0], [0], [1], [0, 0, 1, 1], [], []>} : vector<4x96xbf16>, vector<96x192xbf16>, vector<4x192xf32> -> vector<4x192xf32>
    %65 = vector.broadcast %63 : vector<1x192xf32> to vector<4x192xf32>
    %66 = arith.addf %64, %65 : vector<4x192xf32>
    %cst_43 = arith.constant 0.000000e+00 : f32
    %67 = vector.broadcast %cst_43 : f32 to vector<4x192xf32>
    %68 = arith.maximumf %66, %67 : vector<4x192xf32>
    %69 = arith.truncf %68 : vector<4x192xf32> to vector<4x192xbf16>
    %c1_44 = arith.constant 1 : index
    %c0_45 = arith.constant 0 : index
    %c0_46 = arith.constant 0 : index
    %70 = vector.load %arg5[%c1_44, %c0_45, %c0_46] : memref<8x192x384xbf16, #tpu.memory_space<vmem>>, vector<1x192x384xbf16>
    %71 = vector.shape_cast %70 : vector<1x192x384xbf16> to vector<192x384xbf16>
    %c1_47 = arith.constant 1 : index
    %c0_48 = arith.constant 0 : index
    %c0_49 = arith.constant 0 : index
    %72 = vector.load %arg6[%c1_47, %c0_48, %c0_49] : memref<8x1x384xf32, #tpu.memory_space<vmem>>, vector<1x1x384xf32>
    %73 = vector.shape_cast %72 : vector<1x1x384xf32> to vector<1x384xf32>
    %cst_50 = arith.constant dense<0.000000e+00> : vector<4x384xf32>
    %74 = tpu.matmul %69, %71, %cst_50 {dimension_numbers = #tpu.dot_dimension_numbers<[1], [0], [0], [1], [0, 0, 1, 1], [], []>} : vector<4x192xbf16>, vector<192x384xbf16>, vector<4x384xf32> -> vector<4x384xf32>
    %75 = vector.broadcast %73 : vector<1x384xf32> to vector<4x384xf32>
    %76 = arith.addf %74, %75 : vector<4x384xf32>
    %cst_51 = arith.constant 0.000000e+00 : f32
    %77 = vector.broadcast %cst_51 : f32 to vector<4x384xf32>
    %78 = arith.maximumf %76, %77 : vector<4x384xf32>
    %79 = arith.truncf %78 : vector<4x384xf32> to vector<4x384xbf16>
    %c2 = arith.constant 2 : index
    %c0_52 = arith.constant 0 : index
    %c0_53 = arith.constant 0 : index
    %80 = vector.load %arg1[%c2, %c0_52, %c0_53] : memref<8x24x96xbf16, #tpu.memory_space<vmem>>, vector<1x24x96xbf16>
    %81 = vector.shape_cast %80 : vector<1x24x96xbf16> to vector<24x96xbf16>
    %c2_54 = arith.constant 2 : index
    %c0_55 = arith.constant 0 : index
    %c0_56 = arith.constant 0 : index
    %82 = vector.load %arg2[%c2_54, %c0_55, %c0_56] : memref<8x1x96xf32, #tpu.memory_space<vmem>>, vector<1x1x96xf32>
    %83 = vector.shape_cast %82 : vector<1x1x96xf32> to vector<1x96xf32>
    %cst_57 = arith.constant dense<0.000000e+00> : vector<4x96xf32>
    %84 = tpu.matmul %19, %81, %cst_57 {dimension_numbers = #tpu.dot_dimension_numbers<[1], [0], [0], [1], [0, 0, 1, 1], [], []>} : vector<4x24xbf16>, vector<24x96xbf16>, vector<4x96xf32> -> vector<4x96xf32>
    %85 = vector.broadcast %83 : vector<1x96xf32> to vector<4x96xf32>
    %86 = arith.addf %84, %85 : vector<4x96xf32>
    %cst_58 = arith.constant 0.000000e+00 : f32
    %87 = vector.broadcast %cst_58 : f32 to vector<4x96xf32>
    %88 = arith.maximumf %86, %87 : vector<4x96xf32>
    %89 = arith.truncf %88 : vector<4x96xf32> to vector<4x96xbf16>
    %c2_59 = arith.constant 2 : index
    %c0_60 = arith.constant 0 : index
    %c0_61 = arith.constant 0 : index
    %90 = vector.load %arg3[%c2_59, %c0_60, %c0_61] : memref<8x96x192xbf16, #tpu.memory_space<vmem>>, vector<1x96x192xbf16>
    %91 = vector.shape_cast %90 : vector<1x96x192xbf16> to vector<96x192xbf16>
    %c2_62 = arith.constant 2 : index
    %c0_63 = arith.constant 0 : index
    %c0_64 = arith.constant 0 : index
    %92 = vector.load %arg4[%c2_62, %c0_63, %c0_64] : memref<8x1x192xf32, #tpu.memory_space<vmem>>, vector<1x1x192xf32>
    %93 = vector.shape_cast %92 : vector<1x1x192xf32> to vector<1x192xf32>
    %cst_65 = arith.constant dense<0.000000e+00> : vector<4x192xf32>
    %94 = tpu.matmul %89, %91, %cst_65 {dimension_numbers = #tpu.dot_dimension_numbers<[1], [0], [0], [1], [0, 0, 1, 1], [], []>} : vector<4x96xbf16>, vector<96x192xbf16>, vector<4x192xf32> -> vector<4x192xf32>
    %95 = vector.broadcast %93 : vector<1x192xf32> to vector<4x192xf32>
    %96 = arith.addf %94, %95 : vector<4x192xf32>
    %cst_66 = arith.constant 0.000000e+00 : f32
    %97 = vector.broadcast %cst_66 : f32 to vector<4x192xf32>
    %98 = arith.maximumf %96, %97 : vector<4x192xf32>
    %99 = arith.truncf %98 : vector<4x192xf32> to vector<4x192xbf16>
    %c2_67 = arith.constant 2 : index
    %c0_68 = arith.constant 0 : index
    %c0_69 = arith.constant 0 : index
    %100 = vector.load %arg5[%c2_67, %c0_68, %c0_69] : memref<8x192x384xbf16, #tpu.memory_space<vmem>>, vector<1x192x384xbf16>
    %101 = vector.shape_cast %100 : vector<1x192x384xbf16> to vector<192x384xbf16>
    %c2_70 = arith.constant 2 : index
    %c0_71 = arith.constant 0 : index
    %c0_72 = arith.constant 0 : index
    %102 = vector.load %arg6[%c2_70, %c0_71, %c0_72] : memref<8x1x384xf32, #tpu.memory_space<vmem>>, vector<1x1x384xf32>
    %103 = vector.shape_cast %102 : vector<1x1x384xf32> to vector<1x384xf32>
    %cst_73 = arith.constant dense<0.000000e+00> : vector<4x384xf32>
    %104 = tpu.matmul %99, %101, %cst_73 {dimension_numbers = #tpu.dot_dimension_numbers<[1], [0], [0], [1], [0, 0, 1, 1], [], []>} : vector<4x192xbf16>, vector<192x384xbf16>, vector<4x384xf32> -> vector<4x384xf32>
    %105 = vector.broadcast %103 : vector<1x384xf32> to vector<4x384xf32>
    %106 = arith.addf %104, %105 : vector<4x384xf32>
    %cst_74 = arith.constant 0.000000e+00 : f32
    %107 = vector.broadcast %cst_74 : f32 to vector<4x384xf32>
    %108 = arith.maximumf %106, %107 : vector<4x384xf32>
    %109 = arith.truncf %108 : vector<4x384xf32> to vector<4x384xbf16>
    %c3 = arith.constant 3 : index
    %c0_75 = arith.constant 0 : index
    %c0_76 = arith.constant 0 : index
    %110 = vector.load %arg1[%c3, %c0_75, %c0_76] : memref<8x24x96xbf16, #tpu.memory_space<vmem>>, vector<1x24x96xbf16>
    %111 = vector.shape_cast %110 : vector<1x24x96xbf16> to vector<24x96xbf16>
    %c3_77 = arith.constant 3 : index
    %c0_78 = arith.constant 0 : index
    %c0_79 = arith.constant 0 : index
    %112 = vector.load %arg2[%c3_77, %c0_78, %c0_79] : memref<8x1x96xf32, #tpu.memory_space<vmem>>, vector<1x1x96xf32>
    %113 = vector.shape_cast %112 : vector<1x1x96xf32> to vector<1x96xf32>
    %cst_80 = arith.constant dense<0.000000e+00> : vector<4x96xf32>
    %114 = tpu.matmul %19, %111, %cst_80 {dimension_numbers = #tpu.dot_dimension_numbers<[1], [0], [0], [1], [0, 0, 1, 1], [], []>} : vector<4x24xbf16>, vector<24x96xbf16>, vector<4x96xf32> -> vector<4x96xf32>
    %115 = vector.broadcast %113 : vector<1x96xf32> to vector<4x96xf32>
    %116 = arith.addf %114, %115 : vector<4x96xf32>
    %cst_81 = arith.constant 0.000000e+00 : f32
    %117 = vector.broadcast %cst_81 : f32 to vector<4x96xf32>
    %118 = arith.maximumf %116, %117 : vector<4x96xf32>
    %119 = arith.truncf %118 : vector<4x96xf32> to vector<4x96xbf16>
    %c3_82 = arith.constant 3 : index
    %c0_83 = arith.constant 0 : index
    %c0_84 = arith.constant 0 : index
    %120 = vector.load %arg3[%c3_82, %c0_83, %c0_84] : memref<8x96x192xbf16, #tpu.memory_space<vmem>>, vector<1x96x192xbf16>
    %121 = vector.shape_cast %120 : vector<1x96x192xbf16> to vector<96x192xbf16>
    %c3_85 = arith.constant 3 : index
    %c0_86 = arith.constant 0 : index
    %c0_87 = arith.constant 0 : index
    %122 = vector.load %arg4[%c3_85, %c0_86, %c0_87] : memref<8x1x192xf32, #tpu.memory_space<vmem>>, vector<1x1x192xf32>
    %123 = vector.shape_cast %122 : vector<1x1x192xf32> to vector<1x192xf32>
    %cst_88 = arith.constant dense<0.000000e+00> : vector<4x192xf32>
    %124 = tpu.matmul %119, %121, %cst_88 {dimension_numbers = #tpu.dot_dimension_numbers<[1], [0], [0], [1], [0, 0, 1, 1], [], []>} : vector<4x96xbf16>, vector<96x192xbf16>, vector<4x192xf32> -> vector<4x192xf32>
    %125 = vector.broadcast %123 : vector<1x192xf32> to vector<4x192xf32>
    %126 = arith.addf %124, %125 : vector<4x192xf32>
    %cst_89 = arith.constant 0.000000e+00 : f32
    %127 = vector.broadcast %cst_89 : f32 to vector<4x192xf32>
    %128 = arith.maximumf %126, %127 : vector<4x192xf32>
    %129 = arith.truncf %128 : vector<4x192xf32> to vector<4x192xbf16>
    %c3_90 = arith.constant 3 : index
    %c0_91 = arith.constant 0 : index
    %c0_92 = arith.constant 0 : index
    %130 = vector.load %arg5[%c3_90, %c0_91, %c0_92] : memref<8x192x384xbf16, #tpu.memory_space<vmem>>, vector<1x192x384xbf16>
    %131 = vector.shape_cast %130 : vector<1x192x384xbf16> to vector<192x384xbf16>
    %c3_93 = arith.constant 3 : index
    %c0_94 = arith.constant 0 : index
    %c0_95 = arith.constant 0 : index
    %132 = vector.load %arg6[%c3_93, %c0_94, %c0_95] : memref<8x1x384xf32, #tpu.memory_space<vmem>>, vector<1x1x384xf32>
    %133 = vector.shape_cast %132 : vector<1x1x384xf32> to vector<1x384xf32>
    %cst_96 = arith.constant dense<0.000000e+00> : vector<4x384xf32>
    %134 = tpu.matmul %129, %131, %cst_96 {dimension_numbers = #tpu.dot_dimension_numbers<[1], [0], [0], [1], [0, 0, 1, 1], [], []>} : vector<4x192xbf16>, vector<192x384xbf16>, vector<4x384xf32> -> vector<4x384xf32>
    %135 = vector.broadcast %133 : vector<1x384xf32> to vector<4x384xf32>
    %136 = arith.addf %134, %135 : vector<4x384xf32>
    %cst_97 = arith.constant 0.000000e+00 : f32
    %137 = vector.broadcast %cst_97 : f32 to vector<4x384xf32>
    %138 = arith.maximumf %136, %137 : vector<4x384xf32>
    %139 = arith.truncf %138 : vector<4x384xf32> to vector<4x384xbf16>
    %c4 = arith.constant 4 : index
    %c0_98 = arith.constant 0 : index
    %c0_99 = arith.constant 0 : index
    %140 = vector.load %arg1[%c4, %c0_98, %c0_99] : memref<8x24x96xbf16, #tpu.memory_space<vmem>>, vector<1x24x96xbf16>
    %141 = vector.shape_cast %140 : vector<1x24x96xbf16> to vector<24x96xbf16>
    %c4_100 = arith.constant 4 : index
    %c0_101 = arith.constant 0 : index
    %c0_102 = arith.constant 0 : index
    %142 = vector.load %arg2[%c4_100, %c0_101, %c0_102] : memref<8x1x96xf32, #tpu.memory_space<vmem>>, vector<1x1x96xf32>
    %143 = vector.shape_cast %142 : vector<1x1x96xf32> to vector<1x96xf32>
    %cst_103 = arith.constant dense<0.000000e+00> : vector<4x96xf32>
    %144 = tpu.matmul %19, %141, %cst_103 {dimension_numbers = #tpu.dot_dimension_numbers<[1], [0], [0], [1], [0, 0, 1, 1], [], []>} : vector<4x24xbf16>, vector<24x96xbf16>, vector<4x96xf32> -> vector<4x96xf32>
    %145 = vector.broadcast %143 : vector<1x96xf32> to vector<4x96xf32>
    %146 = arith.addf %144, %145 : vector<4x96xf32>
    %cst_104 = arith.constant 0.000000e+00 : f32
    %147 = vector.broadcast %cst_104 : f32 to vector<4x96xf32>
    %148 = arith.maximumf %146, %147 : vector<4x96xf32>
    %149 = arith.truncf %148 : vector<4x96xf32> to vector<4x96xbf16>
    %c4_105 = arith.constant 4 : index
    %c0_106 = arith.constant 0 : index
    %c0_107 = arith.constant 0 : index
    %150 = vector.load %arg3[%c4_105, %c0_106, %c0_107] : memref<8x96x192xbf16, #tpu.memory_space<vmem>>, vector<1x96x192xbf16>
    %151 = vector.shape_cast %150 : vector<1x96x192xbf16> to vector<96x192xbf16>
    %c4_108 = arith.constant 4 : index
    %c0_109 = arith.constant 0 : index
    %c0_110 = arith.constant 0 : index
    %152 = vector.load %arg4[%c4_108, %c0_109, %c0_110] : memref<8x1x192xf32, #tpu.memory_space<vmem>>, vector<1x1x192xf32>
    %153 = vector.shape_cast %152 : vector<1x1x192xf32> to vector<1x192xf32>
    %cst_111 = arith.constant dense<0.000000e+00> : vector<4x192xf32>
    %154 = tpu.matmul %149, %151, %cst_111 {dimension_numbers = #tpu.dot_dimension_numbers<[1], [0], [0], [1], [0, 0, 1, 1], [], []>} : vector<4x96xbf16>, vector<96x192xbf16>, vector<4x192xf32> -> vector<4x192xf32>
    %155 = vector.broadcast %153 : vector<1x192xf32> to vector<4x192xf32>
    %156 = arith.addf %154, %155 : vector<4x192xf32>
    %cst_112 = arith.constant 0.000000e+00 : f32
    %157 = vector.broadcast %cst_112 : f32 to vector<4x192xf32>
    %158 = arith.maximumf %156, %157 : vector<4x192xf32>
    %159 = arith.truncf %158 : vector<4x192xf32> to vector<4x192xbf16>
    %c4_113 = arith.constant 4 : index
    %c0_114 = arith.constant 0 : index
    %c0_115 = arith.constant 0 : index
    %160 = vector.load %arg5[%c4_113, %c0_114, %c0_115] : memref<8x192x384xbf16, #tpu.memory_space<vmem>>, vector<1x192x384xbf16>
    %161 = vector.shape_cast %160 : vector<1x192x384xbf16> to vector<192x384xbf16>
    %c4_116 = arith.constant 4 : index
    %c0_117 = arith.constant 0 : index
    %c0_118 = arith.constant 0 : index
    %162 = vector.load %arg6[%c4_116, %c0_117, %c0_118] : memref<8x1x384xf32, #tpu.memory_space<vmem>>, vector<1x1x384xf32>
    %163 = vector.shape_cast %162 : vector<1x1x384xf32> to vector<1x384xf32>
    %cst_119 = arith.constant dense<0.000000e+00> : vector<4x384xf32>
    %164 = tpu.matmul %159, %161, %cst_119 {dimension_numbers = #tpu.dot_dimension_numbers<[1], [0], [0], [1], [0, 0, 1, 1], [], []>} : vector<4x192xbf16>, vector<192x384xbf16>, vector<4x384xf32> -> vector<4x384xf32>
    %165 = vector.broadcast %163 : vector<1x384xf32> to vector<4x384xf32>
    %166 = arith.addf %164, %165 : vector<4x384xf32>
    %cst_120 = arith.constant 0.000000e+00 : f32
    %167 = vector.broadcast %cst_120 : f32 to vector<4x384xf32>
    %168 = arith.maximumf %166, %167 : vector<4x384xf32>
    %169 = arith.truncf %168 : vector<4x384xf32> to vector<4x384xbf16>
    %c5 = arith.constant 5 : index
    %c0_121 = arith.constant 0 : index
    %c0_122 = arith.constant 0 : index
    %170 = vector.load %arg1[%c5, %c0_121, %c0_122] : memref<8x24x96xbf16, #tpu.memory_space<vmem>>, vector<1x24x96xbf16>
    %171 = vector.shape_cast %170 : vector<1x24x96xbf16> to vector<24x96xbf16>
    %c5_123 = arith.constant 5 : index
    %c0_124 = arith.constant 0 : index
    %c0_125 = arith.constant 0 : index
    %172 = vector.load %arg2[%c5_123, %c0_124, %c0_125] : memref<8x1x96xf32, #tpu.memory_space<vmem>>, vector<1x1x96xf32>
    %173 = vector.shape_cast %172 : vector<1x1x96xf32> to vector<1x96xf32>
    %cst_126 = arith.constant dense<0.000000e+00> : vector<4x96xf32>
    %174 = tpu.matmul %19, %171, %cst_126 {dimension_numbers = #tpu.dot_dimension_numbers<[1], [0], [0], [1], [0, 0, 1, 1], [], []>} : vector<4x24xbf16>, vector<24x96xbf16>, vector<4x96xf32> -> vector<4x96xf32>
    %175 = vector.broadcast %173 : vector<1x96xf32> to vector<4x96xf32>
    %176 = arith.addf %174, %175 : vector<4x96xf32>
    %cst_127 = arith.constant 0.000000e+00 : f32
    %177 = vector.broadcast %cst_127 : f32 to vector<4x96xf32>
    %178 = arith.maximumf %176, %177 : vector<4x96xf32>
    %179 = arith.truncf %178 : vector<4x96xf32> to vector<4x96xbf16>
    %c5_128 = arith.constant 5 : index
    %c0_129 = arith.constant 0 : index
    %c0_130 = arith.constant 0 : index
    %180 = vector.load %arg3[%c5_128, %c0_129, %c0_130] : memref<8x96x192xbf16, #tpu.memory_space<vmem>>, vector<1x96x192xbf16>
    %181 = vector.shape_cast %180 : vector<1x96x192xbf16> to vector<96x192xbf16>
    %c5_131 = arith.constant 5 : index
    %c0_132 = arith.constant 0 : index
    %c0_133 = arith.constant 0 : index
    %182 = vector.load %arg4[%c5_131, %c0_132, %c0_133] : memref<8x1x192xf32, #tpu.memory_space<vmem>>, vector<1x1x192xf32>
    %183 = vector.shape_cast %182 : vector<1x1x192xf32> to vector<1x192xf32>
    %cst_134 = arith.constant dense<0.000000e+00> : vector<4x192xf32>
    %184 = tpu.matmul %179, %181, %cst_134 {dimension_numbers = #tpu.dot_dimension_numbers<[1], [0], [0], [1], [0, 0, 1, 1], [], []>} : vector<4x96xbf16>, vector<96x192xbf16>, vector<4x192xf32> -> vector<4x192xf32>
    %185 = vector.broadcast %183 : vector<1x192xf32> to vector<4x192xf32>
    %186 = arith.addf %184, %185 : vector<4x192xf32>
    %cst_135 = arith.constant 0.000000e+00 : f32
    %187 = vector.broadcast %cst_135 : f32 to vector<4x192xf32>
    %188 = arith.maximumf %186, %187 : vector<4x192xf32>
    %189 = arith.truncf %188 : vector<4x192xf32> to vector<4x192xbf16>
    %c5_136 = arith.constant 5 : index
    %c0_137 = arith.constant 0 : index
    %c0_138 = arith.constant 0 : index
    %190 = vector.load %arg5[%c5_136, %c0_137, %c0_138] : memref<8x192x384xbf16, #tpu.memory_space<vmem>>, vector<1x192x384xbf16>
    %191 = vector.shape_cast %190 : vector<1x192x384xbf16> to vector<192x384xbf16>
    %c5_139 = arith.constant 5 : index
    %c0_140 = arith.constant 0 : index
    %c0_141 = arith.constant 0 : index
    %192 = vector.load %arg6[%c5_139, %c0_140, %c0_141] : memref<8x1x384xf32, #tpu.memory_space<vmem>>, vector<1x1x384xf32>
    %193 = vector.shape_cast %192 : vector<1x1x384xf32> to vector<1x384xf32>
    %cst_142 = arith.constant dense<0.000000e+00> : vector<4x384xf32>
    %194 = tpu.matmul %189, %191, %cst_142 {dimension_numbers = #tpu.dot_dimension_numbers<[1], [0], [0], [1], [0, 0, 1, 1], [], []>} : vector<4x192xbf16>, vector<192x384xbf16>, vector<4x384xf32> -> vector<4x384xf32>
    %195 = vector.broadcast %193 : vector<1x384xf32> to vector<4x384xf32>
    %196 = arith.addf %194, %195 : vector<4x384xf32>
    %cst_143 = arith.constant 0.000000e+00 : f32
    %197 = vector.broadcast %cst_143 : f32 to vector<4x384xf32>
    %198 = arith.maximumf %196, %197 : vector<4x384xf32>
    %199 = arith.truncf %198 : vector<4x384xf32> to vector<4x384xbf16>
    %c6 = arith.constant 6 : index
    %c0_144 = arith.constant 0 : index
    %c0_145 = arith.constant 0 : index
    %200 = vector.load %arg1[%c6, %c0_144, %c0_145] : memref<8x24x96xbf16, #tpu.memory_space<vmem>>, vector<1x24x96xbf16>
    %201 = vector.shape_cast %200 : vector<1x24x96xbf16> to vector<24x96xbf16>
    %c6_146 = arith.constant 6 : index
    %c0_147 = arith.constant 0 : index
    %c0_148 = arith.constant 0 : index
    %202 = vector.load %arg2[%c6_146, %c0_147, %c0_148] : memref<8x1x96xf32, #tpu.memory_space<vmem>>, vector<1x1x96xf32>
    %203 = vector.shape_cast %202 : vector<1x1x96xf32> to vector<1x96xf32>
    %cst_149 = arith.constant dense<0.000000e+00> : vector<4x96xf32>
    %204 = tpu.matmul %19, %201, %cst_149 {dimension_numbers = #tpu.dot_dimension_numbers<[1], [0], [0], [1], [0, 0, 1, 1], [], []>} : vector<4x24xbf16>, vector<24x96xbf16>, vector<4x96xf32> -> vector<4x96xf32>
    %205 = vector.broadcast %203 : vector<1x96xf32> to vector<4x96xf32>
    %206 = arith.addf %204, %205 : vector<4x96xf32>
    %cst_150 = arith.constant 0.000000e+00 : f32
    %207 = vector.broadcast %cst_150 : f32 to vector<4x96xf32>
    %208 = arith.maximumf %206, %207 : vector<4x96xf32>
    %209 = arith.truncf %208 : vector<4x96xf32> to vector<4x96xbf16>
    %c6_151 = arith.constant 6 : index
    %c0_152 = arith.constant 0 : index
    %c0_153 = arith.constant 0 : index
    %210 = vector.load %arg3[%c6_151, %c0_152, %c0_153] : memref<8x96x192xbf16, #tpu.memory_space<vmem>>, vector<1x96x192xbf16>
    %211 = vector.shape_cast %210 : vector<1x96x192xbf16> to vector<96x192xbf16>
    %c6_154 = arith.constant 6 : index
    %c0_155 = arith.constant 0 : index
    %c0_156 = arith.constant 0 : index
    %212 = vector.load %arg4[%c6_154, %c0_155, %c0_156] : memref<8x1x192xf32, #tpu.memory_space<vmem>>, vector<1x1x192xf32>
    %213 = vector.shape_cast %212 : vector<1x1x192xf32> to vector<1x192xf32>
    %cst_157 = arith.constant dense<0.000000e+00> : vector<4x192xf32>
    %214 = tpu.matmul %209, %211, %cst_157 {dimension_numbers = #tpu.dot_dimension_numbers<[1], [0], [0], [1], [0, 0, 1, 1], [], []>} : vector<4x96xbf16>, vector<96x192xbf16>, vector<4x192xf32> -> vector<4x192xf32>
    %215 = vector.broadcast %213 : vector<1x192xf32> to vector<4x192xf32>
    %216 = arith.addf %214, %215 : vector<4x192xf32>
    %cst_158 = arith.constant 0.000000e+00 : f32
    %217 = vector.broadcast %cst_158 : f32 to vector<4x192xf32>
    %218 = arith.maximumf %216, %217 : vector<4x192xf32>
    %219 = arith.truncf %218 : vector<4x192xf32> to vector<4x192xbf16>
    %c6_159 = arith.constant 6 : index
    %c0_160 = arith.constant 0 : index
    %c0_161 = arith.constant 0 : index
    %220 = vector.load %arg5[%c6_159, %c0_160, %c0_161] : memref<8x192x384xbf16, #tpu.memory_space<vmem>>, vector<1x192x384xbf16>
    %221 = vector.shape_cast %220 : vector<1x192x384xbf16> to vector<192x384xbf16>
    %c6_162 = arith.constant 6 : index
    %c0_163 = arith.constant 0 : index
    %c0_164 = arith.constant 0 : index
    %222 = vector.load %arg6[%c6_162, %c0_163, %c0_164] : memref<8x1x384xf32, #tpu.memory_space<vmem>>, vector<1x1x384xf32>
    %223 = vector.shape_cast %222 : vector<1x1x384xf32> to vector<1x384xf32>
    %cst_165 = arith.constant dense<0.000000e+00> : vector<4x384xf32>
    %224 = tpu.matmul %219, %221, %cst_165 {dimension_numbers = #tpu.dot_dimension_numbers<[1], [0], [0], [1], [0, 0, 1, 1], [], []>} : vector<4x192xbf16>, vector<192x384xbf16>, vector<4x384xf32> -> vector<4x384xf32>
    %225 = vector.broadcast %223 : vector<1x384xf32> to vector<4x384xf32>
    %226 = arith.addf %224, %225 : vector<4x384xf32>
    %cst_166 = arith.constant 0.000000e+00 : f32
    %227 = vector.broadcast %cst_166 : f32 to vector<4x384xf32>
    %228 = arith.maximumf %226, %227 : vector<4x384xf32>
    %229 = arith.truncf %228 : vector<4x384xf32> to vector<4x384xbf16>
    %c7 = arith.constant 7 : index
    %c0_167 = arith.constant 0 : index
    %c0_168 = arith.constant 0 : index
    %230 = vector.load %arg1[%c7, %c0_167, %c0_168] : memref<8x24x96xbf16, #tpu.memory_space<vmem>>, vector<1x24x96xbf16>
    %231 = vector.shape_cast %230 : vector<1x24x96xbf16> to vector<24x96xbf16>
    %c7_169 = arith.constant 7 : index
    %c0_170 = arith.constant 0 : index
    %c0_171 = arith.constant 0 : index
    %232 = vector.load %arg2[%c7_169, %c0_170, %c0_171] : memref<8x1x96xf32, #tpu.memory_space<vmem>>, vector<1x1x96xf32>
    %233 = vector.shape_cast %232 : vector<1x1x96xf32> to vector<1x96xf32>
    %cst_172 = arith.constant dense<0.000000e+00> : vector<4x96xf32>
    %234 = tpu.matmul %19, %231, %cst_172 {dimension_numbers = #tpu.dot_dimension_numbers<[1], [0], [0], [1], [0, 0, 1, 1], [], []>} : vector<4x24xbf16>, vector<24x96xbf16>, vector<4x96xf32> -> vector<4x96xf32>
    %235 = vector.broadcast %233 : vector<1x96xf32> to vector<4x96xf32>
    %236 = arith.addf %234, %235 : vector<4x96xf32>
    %cst_173 = arith.constant 0.000000e+00 : f32
    %237 = vector.broadcast %cst_173 : f32 to vector<4x96xf32>
    %238 = arith.maximumf %236, %237 : vector<4x96xf32>
    %239 = arith.truncf %238 : vector<4x96xf32> to vector<4x96xbf16>
    %c7_174 = arith.constant 7 : index
    %c0_175 = arith.constant 0 : index
    %c0_176 = arith.constant 0 : index
    %240 = vector.load %arg3[%c7_174, %c0_175, %c0_176] : memref<8x96x192xbf16, #tpu.memory_space<vmem>>, vector<1x96x192xbf16>
    %241 = vector.shape_cast %240 : vector<1x96x192xbf16> to vector<96x192xbf16>
    %c7_177 = arith.constant 7 : index
    %c0_178 = arith.constant 0 : index
    %c0_179 = arith.constant 0 : index
    %242 = vector.load %arg4[%c7_177, %c0_178, %c0_179] : memref<8x1x192xf32, #tpu.memory_space<vmem>>, vector<1x1x192xf32>
    %243 = vector.shape_cast %242 : vector<1x1x192xf32> to vector<1x192xf32>
    %cst_180 = arith.constant dense<0.000000e+00> : vector<4x192xf32>
    %244 = tpu.matmul %239, %241, %cst_180 {dimension_numbers = #tpu.dot_dimension_numbers<[1], [0], [0], [1], [0, 0, 1, 1], [], []>} : vector<4x96xbf16>, vector<96x192xbf16>, vector<4x192xf32> -> vector<4x192xf32>
    %245 = vector.broadcast %243 : vector<1x192xf32> to vector<4x192xf32>
    %246 = arith.addf %244, %245 : vector<4x192xf32>
    %cst_181 = arith.constant 0.000000e+00 : f32
    %247 = vector.broadcast %cst_181 : f32 to vector<4x192xf32>
    %248 = arith.maximumf %246, %247 : vector<4x192xf32>
    %249 = arith.truncf %248 : vector<4x192xf32> to vector<4x192xbf16>
    %c7_182 = arith.constant 7 : index
    %c0_183 = arith.constant 0 : index
    %c0_184 = arith.constant 0 : index
    %250 = vector.load %arg5[%c7_182, %c0_183, %c0_184] : memref<8x192x384xbf16, #tpu.memory_space<vmem>>, vector<1x192x384xbf16>
    %251 = vector.shape_cast %250 : vector<1x192x384xbf16> to vector<192x384xbf16>
    %c7_185 = arith.constant 7 : index
    %c0_186 = arith.constant 0 : index
    %c0_187 = arith.constant 0 : index
    %252 = vector.load %arg6[%c7_185, %c0_186, %c0_187] : memref<8x1x384xf32, #tpu.memory_space<vmem>>, vector<1x1x384xf32>
    %253 = vector.shape_cast %252 : vector<1x1x384xf32> to vector<1x384xf32>
    %cst_188 = arith.constant dense<0.000000e+00> : vector<4x384xf32>
    %254 = tpu.matmul %249, %251, %cst_188 {dimension_numbers = #tpu.dot_dimension_numbers<[1], [0], [0], [1], [0, 0, 1, 1], [], []>} : vector<4x192xbf16>, vector<192x384xbf16>, vector<4x384xf32> -> vector<4x384xf32>
    %255 = vector.broadcast %253 : vector<1x384xf32> to vector<4x384xf32>
    %256 = arith.addf %254, %255 : vector<4x384xf32>
    %cst_189 = arith.constant 0.000000e+00 : f32
    %257 = vector.broadcast %cst_189 : f32 to vector<4x384xf32>
    %258 = arith.maximumf %256, %257 : vector<4x384xf32>
    %259 = arith.truncf %258 : vector<4x384xf32> to vector<4x384xbf16>
    %260 = tpu.concatenate %49, %79, %109, %139, %169, %199, %229, %259 in 1 : vector<4x384xbf16>, vector<4x384xbf16>, vector<4x384xbf16>, vector<4x384xbf16>, vector<4x384xbf16>, vector<4x384xbf16>, vector<4x384xbf16>, vector<4x384xbf16> -> vector<4x3072xbf16>
    %c0_190 = arith.constant 0 : index
    %c0_191 = arith.constant 0 : index
    %261 = vector.load %arg7[%c0_190, %c0_191] : memref<3072x27xbf16, #tpu.memory_space<vmem>>, vector<3072x27xbf16>
    %cst_192 = arith.constant dense<0.000000e+00> : vector<4x27xf32>
    %262 = tpu.matmul %260, %261, %cst_192 {dimension_numbers = #tpu.dot_dimension_numbers<[1], [0], [0], [1], [0, 0, 1, 1], [], []>} : vector<4x3072xbf16>, vector<3072x27xbf16>, vector<4x27xf32> -> vector<4x27xf32>
    %c0_193 = arith.constant 0 : index
    %c0_194 = arith.constant 0 : index
    %263 = vector.load %arg8[%c0_193, %c0_194] : memref<1x27xf32, #tpu.memory_space<vmem>>, vector<1x27xf32>
    %264 = vector.broadcast %263 : vector<1x27xf32> to vector<4x27xf32>
    %265 = arith.addf %262, %264 : vector<4x27xf32>
    %266 = math.tanh %265 : vector<4x27xf32>
    %cst_195 = arith.constant 1.000000e+01 : f32
    %267 = vector.broadcast %cst_195 : f32 to vector<4x27xf32>
    %268 = arith.mulf %267, %266 : vector<4x27xf32>
    %c0_196 = arith.constant 0 : index
    %c0_197 = arith.constant 0 : index
    %269 = vector.load %arg9[%c0_196, %c0_197] : memref<1x27xf32, #tpu.memory_space<vmem>>, vector<1x27xf32>
    %270 = vector.broadcast %269 : vector<1x27xf32> to vector<4x27xf32>
    %271 = arith.addf %268, %270 : vector<4x27xf32>
    %cst_198 = arith.constant 0.000000e+00 : f32
    %272 = vector.broadcast %cst_198 : f32 to vector<4x101xf32>
    %273 = tpu.concatenate %271, %272 in 1 : vector<4x27xf32>, vector<4x101xf32> -> vector<4x128xf32>
    %c0_199 = arith.constant 0 : index
    %c0_200 = arith.constant 0 : index
    %274 = vector.load %arg10[%c0_199, %c0_200] : memref<4x128xf32, #tpu.memory_space<vmem>>, vector<4x128xf32>
    tpu.vector_store %arg10[%c0_199, %c0_200], %273 {strides = array<i32>} : memref<4x128xf32, #tpu.memory_space<vmem>>, vector<4x128xf32>,
    return
  }
}

</mosaic_0001>

<bundles_post_ra>
// kernel: net_independent_forward.1
= control target key start
LH: loop header
LB: loop body
LE: loop exit
PB: predicated region body
PF: predicated region fallthrough
CT: control target
= control target key end

     0   :  { %15 = vsyncpa [#allocation3], 0  ;;  %s9947_s0 = inlined_call_operand.hbm [shape: f32[4,24], index: 0, kind: input, shape index: {}]   ;;  %s9948_s1 = inlined_call_operand.hbm [shape: bf16[8,24,96], index: 1, kind: input, shape index: {}]   ;;  %s9949_s2 = inlined_call_operand.hbm [shape: f32[8,1,96], index: 2, kind: input, shape index: {}]   ;;  %s9950_s3 = inlined_call_operand.vmem [shape: bf16[8,96,192], index: 3, kind: input, shape index: {}]   ;;  %s9951_s4 = inlined_call_operand.hbm [shape: f32[8,1,192], index: 4, kind: input, shape index: {}]   ;;  %s9952_s5 = inlined_call_operand.hbm [shape: bf16[8,192,384], index: 5, kind: input, shape index: {}]   ;;  %s9953_s6 = inlined_call_operand.hbm [shape: f32[8,1,384], index: 6, kind: input, shape index: {}]   ;;  %s9954_s7 = inlined_call_operand.vmem [shape: bf16[3072,27], index: 7, kind: input, shape index: {}]   ;;  %s9955_s8 = inlined_call_operand.hbm [shape: f32[1,27], index: 8, kind: input, shape index: {}]   ;;  %s9956_s9 = inlined_call_operand.vmem [shape: f32[1,27], index: 9, kind: input, shape index: {}]   ;;  %s9957_s10 = inlined_call_operand.vmem [shape: f32[4,128], index: 10, kind: output, shape index: {}]  }
   0x1   :  { %16 = vsyncpa [#allocation5], 0 }
   0x2   :  { %17 = vsyncpa [#allocation8], 0 }
   0x3   :  { %18 = vsyncpa [#allocation11], 0  ;;  %s8581_s13 = smov [#allocation4]   ;;  %s8419_s17 = scalar_lea.hbm %s9948_s1, 1536 }
   0x4   :  { %s34_s14 = sshll.u32 %s8581_s13, 4  ;;  %p8420_p0 = scmp.ne.s32.totalorder %s9948_s1, %s8419_s17  ;;  %s35_s14 = int_to_ptr.vmem [resolvable:$true] %s34_s14 }
   0x5   :  { %p8423_p1 = scmp.lt.u32.totalorder %s8419_s17, %s9948_s1 }
   0x7   :  { %p8425_p2 = pnand %p8423_p1, %p8420_p0 }
   0x9   :  { %8428 = shalt.err (!%p8425_p2)
}
   0xa   :  { %s8429_s22 = scalar_lea.vmem %s35_s14, 1536  ;;  %p8434_p4 = scmp.lt.s32.totalorder %s35_s14, %s35_s14 }
   0xb   :  { %p8430_p3 = scmp.ne.s32.totalorder %s35_s14, %s8429_s22  ;;  %p8435_p5 = scmp.lt.s32.totalorder %s8429_s22, %s8429_s22 }
   0xd   :  { %p8436_p6 = por %p8435_p5, %p8434_p4 }
   0xf   :  { %p8437_p7 = pnand %p8436_p6, %p8430_p3 }
  0x11   :  { %8440 = shalt.err (!%p8437_p7)
}
  0x12   :  { %s8582_s23 = smov 64   ;;  %s8583_s24 = smov 4  }
  0x13   :  { %40 = dma.hbm_to_vmem [thread:$0]  %s9948_s1, 1536, %s35_s14, [#allocation5], %s8582_s23, %s8582_s23, %s8583_s24  }
  0x14   :  { %s8584_s27 = smov [#allocation7]   ;;  %s8441_s11 = scalar_lea.hbm %s9951_s4, 256 }
  0x15   :  { %s60_s28 = sshll.u32 %s8584_s27, 4  ;;  %p8442_p8 = scmp.ne.s32.totalorder %s9951_s4, %s8441_s11  ;;  %s61_s28 = int_to_ptr.vmem [resolvable:$true] %s60_s28 }
  0x16   :  { %p8445_p9 = scmp.lt.u32.totalorder %s8441_s11, %s9951_s4 }
  0x18   :  { %p8447_p10 = pnand %p8445_p9, %p8442_p8 }
  0x1a   :  { %8450 = shalt.err (!%p8447_p10)
}
  0x1b   :  { %s8451_s17 = scalar_lea.vmem %s61_s28, 256  ;;  %p8456_p12 = scmp.lt.s32.totalorder %s61_s28, %s61_s28 }
  0x1c   :  { %p8452_p11 = scmp.ne.s32.totalorder %s61_s28, %s8451_s17  ;;  %p8457_p13 = scmp.lt.s32.totalorder %s8451_s17, %s8451_s17 }
  0x1e   :  { %p8458_p0 = por %p8457_p13, %p8456_p12 }
  0x20   :  { %p8459_p1 = pnand %p8458_p0, %p8452_p11 }
  0x22   :  { %8462 = shalt.err (!%p8459_p1)
}
  0x23   :  { %s8585_s1 = smov 32   ;;  %s8586_s14 = smov 2  }
  0x24   :  { %66 = dma.hbm_to_vmem [thread:$0]  %s9951_s4, 256, %s61_s28, [#allocation8], %s8585_s1, %s8585_s1, %s8586_s14  }
  0x25   :  { %s8587_s20 = smov [#allocation10]   ;;  %s8463_s24 = scalar_lea.hbm %s9953_s6, 384 }
  0x26   :  { %s84_s21 = sshll.u32 %s8587_s20, 4  ;;  %p8464_p2 = scmp.ne.s32.totalorder %s9953_s6, %s8463_s24  ;;  %s85_s21 = int_to_ptr.vmem [resolvable:$true] %s84_s21 }
  0x27   :  { %p8467_p3 = scmp.lt.u32.totalorder %s8463_s24, %s9953_s6 }
  0x29   :  { %p8469_p4 = pnand %p8467_p3, %p8464_p2 }
  0x2b   :  { %8472 = shalt.err (!%p8469_p4)
}
  0x2c   :  { %s8473_s30 = scalar_lea.vmem %s85_s21, 384  ;;  %p8478_p6 = scmp.lt.s32.totalorder %s85_s21, %s85_s21 }
  0x2d   :  { %p8474_p5 = scmp.ne.s32.totalorder %s85_s21, %s8473_s30  ;;  %p8479_p7 = scmp.lt.s32.totalorder %s8473_s30, %s8473_s30 }
  0x2f   :  { %p8480_p8 = por %p8479_p7, %p8478_p6 }
  0x31   :  { %p8481_p9 = pnand %p8480_p8, %p8474_p5 }
  0x33   :  { %8484 = shalt.err (!%p8481_p9)
}
  0x34   :  { %s8588_s4 = smov 48   ;;  %s8589_s28 = smov 3  }
  0x35   :  { %90 = dma.hbm_to_vmem [thread:$0]  %s9953_s6, 384, %s85_s21, [#allocation11], %s8588_s4, %s8588_s4, %s8589_s28  }
  0x36   :  { %s8590_s13 = smov [#allocation2]   ;;  %s8591_s16 = smov [#allocation6]  }
  0x37   :  { %s25_s15 = sshll.u32 %s8590_s13, 4  ;;  %s46_s17 = sshll.u32 %s8591_s16, 4  ;;  %s26_s15 = int_to_ptr.vmem [resolvable:$true] %s25_s15  ;;  %s47_s17 = int_to_ptr.vmem [resolvable:$true] %s46_s17 }
  0x38   :  { %s8485_s18 = scalar_lea.hbm %s9947_s0, 64 }
  0x39   :  { %p8486_p10 = scmp.ne.s32.totalorder %s9947_s0, %s8485_s18  ;;  %p8489_p11 = scmp.lt.u32.totalorder %s8485_s18, %s9947_s0 }
  0x3b   :  { %p8491_p12 = pnand %p8489_p11, %p8486_p10 }
  0x3d   :  { %8494 = shalt.err (!%p8491_p12)
}
  0x3e   :  { %s8495_s6 = scalar_lea.vmem %s26_s15, 64  ;;  %p8500_p0 = scmp.lt.s32.totalorder %s26_s15, %s26_s15 }
  0x3f   :  { %p8496_p13 = scmp.ne.s32.totalorder %s26_s15, %s8495_s6  ;;  %p8501_p1 = scmp.lt.s32.totalorder %s8495_s6, %s8495_s6 }
  0x41   :  { %p8502_p2 = por %p8501_p1, %p8500_p0 }
  0x43   :  { %p8503_p3 = pnand %p8502_p2, %p8496_p13 }
  0x45   :  { %8506 = shalt.err (!%p8503_p3)
}
  0x46   :  { %28 = dma.hbm_to_vmem [thread:$0]  %s9947_s0, 64, %s26_s15, [#allocation3]  }
  0x47   :  { %s8507_s27 = scalar_lea.hbm %s9949_s2, 128 }
  0x48   :  { %p8508_p4 = scmp.ne.s32.totalorder %s9949_s2, %s8507_s27  ;;  %p8511_p5 = scmp.lt.u32.totalorder %s8507_s27, %s9949_s2 }
  0x4a   :  { %p8513_p6 = pnand %p8511_p5, %p8508_p4 }
  0x4c   :  { %8516 = shalt.err (!%p8513_p6)
}
  0x4d   :  { %s8517_s11 = scalar_lea.vmem %s47_s17, 128  ;;  %p8522_p8 = scmp.lt.s32.totalorder %s47_s17, %s47_s17 }
  0x4e   :  { %p8518_p7 = scmp.ne.s32.totalorder %s47_s17, %s8517_s11  ;;  %p8523_p9 = scmp.lt.s32.totalorder %s8517_s11, %s8517_s11 }
  0x50   :  { %p8524_p10 = por %p8523_p9, %p8522_p8 }
  0x52   :  { %p8525_p11 = pnand %p8524_p10, %p8518_p7 }
  0x54   :  { %8528 = shalt.err (!%p8525_p11)
}
  0x55   :  { %s8592_s0 = smov 16   ;;  %s8593_s12 = smov 1  }
  0x56   :  { %52 = dma.hbm_to_vmem [thread:$0]  %s9949_s2, 128, %s47_s17, [#allocation5], %s8592_s0, %s8592_s0, %s8593_s12  }
  0x57   :  { %s8594_s16 = smov [#allocation9]   ;;  %s8529_s19 = scalar_lea.hbm %s9952_s5, 36864 }
  0x58   :  { %s72_s1 = sshll.u32 %s8594_s16, 4  ;;  %p8530_p12 = scmp.ne.s32.totalorder %s9952_s5, %s8529_s19  ;;  %s73_s1 = int_to_ptr.vmem [resolvable:$true] %s72_s1 }
  0x59   :  { %p8533_p13 = scmp.lt.u32.totalorder %s8529_s19, %s9952_s5 }
  0x5b   :  { %p8535_p0 = pnand %p8533_p13, %p8530_p12 }
  0x5d   :  { %8538 = shalt.err (!%p8535_p0)
}
  0x5e   :  { %s8539_s21 = scalar_lea.vmem %s73_s1, 36864  ;;  %p8544_p2 = scmp.lt.s32.totalorder %s73_s1, %s73_s1 }
  0x5f   :  { %p8540_p1 = scmp.ne.s32.totalorder %s73_s1, %s8539_s21  ;;  %p8545_p3 = scmp.lt.s32.totalorder %s8539_s21, %s8539_s21 }
  0x61   :  { %p8546_p4 = por %p8545_p3, %p8544_p2 }
  0x63   :  { %p8547_p5 = pnand %p8546_p4, %p8540_p1 }
  0x65   :  { %8550 = shalt.err (!%p8547_p5)
}
  0x66   :  { %s8595_s2 = smov 192   ;;  %s8596_s17 = smov 12  }
  0x67   :  { %78 = dma.hbm_to_vmem [thread:$0]  %s9952_s5, 36864, %s73_s1, [#allocation8], %s8595_s2, %s8595_s2, %s8596_s17  }
  0x68   :  { %s8597_s26 = smov [#allocation12]   ;;  %s8551_s4 = scalar_lea.hbm %s9955_s8, 16 }
  0x69   :  { %s99_s27 = sshll.u32 %s8597_s26, 4  ;;  %p8552_p6 = scmp.ne.s32.totalorder %s9955_s8, %s8551_s4  ;;  %s100_s27 = int_to_ptr.vmem [resolvable:$true] %s99_s27 }
  0x6a   :  { %p8555_p7 = scmp.lt.u32.totalorder %s8551_s4, %s9955_s8 }
  0x6c   :  { %p8557_p8 = pnand %p8555_p7, %p8552_p6 }
  0x6e   :  { %8560 = shalt.err (!%p8557_p8)
}
  0x6f   :  { %s8561_s13 = scalar_lea.vmem %s100_s27, 16  ;;  %s8565_s5 = scalar_lea.vmem %s100_s27, 32 }
  0x70   :  { %p8562_p9 = scmp.ne.s32.totalorder %s100_s27, %s8561_s13  ;;  %p8566_p10 = scmp.lt.s32.totalorder %s100_s27, %s100_s27 }
  0x71   :  { %p8567_p11 = scmp.lt.s32.totalorder %s8565_s5, %s8561_s13 }
  0x73   :  { %p8568_p12 = por %p8567_p11, %p8566_p10 }
  0x75   :  { %p8569_p13 = pnand %p8568_p12, %p8562_p9 }
  0x77   :  { %8572 = shalt.err (!%p8569_p13)
}
  0x78   :  { %102 = dma.hbm_to_vmem [thread:$0]  %s9955_s8, 16, %s100_s27, [#allocation11]  }
  0x79   :  { %8573 = dma.done.wait [#allocation3], 64  }
  0x7a   :  { %8574 = vsyncadd [#allocation3], 4294967232 }
  0x7b   :  { %8575 = dma.done.wait [#allocation5], 1664  }
  0x7c   :  { %8576 = vsyncadd [#allocation5], 4294965632 }
  0x7d   :  { %8577 = dma.done.wait [#allocation8], 37120  }
  0x7e   :  { %8578 = vsyncadd [#allocation8], 4294930176 }
  0x7f   :  { %8579 = dma.done.wait [#allocation11], 400  }
  0x80   :  { %8580 = vsyncadd [#allocation11], 4294966896  ;;  %v8598_v0 = vmov 0.0   ;;  %vm8599_vm0 = vmmov 0   ;;  %vm128_vm1 = vcmask 191488   ;;  %v7679_v1 = vld [vmem:[#allocation4] sm:$0xff]  }
  0x81   :  { %7595 = vmatprep.subr.bf16.mxu1 %v8598_v0  ;;  %7599 = vmatprep.mubr.msk.bf16.mxu1 %vm8599_vm0, %v8598_v0  ;;  %vm175_vm2 = vcmask 1043456   ;;  %v7680_v2 = vld [vmem:[#allocation4 + $0x8] ss:$0 sps:$4 sm:$0xff]   ;;  %v127_v3 = vld [vmem:[#allocation2] sm:$0xf]  ;;  %vm171_vm3 = vcmask 195584  }
  0x82   :  { %7596 = vmatpush3.bf16.msra.mxu1 %v7679_v1  ;;  %v129_v4 = vsel %vm128_vm1, %v127_v3, 0.0  ;;  %v177_v5 = vsel %vm175_vm2, %v7680_v2, 0  ;;  %v7683_v7 = vld [vmem:[%s9950_s3 + $0x4] ss:$8 sps:$4 sm:$0xff]   ;;  %v7681_v26 = vld [vmem:[%s9950_s3] ss:$8 sps:$4 sm:$0xff]  }
  0x83   :  { %7597 = vmatprep.subr.bf16.mxu1 %v8598_v0  ;;  %v130_v6 = vrot.slane %v129_v4, 4  ;;  %v7686_v28 = vld [vmem:[%s9950_s3 + $0x14] ss:$8 sps:$4 sm:$0xff]   ;;  %v7684_v30 = vld [vmem:[%s9950_s3 + $0x10] ss:$8 sps:$4 sm:$0xff]   ;;  %v8600_v39 = vmov 0  }
  0x84   :  { %v7689_v31 = vld [vmem:[%s9950_s3 + $0x24] ss:$8 sps:$4 sm:$0xff]   ;;  %v7687_v32 = vld [vmem:[%s9950_s3 + $0x20] ss:$8 sps:$4 sm:$0xff]   ;;  %v7692_v33 = vld [vmem:[%s9950_s3 + $0x34] ss:$8 sps:$4 sm:$0xff]  }
  0x85   :  { %v131_v8 = vadd.f32 %v130_v6, %v129_v4  ;;  %v7690_v34 = vld [vmem:[%s9950_s3 + $0x30] ss:$8 sps:$4 sm:$0xff]   ;;  %v7695_v35 = vld [vmem:[%s9950_s3 + $0x44] ss:$8 sps:$4 sm:$0xff]   ;;  %v7693_v36 = vld [vmem:[%s9950_s3 + $0x40] ss:$8 sps:$4 sm:$0xff]  }
  0x86   :  { %7598 = vmatpush3.bf16.msra.mxu1 %v177_v5  ;;  %v7698_v37 = vld [vmem:[%s9950_s3 + $0x54] ss:$8 sps:$4 sm:$0xff]   ;;  %v7696_v38 = vld [vmem:[%s9950_s3 + $0x50] ss:$8 sps:$4 sm:$0xff]   ;;  %v7699_v40 = vld [vmem:[#allocation9 + $0x4] ss:$12 sps:$4 sm:$0xff]  }
  0x87   :  { %v132_v9 = vrot.slane %v131_v8, 2  ;;  %309 = vmatprep.subr.bf16.mxu1 %v7683_v7  ;;  %v7701_v41 = vld [vmem:[#allocation9] ss:$12 sps:$4 sm:$0xff]   ;;  %v7703_v42 = vld [vmem:[#allocation9 + $0x1c] ss:$12 sps:$4 sm:$0xff]   ;;  %615 = vmatprep.subr.bf16.mxu0 %v7699_v40  ;;  %vm305_vm4 = vcmask 785408  }
  0x88   :  { %v7705_v43 = vld [vmem:[#allocation9 + $0x18] ss:$12 sps:$4 sm:$0xff]   ;;  %616 = vmatpush1.bf16.msra.mxu0 %v7701_v41  ;;  %v7707_v44 = vld [vmem:[#allocation9 + $0x34] ss:$12 sps:$4 sm:$0xff]   ;;  %v7709_v45 = vld [vmem:[#allocation9 + $0x30] ss:$12 sps:$4 sm:$0xff]  }
  0x89   :  { %v133_v10 = vadd.f32 %v132_v9, %v131_v8  ;;  %617 = vmatprep.subr.bf16.mxu0 %v7703_v42  ;;  %v7711_v46 = vld [vmem:[#allocation9 + $0x4c] ss:$12 sps:$4 sm:$0xff]   ;;  %v7713_v47 = vld [vmem:[#allocation9 + $0x48] ss:$12 sps:$4 sm:$0xff]   ;;  %v7715_v48 = vld [vmem:[#allocation9 + $0x64] ss:$12 sps:$4 sm:$0xff]  }
  0x8a   :  { %v7717_v49 = vld [vmem:[#allocation9 + $0x60] ss:$12 sps:$4 sm:$0xff]   ;;  %v7719_v50 = vld [vmem:[#allocation9 + $0x7c] ss:$12 sps:$4 sm:$0xff]   ;;  %v7721_v51 = vld [vmem:[#allocation9 + $0x78] ss:$12 sps:$4 sm:$0xff]  }
  0x8b   :  { %v134_v11 = vrot.slane %v133_v10, 1  ;;  %v7723_v52 = vld [vmem:[#allocation9 + $0x94] ss:$12 sps:$4 sm:$0xff]   ;;  %v7725_v53 = vld [vmem:[#allocation9 + $0x90] ss:$12 sps:$4 sm:$0xff]   ;;  %vm611_vm5 = vcmask 523264  }
  0x8c   :  { %618 = vmatpush1.bf16.msra.mxu0 %v7705_v43  ;;  %v7727_v54 = vld [vmem:[#allocation9 + $0xac] ss:$12 sps:$4 sm:$0xff]   ;;  %v7729_v55 = vld [vmem:[#allocation9 + $0xa8] ss:$12 sps:$4 sm:$0xff]   ;;  %v7731_v56 = vld [vmem:[#allocation9 + $0xc4] ss:$12 sps:$4 sm:$0xff]  }
  0x8d   :  { %v135_v12 = vadd.f32 %v134_v11, %v133_v10  ;;  %619 = vmatprep.subr.bf16.mxu0 %v7707_v44  ;;  %v7733_v57 = vld [vmem:[#allocation9 + $0xc0] ss:$12 sps:$4 sm:$0xff]   ;;  %v7735_v58 = vld [vmem:[#allocation9 + $0xdc] ss:$12 sps:$4 sm:$0xff]   ;;  %v7737_v59 = vld [vmem:[#allocation9 + $0xd8] ss:$12 sps:$4 sm:$0xff]  }
  0x8e   :  { %v6589_v60 = vld [vmem:[#allocation6] ss:$0 sm:$0xff]  ;;  %v7706_v6 = vld [vmem:[#allocation9 + $0x20] ss:$12 sps:$4 sm:$0xff]   ;;  %v7710_v7 = vld [vmem:[#allocation9 + $0x38] ss:$12 sps:$4 sm:$0xff]  }
  0x8f   :  { %v137_v13 = vmul.f32 0.25, %v135_v12  ;;  %v7702_v2 = vld [vmem:[#allocation9 + $0x8] ss:$12 sps:$4 sm:$0xff]   ;;  %v7714_v8 = vld [vmem:[#allocation9 + $0x50] ss:$12 sps:$4 sm:$0xff]   ;;  %vm6578_vm6 = vcmask 220160  }
  0x90   :  { %620 = vmatpush1.bf16.msra.mxu0 %v7709_v45  ;;  %v7718_v9 = vld [vmem:[#allocation9 + $0x68] ss:$12 sps:$4 sm:$0xff]   ;;  %v7722_v10 = vld [vmem:[#allocation9 + $0x80] ss:$12 sps:$4 sm:$0xff]   ;;  %v7726_v11 = vld [vmem:[#allocation9 + $0x98] ss:$12 sps:$4 sm:$0xff]  }
  0x91   :  { %v138_v14 = vsub.f32 %v127_v3, %v137_v13  ;;  %621 = vmatprep.subr.bf16.mxu0 %v7711_v46  ;;  %v7730_v12 = vld [vmem:[#allocation9 + $0xb0] ss:$12 sps:$4 sm:$0xff]   ;;  %v7734_v13 = vld [vmem:[#allocation9 + $0xc8] ss:$12 sps:$4 sm:$0xff]   ;;  %v7749_v44 = vld [vmem:[%s9950_s3 + $0x60] ss:$8 sps:$4 sm:$0xff]  }
  0x92   :  { %v7748_v41 = vld [vmem:[#allocation4 + $0x14] ss:$0 sps:$4 sm:$0xff]   ;;  %v7751_v43 = vld [vmem:[%s9950_s3 + $0x64] ss:$8 sps:$4 sm:$0xff]   ;;  %v7754_v45 = vld [vmem:[%s9950_s3 + $0x74] ss:$8 sps:$4 sm:$0xff]  }
  0x93   :  { %v139_v15 = vmul.f32 %v138_v14, %v138_v14  ;;  %v724_v42 = vsel %vm175_vm2, %v7748_v41, 0  ;;  %v7752_v46 = vld [vmem:[%s9950_s3 + $0x70] ss:$8 sps:$4 sm:$0xff]  }
  0x94   :  { %622 = vmatpush1.bf16.msra.mxu0 %v7713_v47  ;;  %v7757_v47 = vld [vmem:[%s9950_s3 + $0x84] ss:$8 sps:$4 sm:$0xff]  }
  0x95   :  { %v140_v16 = vsel %vm128_vm1, %v139_v15, 0.0  ;;  %623 = vmatprep.subr.bf16.mxu0 %v7715_v48  ;;  %v7739_v15 = vld [vmem:[#allocation9 + $0xf4] ss:$12 sps:$4 sm:$0xff]   ;;  %v7755_v48 = vld [vmem:[%s9950_s3 + $0x80] ss:$8 sps:$4 sm:$0xff]  }
  0x96   :  { %v141_v17 = vrot.slane %v140_v16, 4  ;;  %v7802_v41 = vld [vmem:[#allocation9 + $0x1e8] ss:$12 sps:$4 sm:$0xff]  }
  0x98   :  { %v142_v18 = vadd.f32 %v141_v17, %v140_v16  ;;  %624 = vmatpush1.bf16.msra.mxu0 %v7717_v49  ;;  %v7741_v16 = vld [vmem:[#allocation9 + $0xf0] ss:$12 sps:$4 sm:$0xff]   ;;  %v7742_v17 = vld [vmem:[#allocation9 + $0xf8] ss:$12 sps:$4 sm:$0xff]  }
  0x99   :  { %625 = vmatprep.subr.bf16.mxu0 %v7719_v50  ;;  %v7760_v49 = vld [vmem:[%s9950_s3 + $0x94] ss:$8 sps:$4 sm:$0xff]   ;;  %v7758_v50 = vld [vmem:[%s9950_s3 + $0x90] ss:$8 sps:$4 sm:$0xff]  }
  0x9a   :  { %v143_v19 = vrot.slane %v142_v18, 2 }
  0x9c   :  { %v144_v20 = vadd.f32 %v143_v19, %v142_v18  ;;  %626 = vmatpush1.bf16.msra.mxu0 %v7721_v51  ;;  %v7743_v18 = vld [vmem:[#allocation9 + $0x10c] ss:$12 sps:$4 sm:$0xff]   ;;  %v7745_v19 = vld [vmem:[#allocation9 + $0x108] ss:$12 sps:$4 sm:$0xff]  }
  0x9d   :  { %627 = vmatprep.subr.bf16.mxu0 %v7723_v52  ;;  %v7763_v51 = vld [vmem:[%s9950_s3 + $0xa4] ss:$8 sps:$4 sm:$0xff]   ;;  %v7761_v52 = vld [vmem:[%s9950_s3 + $0xa0] ss:$8 sps:$4 sm:$0xff]  }
  0x9e   :  { %v145_v21 = vrot.slane %v144_v20, 1 }
  0xa0   :  { %v146_v22 = vadd.f32 %v145_v21, %v144_v20  ;;  %628 = vmatpush1.bf16.msra.mxu0 %v7725_v53  ;;  %v7746_v20 = vld [vmem:[#allocation9 + $0x110] ss:$12 sps:$4 sm:$0xff]   ;;  %v235_v21 = vlaneseq  ;;  %v7766_v53 = vld [vmem:[%s9950_s3 + $0xb4] ss:$8 sps:$4 sm:$0xff]  }
  0xa1   :  { %629 = vmatprep.subr.bf16.mxu0 %v7727_v54  ;;  %v7764_v54 = vld [vmem:[%s9950_s3 + $0xb0] ss:$8 sps:$4 sm:$0xff]  }
  0xa2   :  { %v147_v23 = vmul.f32 0.25, %v146_v22  ;;  %v8802_v22 = vshrl.u32 %v235_v21, 7 }
  0xa4   :  { %v148_v24 = vadd.f32 1e-05, %v147_v23  ;;  %630 = vmatpush1.bf16.msra.mxu0 %v7729_v55  ;;  %v8805_v23 = vsub.s32 0, %v8802_v22  ;;  %v7767_v55 = vld [vmem:[#allocation9 + $0x120] ss:$12 sps:$4 sm:$0xff]  }
  0xa5   :  { %631 = vmatprep.subr.bf16.mxu0 %v7731_v56  ;;  %v7769_v56 = vld [vmem:[#allocation9 + $0x124] ss:$12 sps:$4 sm:$0xff]  }
  0xa6   :  { %8415 = vrsqrt.f32 %v148_v24  ;;  %v233_v24 = vld [vmem:[#allocation7] sm:$0x3] }
  0xa8   :  { %632 = vmatpush1.bf16.msra.mxu0 %v7733_v57  ;;  %v7773_v57 = vld [vmem:[#allocation9 + $0x13c] ss:$12 sps:$4 sm:$0xff]  }
  0xa9   :  { %633 = vmatprep.subr.bf16.mxu0 %v7735_v58  ;;  %v7771_v58 = vld [vmem:[#allocation9 + $0x138] ss:$12 sps:$4 sm:$0xff]  }
  0xac   :  { %634 = vmatpush1.bf16.msra.mxu0 %v7737_v59  ;;  %v7777_v59 = vld [vmem:[#allocation9 + $0x154] ss:$12 sps:$4 sm:$0xff]  }
  0xad   :  { %635 = vmatprep.subr.bf16.mxu0 %v7739_v15 }
  0xb0   :  { %v8416_v25 = vpop.eup %8415  ;;  %636 = vmatpush1.bf16.msra.mxu0 %v7741_v16 }
  0xb1   :  { %v150_v27 = vmul.f32 %v8416_v25, %v138_v14  ;;  %v7738_v14 = vld [vmem:[#allocation9 + $0xe0] ss:$12 sps:$4 sm:$0xff]   ;;  %637 = vmatprep.subr.bf16.mxu0 %v7743_v18  ;;  %v8808_v25 = vsub.s32 1, %v8802_v22 }
  0xb3   :  { %v8756_v29 = vpack.c.bf16 %v150_v27, %v150_v27  ;;  %v242_v27 = vrot.slane %v233_v24, %v8808_v25 }
  0xb4   :  { %638 = vmatpush1.bf16.msra.mxu0 %v7745_v19 }
  0xb5   :  { %7600 = vmatmul.mubr.msk.bf16.vlgmr.msra.gmra.mrb[0].mxu1 %vm171_vm3, %v8756_v29  ;;  %7603 = vmatprep.subr.bf16.mxu0 %v8598_v0 }
  0xb6   :  { %310 = vmatpush1.bf16.msra.mxu1 %v7681_v26  ;;  %341 = vmatprep.mubr.bf16.mxu1 %v8600_v39  ;;  %v238_v26 = vrot.slane %v233_v24, %v8805_v23 }
  0xb7   :  { %311 = vmatprep.subr.bf16.mxu1 %v7686_v28 }
  0xba   :  { %312 = vmatpush1.bf16.msra.mxu1 %v7684_v30 }
  0xbb   :  { %313 = vmatprep.subr.bf16.mxu1 %v7689_v31 }
  0xbe   :  { %314 = vmatpush1.bf16.msra.mxu1 %v7687_v32 }
  0xbf   :  { %315 = vmatprep.subr.bf16.mxu1 %v7692_v33 }
  0xc2   :  { %316 = vmatpush1.bf16.msra.mxu1 %v7690_v34 }
  0xc3   :  { %317 = vmatprep.subr.bf16.mxu1 %v7695_v35 }
  0xc6   :  { %318 = vmatpush1.bf16.msra.mxu1 %v7693_v36 }
  0xc7   :  { %319 = vmatprep.subr.bf16.mxu1 %v7698_v37 }
  0xca   :  { %320 = vmatpush1.bf16.msra.mxu1 %v7696_v38  ;;  %v7747_v38 = vld [vmem:[#allocation4 + $0xc] sm:$0xff]  }
  0xcb   :  { %656 = vmatprep.subr.bf16.mxu1 %v8600_v39 }
 0x188   :  { %v213_v61 = vpop.f32.mrb[0].mxu1 }
 0x189   :  { %v214_v62 = vadd.f32 %v6589_v60, %v213_v61  ;;  %v7601_v63 = vpop.f32.mrb[1].mxu1  ;;  %v7775_v60 = vld [vmem:[#allocation9 + $0x150] ss:$12 sps:$4 sm:$0xff]   ;;  %v7781_v61 = vld [vmem:[#allocation9 + $0x16c] ss:$12 sps:$4 sm:$0xff]  }
 0x18a   :  { %v216_v1 = vpop.f32.mrb[2].mxu1  ;;  %v7785_v63 = vld [vmem:[#allocation9 + $0x184] ss:$12 sps:$4 sm:$0xff]  }
 0x18b   :  { %v219_v3 = vmax.f32 %v214_v62, 0.0  ;;  %v7602_v4 = vpop.f32.mrb[3].mxu1  ;;  %v7779_v62 = vld [vmem:[#allocation9 + $0x168] ss:$12 sps:$4 sm:$0xff]   ;;  %v7783_v1 = vld [vmem:[#allocation9 + $0x180] ss:$12 sps:$4 sm:$0xff]  }
 0x18c   :  { %v7793_v4 = vld [vmem:[#allocation9 + $0x1b4] ss:$12 sps:$4 sm:$0xff]  }
 0x18d   :  { %v220_v5 = vpack.c.bf16 %v219_v3, %v219_v3  ;;  %v7787_v3 = vld [vmem:[#allocation9 + $0x198] ss:$12 sps:$4 sm:$0xff]  }
 0x18f   :  { %6605 = vmatmul.mubr.msk.bf16.vlgmr.msra.gmra.mrb[4].mxu1 %vm305_vm4, %v220_v5  ;;  %v7791_v5 = vld [vmem:[#allocation9 + $0x1b0] ss:$12 sps:$4 sm:$0xff]  }
 0x190   :  { %657 = vmatpush1.bf16.msra.mxu1 %v7702_v2  ;;  %v7789_v2 = vld [vmem:[#allocation9 + $0x19c] ss:$12 sps:$4 sm:$0xff]  }
 0x191   :  { %658 = vmatprep.subr.bf16.mxu1 %v8600_v39 }
 0x194   :  { %659 = vmatpush1.bf16.msra.mxu1 %v7706_v6  ;;  %v7797_v6 = vld [vmem:[#allocation9 + $0x1cc] ss:$12 sps:$4 sm:$0xff]  }
 0x195   :  { %660 = vmatprep.subr.bf16.mxu1 %v8600_v39 }
 0x198   :  { %661 = vmatpush1.bf16.msra.mxu1 %v7710_v7  ;;  %v7795_v7 = vld [vmem:[#allocation9 + $0x1c8] ss:$12 sps:$4 sm:$0xff]  }
 0x199   :  { %662 = vmatprep.subr.bf16.mxu1 %v8600_v39 }
 0x19c   :  { %663 = vmatpush1.bf16.msra.mxu1 %v7714_v8  ;;  %v7801_v8 = vld [vmem:[#allocation9 + $0x1e4] ss:$12 sps:$4 sm:$0xff]  }
 0x19d   :  { %664 = vmatprep.subr.bf16.mxu1 %v8600_v39 }
 0x1a0   :  { %665 = vmatpush1.bf16.msra.mxu1 %v7718_v9  ;;  %v7799_v9 = vld [vmem:[#allocation9 + $0x1e0] ss:$12 sps:$4 sm:$0xff]  }
 0x1a1   :  { %666 = vmatprep.subr.bf16.mxu1 %v8600_v39 }
 0x1a4   :  { %667 = vmatpush1.bf16.msra.mxu1 %v7722_v10  ;;  %v7805_v10 = vld [vmem:[#allocation9 + $0x1fc] ss:$12 sps:$4 sm:$0xff]  }
 0x1a5   :  { %668 = vmatprep.subr.bf16.mxu1 %v8600_v39 }
 0x1a8   :  { %669 = vmatpush1.bf16.msra.mxu1 %v7726_v11  ;;  %v7803_v11 = vld [vmem:[#allocation9 + $0x1f8] ss:$12 sps:$4 sm:$0xff]  }
 0x1a9   :  { %670 = vmatprep.subr.bf16.mxu1 %v8600_v39 }
 0x1ac   :  { %671 = vmatpush1.bf16.msra.mxu1 %v7730_v12 }
 0x1ad   :  { %672 = vmatprep.subr.bf16.mxu1 %v8600_v39 }
 0x1b0   :  { %673 = vmatpush1.bf16.msra.mxu1 %v7734_v13 }
 0x1b1   :  { %674 = vmatprep.subr.bf16.mxu1 %v8600_v39 }
 0x1b4   :  { %675 = vmatpush1.bf16.msra.mxu1 %v7738_v14 }
 0x1b5   :  { %676 = vmatprep.subr.bf16.mxu1 %v8600_v39 }
 0x1b8   :  { %677 = vmatpush1.bf16.msra.mxu1 %v7742_v17 }
 0x1b9   :  { %678 = vmatprep.subr.bf16.mxu1 %v8600_v39 }
 0x1bc   :  { %679 = vmatpush1.bf16.msra.mxu1 %v7746_v20  ;;  %v6644_v20 = vld [vmem:[#allocation6 + $0x1] ss:$0 sm:$0xff] }
 0x1bd   :  { %1164 = vmatprep.subr.bf16.mxu1 %v7769_v56 }
 0x262   :  { %v343_v28 = vpop.f32.mrb[4].mxu1 }
 0x263   :  { %v344_v30 = vadd.f32 %v343_v28, %v238_v26  ;;  %v345_v31 = vpop.f32.mrb[5].mxu1 }
 0x264   :  { %v346_v32 = vadd.f32 %v345_v31, %v242_v27  ;;  %v347_v33 = vpop.f32.mrb[6].mxu1  ;;  %v7770_v31 = vld [vmem:[#allocation9 + $0x128] ss:$12 sps:$4 sm:$0xff]  }
 0x265   :  { %v350_v34 = vmax.f32 %v344_v30, 0.0  ;;  %v348_v35 = vpop.f32.mrb[7].mxu1  ;;  %v7774_v33 = vld [vmem:[#allocation9 + $0x140] ss:$12 sps:$4 sm:$0xff]  }
 0x266   :  { %v351_v36 = vmax.f32 %v346_v32, 0.0  ;;  %v7782_v35 = vld [vmem:[#allocation9 + $0x170] ss:$12 sps:$4 sm:$0xff]  }
 0x267   :  { %v352_v40 = vpack.c.bf16 %v350_v34, %v350_v34  ;;  %v7778_v34 = vld [vmem:[#allocation9 + $0x158] ss:$12 sps:$4 sm:$0xff]  }
 0x268   :  { %v353_v37 = vpack.c.bf16 %v351_v36, %v351_v36  ;;  %v7786_v36 = vld [vmem:[#allocation9 + $0x188] ss:$12 sps:$4 sm:$0xff]  }
 0x26a   :  { %6642 = vmatprep.mubr.msk.bf16.mxu0 %vm611_vm5, %v353_v37  ;;  %6643 = vmatprep.mubr.msk.bf16.mxu1 %vm611_vm5, %v353_v37  ;;  %v7790_v37 = vld [vmem:[#allocation9 + $0x1a0] ss:$12 sps:$4 sm:$0xff]  }
 0x26b   :  { %648 = vmatmul.mubr.bf16.vlgmr.msra.gmra.mrb[0].mxu0 %v352_v40  ;;  %689 = vmatmul.mubr.bf16.vlgmr.msra.gmra.mrb[8].mxu1 %v352_v40  ;;  %v7798_v40 = vld [vmem:[#allocation9 + $0x1d0] ss:$12 sps:$4 sm:$0xff]  }
 0x26c   :  { %7604 = vmatpush3.bf16.msra.mxu0 %v7747_v38  ;;  %7607 = vmatprep.mubr.msk.bf16.mxu0 %vm8599_vm0, %v8598_v0  ;;  %v7794_v38 = vld [vmem:[#allocation9 + $0x1b8] ss:$12 sps:$4 sm:$0xff]  }
 0x26d   :  { %7605 = vmatprep.subr.bf16.mxu0 %v8598_v0  ;;  %1165 = vmatpush1.bf16.msra.mxu1 %v7767_v55 }
 0x26e   :  { %1166 = vmatprep.subr.bf16.mxu1 %v7773_v57 }
 0x270   :  { %7606 = vmatpush3.bf16.msra.mxu0 %v724_v42  ;;  %v7806_v42 = vld [vmem:[#allocation9 + $0x200] ss:$12 sps:$4 sm:$0xff]  }
 0x271   :  { %857 = vmatprep.subr.bf16.mxu0 %v7751_v43  ;;  %1167 = vmatpush1.bf16.msra.mxu1 %v7771_v58  ;;  %v7809_v43 = vld [vmem:[#allocation9 + $0x214] ss:$12 sps:$4 sm:$0xff]  }
 0x272   :  { %1168 = vmatprep.subr.bf16.mxu1 %v7777_v59 }
 0x273   :  { %7608 = vmatmul.mubr.msk.bf16.vlgmr.msra.gmra.mrb[4].mxu0 %vm171_vm3, %v8756_v29 }
 0x274   :  { %858 = vmatpush1.bf16.msra.mxu0 %v7749_v44  ;;  %889 = vmatprep.mubr.bf16.mxu0 %v8600_v39  ;;  %v7807_v44 = vld [vmem:[#allocation9 + $0x210] ss:$12 sps:$4 sm:$0xff]  }
 0x275   :  { %859 = vmatprep.subr.bf16.mxu0 %v7754_v45  ;;  %1169 = vmatpush1.bf16.msra.mxu1 %v7775_v60  ;;  %v7810_v45 = vld [vmem:[#allocation9 + $0x218] ss:$12 sps:$4 sm:$0xff]  }
 0x276   :  { %1170 = vmatprep.subr.bf16.mxu1 %v7781_v61  ;;  %v7815_v61 = vld [vmem:[#allocation4 + $0x18] sm:$0xff]  }
 0x278   :  { %860 = vmatpush1.bf16.msra.mxu0 %v7752_v46  ;;  %v7813_v46 = vld [vmem:[#allocation9 + $0x22c] ss:$12 sps:$4 sm:$0xff]  }
 0x279   :  { %861 = vmatprep.subr.bf16.mxu0 %v7757_v47  ;;  %1171 = vmatpush1.bf16.msra.mxu1 %v7779_v62  ;;  %v7811_v47 = vld [vmem:[#allocation9 + $0x228] ss:$12 sps:$4 sm:$0xff]  }
 0x27a   :  { %1172 = vmatprep.subr.bf16.mxu1 %v7785_v63  ;;  %v7816_v63 = vld [vmem:[#allocation4 + $0x20] ss:$0 sps:$4 sm:$0xff]  }
 0x27c   :  { %862 = vmatpush1.bf16.msra.mxu0 %v7755_v48  ;;  %v7814_v48 = vld [vmem:[#allocation9 + $0x230] ss:$12 sps:$4 sm:$0xff]  }
 0x27d   :  { %863 = vmatprep.subr.bf16.mxu0 %v7760_v49  ;;  %1173 = vmatpush1.bf16.msra.mxu1 %v7783_v1  ;;  %v782_v49 = vld [vmem:[#allocation7 + $0x2] sm:$0x3]  ;;  %v1273_v1 = vsel %vm175_vm2, %v7816_v63, 0  ;;  %v7858_v63 = vld [vmem:[#allocation9 + $0x2c0] ss:$12 sps:$4 sm:$0xff]  }
 0x27e   :  { %1174 = vmatprep.subr.bf16.mxu1 %v7789_v2  ;;  %v7819_v2 = vld [vmem:[%s9950_s3 + $0xc4] ss:$8 sps:$4 sm:$0xff]  }
 0x280   :  { %864 = vmatpush1.bf16.msra.mxu0 %v7758_v50  ;;  %v787_v50 = vrot.slane %v782_v49, %v8805_v23 }
 0x281   :  { %865 = vmatprep.subr.bf16.mxu0 %v7763_v51  ;;  %1175 = vmatpush1.bf16.msra.mxu1 %v7787_v3  ;;  %v791_v51 = vrot.slane %v782_v49, %v8808_v25  ;;  %v7817_v3 = vld [vmem:[%s9950_s3 + $0xc0] ss:$8 sps:$4 sm:$0xff]  }
 0x282   :  { %1176 = vmatprep.subr.bf16.mxu1 %v7793_v4  ;;  %v7822_v4 = vld [vmem:[%s9950_s3 + $0xd4] ss:$8 sps:$4 sm:$0xff]  }
 0x284   :  { %866 = vmatpush1.bf16.msra.mxu0 %v7761_v52 }
 0x285   :  { %867 = vmatprep.subr.bf16.mxu0 %v7766_v53  ;;  %1177 = vmatpush1.bf16.msra.mxu1 %v7791_v5  ;;  %v7820_v5 = vld [vmem:[%s9950_s3 + $0xd0] ss:$8 sps:$4 sm:$0xff]  }
 0x286   :  { %1178 = vmatprep.subr.bf16.mxu1 %v7797_v6  ;;  %v7825_v6 = vld [vmem:[%s9950_s3 + $0xe4] ss:$8 sps:$4 sm:$0xff]  }
 0x288   :  { %868 = vmatpush1.bf16.msra.mxu0 %v7764_v54 }
 0x289   :  { %1205 = vmatprep.subr.bf16.mxu0 %v8600_v39  ;;  %1179 = vmatpush1.bf16.msra.mxu1 %v7795_v7  ;;  %v7823_v7 = vld [vmem:[%s9950_s3 + $0xe0] ss:$8 sps:$4 sm:$0xff]  }
 0x28a   :  { %1180 = vmatprep.subr.bf16.mxu1 %v7801_v8  ;;  %v7828_v8 = vld [vmem:[%s9950_s3 + $0xf4] ss:$8 sps:$4 sm:$0xff]  }
 0x28d   :  { %1181 = vmatpush1.bf16.msra.mxu1 %v7799_v9  ;;  %v7826_v9 = vld [vmem:[%s9950_s3 + $0xf0] ss:$8 sps:$4 sm:$0xff]  }
 0x28e   :  { %1182 = vmatprep.subr.bf16.mxu1 %v7805_v10  ;;  %v7831_v10 = vld [vmem:[%s9950_s3 + $0x104] ss:$8 sps:$4 sm:$0xff]  }
 0x291   :  { %1183 = vmatpush1.bf16.msra.mxu1 %v7803_v11  ;;  %v7829_v11 = vld [vmem:[%s9950_s3 + $0x100] ss:$8 sps:$4 sm:$0xff]  }
 0x292   :  { %1184 = vmatprep.subr.bf16.mxu1 %v7809_v43 }
 0x295   :  { %1185 = vmatpush1.bf16.msra.mxu1 %v7807_v44 }
 0x296   :  { %1186 = vmatprep.subr.bf16.mxu1 %v7813_v46 }
 0x299   :  { %1187 = vmatpush1.bf16.msra.mxu1 %v7811_v47 }
 0x29a   :  { %7611 = vmatprep.subr.bf16.mxu1 %v8598_v0 }
 0x33e   :  { %v8858_v12 = vpop.f32.mrb[0].mxu0  ;;  %v8860_v13 = vpop.f32.mrb[8].mxu1 }
 0x33f   :  { %v8862_v14 = vpop.f32.mrb[1].mxu0  ;;  %v692_v15 = vpop.f32.mrb[9].mxu1 }
 0x340   :  { %v653_v16 = vpop.f32.mrb[2].mxu0  ;;  %v693_v17 = vpop.f32.mrb[10].mxu1  ;;  %v7834_v15 = vld [vmem:[%s9950_s3 + $0x114] ss:$8 sps:$4 sm:$0xff]  }
 0x341   :  { %v654_v18 = vpop.f32.mrb[3].mxu0  ;;  %v694_v19 = vpop.f32.mrb[11].mxu1  ;;  %v7832_v16 = vld [vmem:[%s9950_s3 + $0x110] ss:$8 sps:$4 sm:$0xff]   ;;  %v7835_v17 = vld [vmem:[#allocation9 + $0x240] ss:$12 sps:$4 sm:$0xff]  }
 0x342   :  { %v7837_v18 = vld [vmem:[#allocation9 + $0x244] ss:$12 sps:$4 sm:$0xff]   ;;  %v7841_v19 = vld [vmem:[#allocation9 + $0x25c] ss:$12 sps:$4 sm:$0xff]  }
 0x346   :  { %v760_v21 = vpop.f32.mrb[4].mxu0 }
 0x347   :  { %v761_v24 = vadd.f32 %v6644_v20, %v760_v21  ;;  %v7609_v26 = vpop.f32.mrb[5].mxu0  ;;  %v7839_v20 = vld [vmem:[#allocation9 + $0x258] ss:$12 sps:$4 sm:$0xff]   ;;  %v7845_v21 = vld [vmem:[#allocation9 + $0x274] ss:$12 sps:$4 sm:$0xff]  }
 0x348   :  { %v763_v27 = vpop.f32.mrb[6].mxu0  ;;  %v7849_v26 = vld [vmem:[#allocation9 + $0x28c] ss:$12 sps:$4 sm:$0xff]  }
 0x349   :  { %v766_v28 = vmax.f32 %v761_v24, 0.0  ;;  %v7610_v30 = vpop.f32.mrb[7].mxu0  ;;  %v7843_v24 = vld [vmem:[#allocation9 + $0x270] ss:$12 sps:$4 sm:$0xff]   ;;  %v7847_v27 = vld [vmem:[#allocation9 + $0x288] ss:$12 sps:$4 sm:$0xff]  }
 0x34a   :  { %v7851_v30 = vld [vmem:[#allocation9 + $0x2a0] ss:$12 sps:$4 sm:$0xff]  }
 0x34b   :  { %v767_v32 = vpack.c.bf16 %v766_v28, %v766_v28  ;;  %v7853_v28 = vld [vmem:[#allocation9 + $0x2a4] ss:$12 sps:$4 sm:$0xff]  }
 0x34d   :  { %6672 = vmatmul.mubr.msk.bf16.vlgmr.msra.gmra.mrb[8].mxu0 %vm305_vm4, %v767_v32  ;;  %v7855_v32 = vld [vmem:[#allocation9 + $0x2b8] ss:$12 sps:$4 sm:$0xff]  }
 0x34e   :  { %1206 = vmatpush1.bf16.msra.mxu0 %v7770_v31  ;;  %v7857_v31 = vld [vmem:[#allocation9 + $0x2bc] ss:$12 sps:$4 sm:$0xff]  }
 0x34f   :  { %1207 = vmatprep.subr.bf16.mxu0 %v8600_v39 }
 0x352   :  { %1208 = vmatpush1.bf16.msra.mxu0 %v7774_v33  ;;  %v7861_v33 = vld [vmem:[#allocation9 + $0x2d4] ss:$12 sps:$4 sm:$0xff]  }
 0x353   :  { %1209 = vmatprep.subr.bf16.mxu0 %v8600_v39 }
 0x356   :  { %1210 = vmatpush1.bf16.msra.mxu0 %v7778_v34  ;;  %v7859_v34 = vld [vmem:[#allocation9 + $0x2d0] ss:$12 sps:$4 sm:$0xff]  }
 0x357   :  { %1211 = vmatprep.subr.bf16.mxu0 %v8600_v39 }
 0x35a   :  { %1212 = vmatpush1.bf16.msra.mxu0 %v7782_v35  ;;  %v7865_v35 = vld [vmem:[#allocation9 + $0x2ec] ss:$12 sps:$4 sm:$0xff]  }
 0x35b   :  { %1213 = vmatprep.subr.bf16.mxu0 %v8600_v39 }
 0x35e   :  { %1214 = vmatpush1.bf16.msra.mxu0 %v7786_v36  ;;  %v7863_v36 = vld [vmem:[#allocation9 + $0x2e8] ss:$12 sps:$4 sm:$0xff]  }
 0x35f   :  { %1215 = vmatprep.subr.bf16.mxu0 %v8600_v39 }
 0x362   :  { %1216 = vmatpush1.bf16.msra.mxu0 %v7790_v37  ;;  %v7869_v37 = vld [vmem:[#allocation9 + $0x304] ss:$12 sps:$4 sm:$0xff]  }
 0x363   :  { %1217 = vmatprep.subr.bf16.mxu0 %v8600_v39 }
 0x366   :  { %1218 = vmatpush1.bf16.msra.mxu0 %v7794_v38  ;;  %v7867_v38 = vld [vmem:[#allocation9 + $0x300] ss:$12 sps:$4 sm:$0xff]  }
 0x367   :  { %1219 = vmatprep.subr.bf16.mxu0 %v8600_v39 }
 0x36a   :  { %1220 = vmatpush1.bf16.msra.mxu0 %v7798_v40  ;;  %v7873_v40 = vld [vmem:[#allocation9 + $0x31c] ss:$12 sps:$4 sm:$0xff]  }
 0x36b   :  { %1221 = vmatprep.subr.bf16.mxu0 %v8600_v39 }
 0x36e   :  { %1222 = vmatpush1.bf16.msra.mxu0 %v7802_v41  ;;  %v7871_v41 = vld [vmem:[#allocation9 + $0x318] ss:$12 sps:$4 sm:$0xff]  }
 0x36f   :  { %1223 = vmatprep.subr.bf16.mxu0 %v8600_v39 }
 0x372   :  { %1224 = vmatpush1.bf16.msra.mxu0 %v7806_v42 }
 0x373   :  { %1225 = vmatprep.subr.bf16.mxu0 %v8600_v39 }
 0x376   :  { %1226 = vmatpush1.bf16.msra.mxu0 %v7810_v45 }
 0x377   :  { %1227 = vmatprep.subr.bf16.mxu0 %v8600_v39 }
 0x37a   :  { %1228 = vmatpush1.bf16.msra.mxu0 %v7814_v48 }
 0x37b   :  { %1713 = vmatprep.subr.bf16.mxu0 %v7837_v18 }
 0x420   :  { %v891_v52 = vpop.f32.mrb[8].mxu0 }
 0x421   :  { %v892_v53 = vadd.f32 %v891_v52, %v787_v50  ;;  %v893_v54 = vpop.f32.mrb[9].mxu0  ;;  %v6711_v50 = vld [vmem:[#allocation6 + $0x2] ss:$0 sm:$0xff] }
 0x422   :  { %v894_v55 = vadd.f32 %v893_v54, %v791_v51  ;;  %v895_v56 = vpop.f32.mrb[10].mxu0 }
 0x423   :  { %v898_v57 = vmax.f32 %v892_v53, 0.0  ;;  %v896_v58 = vpop.f32.mrb[11].mxu0 }
 0x424   :  { %v899_v59 = vmax.f32 %v894_v55, 0.0 }
 0x425   :  { %v900_v62 = vpack.c.bf16 %v898_v57, %v898_v57  ;;  %v7838_v57 = vld [vmem:[#allocation9 + $0x248] ss:$12 sps:$4 sm:$0xff]  }
 0x426   :  { %v901_v60 = vpack.c.bf16 %v899_v59, %v899_v59  ;;  %v7842_v59 = vld [vmem:[#allocation9 + $0x260] ss:$12 sps:$4 sm:$0xff]  }
 0x428   :  { %6709 = vmatprep.mubr.msk.bf16.mxu1 %vm611_vm5, %v901_v60  ;;  %6710 = vmatprep.mubr.msk.bf16.mxu0 %vm611_vm5, %v901_v60  ;;  %v7846_v60 = vld [vmem:[#allocation9 + $0x278] ss:$12 sps:$4 sm:$0xff]  }
 0x429   :  { %1197 = vmatmul.mubr.bf16.vlgmr.msra.gmra.mrb[12].mxu1 %v900_v62  ;;  %1238 = vmatmul.mubr.bf16.vlgmr.msra.gmra.mrb[12].mxu0 %v900_v62  ;;  %v7854_v62 = vld [vmem:[#allocation9 + $0x2a8] ss:$12 sps:$4 sm:$0xff]  }
 0x42a   :  { %7612 = vmatpush3.bf16.msra.mxu1 %v7815_v61  ;;  %7615 = vmatprep.mubr.msk.bf16.mxu1 %vm8599_vm0, %v8598_v0  ;;  %v7850_v61 = vld [vmem:[#allocation9 + $0x290] ss:$12 sps:$4 sm:$0xff]  }
 0x42b   :  { %7613 = vmatprep.subr.bf16.mxu1 %v8598_v0  ;;  %1714 = vmatpush1.bf16.msra.mxu0 %v7835_v17 }
 0x42c   :  { %1715 = vmatprep.subr.bf16.mxu0 %v7841_v19 }
 0x42e   :  { %7614 = vmatpush3.bf16.msra.mxu1 %v1273_v1  ;;  %v7862_v1 = vld [vmem:[#allocation9 + $0x2d8] ss:$12 sps:$4 sm:$0xff]  }
 0x42f   :  { %1406 = vmatprep.subr.bf16.mxu1 %v7819_v2  ;;  %1716 = vmatpush1.bf16.msra.mxu0 %v7839_v20  ;;  %v7866_v2 = vld [vmem:[#allocation9 + $0x2f0] ss:$12 sps:$4 sm:$0xff]  }
 0x430   :  { %1717 = vmatprep.subr.bf16.mxu0 %v7845_v21 }
 0x431   :  { %7616 = vmatmul.mubr.msk.bf16.vlgmr.msra.gmra.mrb[16].mxu1 %vm171_vm3, %v8756_v29 }
 0x432   :  { %1407 = vmatpush1.bf16.msra.mxu1 %v7817_v3  ;;  %1438 = vmatprep.mubr.bf16.mxu1 %v8600_v39  ;;  %v7870_v3 = vld [vmem:[#allocation9 + $0x308] ss:$12 sps:$4 sm:$0xff]  }
 0x433   :  { %1408 = vmatprep.subr.bf16.mxu1 %v7822_v4  ;;  %1718 = vmatpush1.bf16.msra.mxu0 %v7843_v24  ;;  %v7874_v4 = vld [vmem:[#allocation9 + $0x320] ss:$12 sps:$4 sm:$0xff]  }
 0x434   :  { %1719 = vmatprep.subr.bf16.mxu0 %v7849_v26 }
 0x436   :  { %1409 = vmatpush1.bf16.msra.mxu1 %v7820_v5  ;;  %v7877_v5 = vld [vmem:[#allocation9 + $0x334] ss:$12 sps:$4 sm:$0xff]  }
 0x437   :  { %1410 = vmatprep.subr.bf16.mxu1 %v7825_v6  ;;  %1720 = vmatpush1.bf16.msra.mxu0 %v7847_v27  ;;  %v7875_v6 = vld [vmem:[#allocation9 + $0x330] ss:$12 sps:$4 sm:$0xff]  }
 0x438   :  { %1721 = vmatprep.subr.bf16.mxu0 %v7853_v28 }
 0x43a   :  { %1411 = vmatpush1.bf16.msra.mxu1 %v7823_v7  ;;  %v7878_v7 = vld [vmem:[#allocation9 + $0x338] ss:$12 sps:$4 sm:$0xff]  }
 0x43b   :  { %1412 = vmatprep.subr.bf16.mxu1 %v7828_v8  ;;  %1722 = vmatpush1.bf16.msra.mxu0 %v7851_v30  ;;  %v7881_v8 = vld [vmem:[#allocation9 + $0x34c] ss:$12 sps:$4 sm:$0xff]  }
 0x43c   :  { %1723 = vmatprep.subr.bf16.mxu0 %v7857_v31  ;;  %v7883_v30 = vld [vmem:[#allocation4 + $0x24] sm:$0xff]  }
 0x43e   :  { %1413 = vmatpush1.bf16.msra.mxu1 %v7826_v9  ;;  %v7879_v9 = vld [vmem:[#allocation9 + $0x348] ss:$12 sps:$4 sm:$0xff]  }
 0x43f   :  { %1414 = vmatprep.subr.bf16.mxu1 %v7831_v10  ;;  %1724 = vmatpush1.bf16.msra.mxu0 %v7855_v32  ;;  %v7882_v10 = vld [vmem:[#allocation9 + $0x350] ss:$12 sps:$4 sm:$0xff]   ;;  %v7884_v32 = vld [vmem:[#allocation4 + $0x2c] ss:$0 sps:$4 sm:$0xff]  }
 0x440   :  { %1725 = vmatprep.subr.bf16.mxu0 %v7861_v33  ;;  %v1822_v33 = vsel %vm175_vm2, %v7884_v32, 0  ;;  %v7914_v32 = vld [vmem:[#allocation9 + $0x398] ss:$12 sps:$4 sm:$0xff]  }
 0x442   :  { %1415 = vmatpush1.bf16.msra.mxu1 %v7829_v11  ;;  %v1331_v11 = vld [vmem:[#allocation7 + $0x4] sm:$0x3] }
 0x443   :  { %1416 = vmatprep.subr.bf16.mxu1 %v7834_v15  ;;  %1726 = vmatpush1.bf16.msra.mxu0 %v7859_v34  ;;  %v1336_v15 = vrot.slane %v1331_v11, %v8805_v23  ;;  %v7887_v34 = vld [vmem:[%s9950_s3 + $0x124] ss:$8 sps:$4 sm:$0xff]  }
 0x444   :  { %1727 = vmatprep.subr.bf16.mxu0 %v7865_v35  ;;  %v7885_v35 = vld [vmem:[%s9950_s3 + $0x120] ss:$8 sps:$4 sm:$0xff]  }
 0x446   :  { %1417 = vmatpush1.bf16.msra.mxu1 %v7832_v16  ;;  %v1340_v16 = vrot.slane %v1331_v11, %v8808_v25 }
 0x447   :  { %1754 = vmatprep.subr.bf16.mxu1 %v8600_v39  ;;  %1728 = vmatpush1.bf16.msra.mxu0 %v7863_v36  ;;  %v7890_v36 = vld [vmem:[%s9950_s3 + $0x134] ss:$8 sps:$4 sm:$0xff]  }
 0x448   :  { %1729 = vmatprep.subr.bf16.mxu0 %v7869_v37  ;;  %v7888_v37 = vld [vmem:[%s9950_s3 + $0x130] ss:$8 sps:$4 sm:$0xff]  }
 0x44b   :  { %1730 = vmatpush1.bf16.msra.mxu0 %v7867_v38  ;;  %v7893_v38 = vld [vmem:[%s9950_s3 + $0x144] ss:$8 sps:$4 sm:$0xff]  }
 0x44c   :  { %1731 = vmatprep.subr.bf16.mxu0 %v7873_v40  ;;  %v7891_v40 = vld [vmem:[%s9950_s3 + $0x140] ss:$8 sps:$4 sm:$0xff]  }
 0x44f   :  { %1732 = vmatpush1.bf16.msra.mxu0 %v7871_v41  ;;  %v7896_v41 = vld [vmem:[%s9950_s3 + $0x154] ss:$8 sps:$4 sm:$0xff]  }
 0x450   :  { %1733 = vmatprep.subr.bf16.mxu0 %v7877_v5  ;;  %v7941_v5 = vld [vmem:[#allocation9 + $0x43c] ss:$12 sps:$4 sm:$0xff]  }
 0x453   :  { %1734 = vmatpush1.bf16.msra.mxu0 %v7875_v6  ;;  %v7939_v6 = vld [vmem:[#allocation9 + $0x438] ss:$12 sps:$4 sm:$0xff]  }
 0x454   :  { %1735 = vmatprep.subr.bf16.mxu0 %v7881_v8 }
 0x457   :  { %1736 = vmatpush1.bf16.msra.mxu0 %v7879_v9 }
 0x458   :  { %7619 = vmatprep.subr.bf16.mxu0 %v8598_v0 }
 0x4fc   :  { %v8925_v42 = vpop.f32.mrb[12].mxu1  ;;  %v8927_v43 = vpop.f32.mrb[12].mxu0 }
 0x4fd   :  { %v8929_v44 = vpop.f32.mrb[13].mxu1  ;;  %v1241_v45 = vpop.f32.mrb[13].mxu0 }
 0x4fe   :  { %v1202_v46 = vpop.f32.mrb[14].mxu1  ;;  %v1242_v47 = vpop.f32.mrb[14].mxu0  ;;  %v7894_v45 = vld [vmem:[%s9950_s3 + $0x150] ss:$8 sps:$4 sm:$0xff]  }
 0x4ff   :  { %v1203_v48 = vpop.f32.mrb[15].mxu1  ;;  %v1243_v49 = vpop.f32.mrb[15].mxu0  ;;  %v7899_v46 = vld [vmem:[%s9950_s3 + $0x164] ss:$8 sps:$4 sm:$0xff]   ;;  %v7897_v47 = vld [vmem:[%s9950_s3 + $0x160] ss:$8 sps:$4 sm:$0xff]  }
 0x500   :  { %v7902_v48 = vld [vmem:[%s9950_s3 + $0x174] ss:$8 sps:$4 sm:$0xff]   ;;  %v7900_v49 = vld [vmem:[%s9950_s3 + $0x170] ss:$8 sps:$4 sm:$0xff]  }
 0x504   :  { %v1309_v51 = vpop.f32.mrb[16].mxu1 }
 0x505   :  { %v1310_v52 = vadd.f32 %v6711_v50, %v1309_v51  ;;  %v7617_v53 = vpop.f32.mrb[17].mxu1  ;;  %v7903_v50 = vld [vmem:[#allocation9 + $0x360] ss:$12 sps:$4 sm:$0xff]   ;;  %v7905_v51 = vld [vmem:[#allocation9 + $0x364] ss:$12 sps:$4 sm:$0xff]  }
 0x506   :  { %v1312_v54 = vpop.f32.mrb[18].mxu1  ;;  %v7907_v53 = vld [vmem:[#allocation9 + $0x378] ss:$12 sps:$4 sm:$0xff]  }
 0x507   :  { %v1315_v55 = vmax.f32 %v1310_v52, 0.0  ;;  %v7618_v56 = vpop.f32.mrb[19].mxu1  ;;  %v7909_v52 = vld [vmem:[#allocation9 + $0x37c] ss:$12 sps:$4 sm:$0xff]   ;;  %v7913_v54 = vld [vmem:[#allocation9 + $0x394] ss:$12 sps:$4 sm:$0xff]  }
 0x508   :  { %v7917_v56 = vld [vmem:[#allocation9 + $0x3ac] ss:$12 sps:$4 sm:$0xff]  }
 0x509   :  { %v1316_v58 = vpack.c.bf16 %v1315_v55, %v1315_v55  ;;  %v7911_v55 = vld [vmem:[#allocation9 + $0x390] ss:$12 sps:$4 sm:$0xff]  }
 0x50b   :  { %6739 = vmatmul.mubr.msk.bf16.vlgmr.msra.gmra.mrb[20].mxu1 %vm305_vm4, %v1316_v58  ;;  %v7921_v58 = vld [vmem:[#allocation9 + $0x3c4] ss:$12 sps:$4 sm:$0xff]  }
 0x50c   :  { %1755 = vmatpush1.bf16.msra.mxu1 %v7838_v57  ;;  %v7915_v57 = vld [vmem:[#allocation9 + $0x3a8] ss:$12 sps:$4 sm:$0xff]  }
 0x50d   :  { %1756 = vmatprep.subr.bf16.mxu1 %v8600_v39 }
 0x510   :  { %1757 = vmatpush1.bf16.msra.mxu1 %v7842_v59  ;;  %v7919_v59 = vld [vmem:[#allocation9 + $0x3c0] ss:$12 sps:$4 sm:$0xff]  }
 0x511   :  { %1758 = vmatprep.subr.bf16.mxu1 %v8600_v39 }
 0x514   :  { %1759 = vmatpush1.bf16.msra.mxu1 %v7846_v60  ;;  %v7925_v60 = vld [vmem:[#allocation9 + $0x3dc] ss:$12 sps:$4 sm:$0xff]  }
 0x515   :  { %1760 = vmatprep.subr.bf16.mxu1 %v8600_v39 }
 0x518   :  { %1761 = vmatpush1.bf16.msra.mxu1 %v7850_v61  ;;  %v7923_v61 = vld [vmem:[#allocation9 + $0x3d8] ss:$12 sps:$4 sm:$0xff]  }
 0x519   :  { %1762 = vmatprep.subr.bf16.mxu1 %v8600_v39 }
 0x51c   :  { %1763 = vmatpush1.bf16.msra.mxu1 %v7854_v62  ;;  %v7929_v62 = vld [vmem:[#allocation9 + $0x3f4] ss:$12 sps:$4 sm:$0xff]  }
 0x51d   :  { %1764 = vmatprep.subr.bf16.mxu1 %v8600_v39 }
 0x520   :  { %1765 = vmatpush1.bf16.msra.mxu1 %v7858_v63  ;;  %v7927_v63 = vld [vmem:[#allocation9 + $0x3f0] ss:$12 sps:$4 sm:$0xff]  }
 0x521   :  { %1766 = vmatprep.subr.bf16.mxu1 %v8600_v39 }
 0x524   :  { %1767 = vmatpush1.bf16.msra.mxu1 %v7862_v1  ;;  %v7933_v1 = vld [vmem:[#allocation9 + $0x40c] ss:$12 sps:$4 sm:$0xff]  }
 0x525   :  { %1768 = vmatprep.subr.bf16.mxu1 %v8600_v39 }
 0x528   :  { %1769 = vmatpush1.bf16.msra.mxu1 %v7866_v2  ;;  %v7931_v2 = vld [vmem:[#allocation9 + $0x408] ss:$12 sps:$4 sm:$0xff]  }
 0x529   :  { %1770 = vmatprep.subr.bf16.mxu1 %v8600_v39 }
 0x52c   :  { %1771 = vmatpush1.bf16.msra.mxu1 %v7870_v3  ;;  %v7937_v3 = vld [vmem:[#allocation9 + $0x424] ss:$12 sps:$4 sm:$0xff]  }
 0x52d   :  { %1772 = vmatprep.subr.bf16.mxu1 %v8600_v39 }
 0x530   :  { %1773 = vmatpush1.bf16.msra.mxu1 %v7874_v4  ;;  %v7935_v4 = vld [vmem:[#allocation9 + $0x420] ss:$12 sps:$4 sm:$0xff]  }
 0x531   :  { %1774 = vmatprep.subr.bf16.mxu1 %v8600_v39 }
 0x534   :  { %1775 = vmatpush1.bf16.msra.mxu1 %v7878_v7 }
 0x535   :  { %1776 = vmatprep.subr.bf16.mxu1 %v8600_v39 }
 0x538   :  { %1777 = vmatpush1.bf16.msra.mxu1 %v7882_v10 }
 0x539   :  { %2262 = vmatprep.subr.bf16.mxu1 %v7905_v51 }
 0x5de   :  { %v1440_v17 = vpop.f32.mrb[20].mxu1 }
 0x5df   :  { %v1441_v18 = vadd.f32 %v1440_v17, %v1336_v15  ;;  %v1442_v19 = vpop.f32.mrb[21].mxu1 }
 0x5e0   :  { %v1443_v20 = vadd.f32 %v1442_v19, %v1340_v16  ;;  %v1444_v21 = vpop.f32.mrb[22].mxu1 }
 0x5e1   :  { %v1447_v24 = vmax.f32 %v1441_v18, 0.0  ;;  %v1445_v26 = vpop.f32.mrb[23].mxu1  ;;  %v6778_v18 = vld [vmem:[#allocation6 + $0x3] ss:$0 sm:$0xff] }
 0x5e2   :  { %v1448_v27 = vmax.f32 %v1443_v20, 0.0 }
 0x5e3   :  { %v1449_v31 = vpack.c.bf16 %v1447_v24, %v1447_v24 }
 0x5e4   :  { %v1450_v28 = vpack.c.bf16 %v1448_v27, %v1448_v27 }
 0x5e6   :  { %6776 = vmatprep.mubr.msk.bf16.mxu0 %vm611_vm5, %v1450_v28  ;;  %6777 = vmatprep.mubr.msk.bf16.mxu1 %vm611_vm5, %v1450_v28  ;;  %v7906_v28 = vld [vmem:[#allocation9 + $0x368] ss:$12 sps:$4 sm:$0xff]  }
 0x5e7   :  { %1746 = vmatmul.mubr.bf16.vlgmr.msra.gmra.mrb[16].mxu0 %v1449_v31  ;;  %1787 = vmatmul.mubr.bf16.vlgmr.msra.gmra.mrb[24].mxu1 %v1449_v31  ;;  %v7910_v31 = vld [vmem:[#allocation9 + $0x380] ss:$12 sps:$4 sm:$0xff]  }
 0x5e8   :  { %7620 = vmatpush3.bf16.msra.mxu0 %v7883_v30  ;;  %7623 = vmatprep.mubr.msk.bf16.mxu0 %vm8599_vm0, %v8598_v0 }
 0x5e9   :  { %7621 = vmatprep.subr.bf16.mxu0 %v8598_v0  ;;  %2263 = vmatpush1.bf16.msra.mxu1 %v7903_v50  ;;  %v1880_v50 = vld [vmem:[#allocation7 + $0x6] sm:$0x3] }
 0x5ea   :  { %2264 = vmatprep.subr.bf16.mxu1 %v7909_v52  ;;  %v1885_v51 = vrot.slane %v1880_v50, %v8805_v23  ;;  %v1889_v52 = vrot.slane %v1880_v50, %v8808_v25 }
 0x5ec   :  { %7622 = vmatpush3.bf16.msra.mxu0 %v1822_v33  ;;  %v7918_v33 = vld [vmem:[#allocation9 + $0x3b0] ss:$12 sps:$4 sm:$0xff]  }
 0x5ed   :  { %1955 = vmatprep.subr.bf16.mxu0 %v7887_v34  ;;  %2265 = vmatpush1.bf16.msra.mxu1 %v7907_v53  ;;  %v7922_v34 = vld [vmem:[#allocation9 + $0x3c8] ss:$12 sps:$4 sm:$0xff]  }
 0x5ee   :  { %2266 = vmatprep.subr.bf16.mxu1 %v7913_v54 }
 0x5ef   :  { %7624 = vmatmul.mubr.msk.bf16.vlgmr.msra.gmra.mrb[20].mxu0 %vm171_vm3, %v8756_v29 }
 0x5f0   :  { %1956 = vmatpush1.bf16.msra.mxu0 %v7885_v35  ;;  %1987 = vmatprep.mubr.bf16.mxu0 %v8600_v39  ;;  %v7926_v35 = vld [vmem:[#allocation9 + $0x3e0] ss:$12 sps:$4 sm:$0xff]  }
 0x5f1   :  { %1957 = vmatprep.subr.bf16.mxu0 %v7890_v36  ;;  %2267 = vmatpush1.bf16.msra.mxu1 %v7911_v55  ;;  %v7930_v36 = vld [vmem:[#allocation9 + $0x3f8] ss:$12 sps:$4 sm:$0xff]  }
 0x5f2   :  { %2268 = vmatprep.subr.bf16.mxu1 %v7917_v56 }
 0x5f4   :  { %1958 = vmatpush1.bf16.msra.mxu0 %v7888_v37  ;;  %v7934_v37 = vld [vmem:[#allocation9 + $0x410] ss:$12 sps:$4 sm:$0xff]  }
 0x5f5   :  { %1959 = vmatprep.subr.bf16.mxu0 %v7893_v38  ;;  %2269 = vmatpush1.bf16.msra.mxu1 %v7915_v57  ;;  %v7938_v38 = vld [vmem:[#allocation9 + $0x428] ss:$12 sps:$4 sm:$0xff]  }
 0x5f6   :  { %2270 = vmatprep.subr.bf16.mxu1 %v7921_v58 }
 0x5f8   :  { %1960 = vmatpush1.bf16.msra.mxu0 %v7891_v40  ;;  %v7942_v40 = vld [vmem:[#allocation9 + $0x440] ss:$12 sps:$4 sm:$0xff]  }
 0x5f9   :  { %1961 = vmatprep.subr.bf16.mxu0 %v7896_v41  ;;  %2271 = vmatpush1.bf16.msra.mxu1 %v7919_v59  ;;  %v7945_v41 = vld [vmem:[#allocation9 + $0x454] ss:$12 sps:$4 sm:$0xff]  }
 0x5fa   :  { %2272 = vmatprep.subr.bf16.mxu1 %v7925_v60 }
 0x5fc   :  { %1962 = vmatpush1.bf16.msra.mxu0 %v7894_v45  ;;  %v7943_v45 = vld [vmem:[#allocation9 + $0x450] ss:$12 sps:$4 sm:$0xff]  }
 0x5fd   :  { %1963 = vmatprep.subr.bf16.mxu0 %v7899_v46  ;;  %2273 = vmatpush1.bf16.msra.mxu1 %v7923_v61  ;;  %v7946_v46 = vld [vmem:[#allocation9 + $0x458] ss:$12 sps:$4 sm:$0xff]  }
 0x5fe   :  { %2274 = vmatprep.subr.bf16.mxu1 %v7929_v62  ;;  %v7951_v62 = vld [vmem:[#allocation4 + $0x30] sm:$0xff]  }
 0x600   :  { %1964 = vmatpush1.bf16.msra.mxu0 %v7897_v47  ;;  %v7949_v47 = vld [vmem:[#allocation9 + $0x46c] ss:$12 sps:$4 sm:$0xff]  }
 0x601   :  { %1965 = vmatprep.subr.bf16.mxu0 %v7902_v48  ;;  %2275 = vmatpush1.bf16.msra.mxu1 %v7927_v63  ;;  %v7947_v48 = vld [vmem:[#allocation9 + $0x468] ss:$12 sps:$4 sm:$0xff]  }
 0x602   :  { %2276 = vmatprep.subr.bf16.mxu1 %v7933_v1  ;;  %v7952_v1 = vld [vmem:[#allocation4 + $0x38] ss:$0 sps:$4 sm:$0xff]  }
 0x604   :  { %1966 = vmatpush1.bf16.msra.mxu0 %v7900_v49  ;;  %v7950_v49 = vld [vmem:[#allocation9 + $0x470] ss:$12 sps:$4 sm:$0xff]  }
 0x605   :  { %2303 = vmatprep.subr.bf16.mxu0 %v8600_v39  ;;  %2277 = vmatpush1.bf16.msra.mxu1 %v7931_v2  ;;  %v2371_v2 = vsel %vm175_vm2, %v7952_v1, 0  ;;  %v7974_v1 = vld [vmem:[#allocation9 + $0x488] ss:$12 sps:$4 sm:$0xff]  }
 0x606   :  { %2278 = vmatprep.subr.bf16.mxu1 %v7937_v3  ;;  %v7955_v3 = vld [vmem:[%s9950_s3 + $0x184] ss:$8 sps:$4 sm:$0xff]  }
 0x609   :  { %2279 = vmatpush1.bf16.msra.mxu1 %v7935_v4  ;;  %v7953_v4 = vld [vmem:[%s9950_s3 + $0x180] ss:$8 sps:$4 sm:$0xff]  }
 0x60a   :  { %2280 = vmatprep.subr.bf16.mxu1 %v7941_v5  ;;  %v7958_v5 = vld [vmem:[%s9950_s3 + $0x194] ss:$8 sps:$4 sm:$0xff]  }
 0x60d   :  { %2281 = vmatpush1.bf16.msra.mxu1 %v7939_v6  ;;  %v7956_v6 = vld [vmem:[%s9950_s3 + $0x190] ss:$8 sps:$4 sm:$0xff]  }
 0x60e   :  { %2282 = vmatprep.subr.bf16.mxu1 %v7945_v41  ;;  %v7999_v41 = vld [vmem:[#allocation9 + $0x528] ss:$12 sps:$4 sm:$0xff]  }
 0x611   :  { %2283 = vmatpush1.bf16.msra.mxu1 %v7943_v45  ;;  %v8005_v45 = vld [vmem:[#allocation9 + $0x544] ss:$12 sps:$4 sm:$0xff]  }
 0x612   :  { %2284 = vmatprep.subr.bf16.mxu1 %v7949_v47  ;;  %v8009_v47 = vld [vmem:[#allocation9 + $0x55c] ss:$12 sps:$4 sm:$0xff]  }
 0x615   :  { %2285 = vmatpush1.bf16.msra.mxu1 %v7947_v48  ;;  %v8007_v48 = vld [vmem:[#allocation9 + $0x558] ss:$12 sps:$4 sm:$0xff]  }
 0x616   :  { %7627 = vmatprep.subr.bf16.mxu1 %v8598_v0 }
 0x6ba   :  { %v8992_v7 = vpop.f32.mrb[16].mxu0  ;;  %v8994_v8 = vpop.f32.mrb[24].mxu1 }
 0x6bb   :  { %v8996_v9 = vpop.f32.mrb[17].mxu0  ;;  %v1790_v10 = vpop.f32.mrb[25].mxu1 }
 0x6bc   :  { %v1751_v11 = vpop.f32.mrb[18].mxu0  ;;  %v1791_v15 = vpop.f32.mrb[26].mxu1  ;;  %v7961_v10 = vld [vmem:[%s9950_s3 + $0x1a4] ss:$8 sps:$4 sm:$0xff]  }
 0x6bd   :  { %v1752_v16 = vpop.f32.mrb[19].mxu0  ;;  %v1792_v17 = vpop.f32.mrb[27].mxu1  ;;  %v7959_v11 = vld [vmem:[%s9950_s3 + $0x1a0] ss:$8 sps:$4 sm:$0xff]   ;;  %v7964_v15 = vld [vmem:[%s9950_s3 + $0x1b4] ss:$8 sps:$4 sm:$0xff]  }
 0x6be   :  { %v7962_v16 = vld [vmem:[%s9950_s3 + $0x1b0] ss:$8 sps:$4 sm:$0xff]   ;;  %v7967_v17 = vld [vmem:[%s9950_s3 + $0x1c4] ss:$8 sps:$4 sm:$0xff]  }
 0x6c2   :  { %v1858_v19 = vpop.f32.mrb[20].mxu0 }
 0x6c3   :  { %v1859_v20 = vadd.f32 %v6778_v18, %v1858_v19  ;;  %v7625_v21 = vpop.f32.mrb[21].mxu0  ;;  %v7965_v18 = vld [vmem:[%s9950_s3 + $0x1c0] ss:$8 sps:$4 sm:$0xff]   ;;  %v7970_v19 = vld [vmem:[%s9950_s3 + $0x1d4] ss:$8 sps:$4 sm:$0xff]  }
 0x6c4   :  { %v1861_v24 = vpop.f32.mrb[22].mxu0  ;;  %v7971_v21 = vld [vmem:[#allocation9 + $0x480] ss:$12 sps:$4 sm:$0xff]  }
 0x6c5   :  { %v1864_v26 = vmax.f32 %v1859_v20, 0.0  ;;  %v7626_v27 = vpop.f32.mrb[23].mxu0  ;;  %v7968_v20 = vld [vmem:[%s9950_s3 + $0x1d0] ss:$8 sps:$4 sm:$0xff]   ;;  %v7973_v24 = vld [vmem:[#allocation9 + $0x484] ss:$12 sps:$4 sm:$0xff]  }
 0x6c6   :  { %v7975_v27 = vld [vmem:[#allocation9 + $0x498] ss:$12 sps:$4 sm:$0xff]  }
 0x6c7   :  { %v1865_v30 = vpack.c.bf16 %v1864_v26, %v1864_v26  ;;  %v7977_v26 = vld [vmem:[#allocation9 + $0x49c] ss:$12 sps:$4 sm:$0xff]  }
 0x6c9   :  { %6806 = vmatmul.mubr.msk.bf16.vlgmr.msra.gmra.mrb[24].mxu0 %vm305_vm4, %v1865_v30  ;;  %v7979_v30 = vld [vmem:[#allocation9 + $0x4b0] ss:$12 sps:$4 sm:$0xff]  }
 0x6ca   :  { %2304 = vmatpush1.bf16.msra.mxu0 %v7906_v28  ;;  %v7981_v28 = vld [vmem:[#allocation9 + $0x4b4] ss:$12 sps:$4 sm:$0xff]  }
 0x6cb   :  { %2305 = vmatprep.subr.bf16.mxu0 %v8600_v39 }
 0x6ce   :  { %2306 = vmatpush1.bf16.msra.mxu0 %v7910_v31  ;;  %v7985_v31 = vld [vmem:[#allocation9 + $0x4cc] ss:$12 sps:$4 sm:$0xff]  }
 0x6cf   :  { %2307 = vmatprep.subr.bf16.mxu0 %v8600_v39 }
 0x6d2   :  { %2308 = vmatpush1.bf16.msra.mxu0 %v7914_v32  ;;  %v7983_v32 = vld [vmem:[#allocation9 + $0x4c8] ss:$12 sps:$4 sm:$0xff]  }
 0x6d3   :  { %2309 = vmatprep.subr.bf16.mxu0 %v8600_v39 }
 0x6d6   :  { %2310 = vmatpush1.bf16.msra.mxu0 %v7918_v33  ;;  %v7989_v33 = vld [vmem:[#allocation9 + $0x4e4] ss:$12 sps:$4 sm:$0xff]  }
 0x6d7   :  { %2311 = vmatprep.subr.bf16.mxu0 %v8600_v39 }
 0x6da   :  { %2312 = vmatpush1.bf16.msra.mxu0 %v7922_v34  ;;  %v7987_v34 = vld [vmem:[#allocation9 + $0x4e0] ss:$12 sps:$4 sm:$0xff]  }
 0x6db   :  { %2313 = vmatprep.subr.bf16.mxu0 %v8600_v39 }
 0x6de   :  { %2314 = vmatpush1.bf16.msra.mxu0 %v7926_v35  ;;  %v7993_v35 = vld [vmem:[#allocation9 + $0x4fc] ss:$12 sps:$4 sm:$0xff]  }
 0x6df   :  { %2315 = vmatprep.subr.bf16.mxu0 %v8600_v39 }
 0x6e2   :  { %2316 = vmatpush1.bf16.msra.mxu0 %v7930_v36  ;;  %v7991_v36 = vld [vmem:[#allocation9 + $0x4f8] ss:$12 sps:$4 sm:$0xff]  }
 0x6e3   :  { %2317 = vmatprep.subr.bf16.mxu0 %v8600_v39 }
 0x6e6   :  { %2318 = vmatpush1.bf16.msra.mxu0 %v7934_v37  ;;  %v7997_v37 = vld [vmem:[#allocation9 + $0x514] ss:$12 sps:$4 sm:$0xff]  }
 0x6e7   :  { %2319 = vmatprep.subr.bf16.mxu0 %v8600_v39 }
 0x6ea   :  { %2320 = vmatpush1.bf16.msra.mxu0 %v7938_v38  ;;  %v7995_v38 = vld [vmem:[#allocation9 + $0x510] ss:$12 sps:$4 sm:$0xff]  }
 0x6eb   :  { %2321 = vmatprep.subr.bf16.mxu0 %v8600_v39 }
 0x6ee   :  { %2322 = vmatpush1.bf16.msra.mxu0 %v7942_v40  ;;  %v8001_v40 = vld [vmem:[#allocation9 + $0x52c] ss:$12 sps:$4 sm:$0xff]  }
 0x6ef   :  { %2323 = vmatprep.subr.bf16.mxu0 %v8600_v39 }
 0x6f2   :  { %2324 = vmatpush1.bf16.msra.mxu0 %v7946_v46  ;;  %v8003_v46 = vld [vmem:[#allocation9 + $0x540] ss:$12 sps:$4 sm:$0xff]  }
 0x6f3   :  { %2325 = vmatprep.subr.bf16.mxu0 %v8600_v39 }
 0x6f6   :  { %2326 = vmatpush1.bf16.msra.mxu0 %v7950_v49 }
 0x6f7   :  { %2811 = vmatprep.subr.bf16.mxu0 %v7973_v24  ;;  %v8015_v24 = vld [vmem:[#allocation9 + $0x588] ss:$12 sps:$4 sm:$0xff]  }
 0x79c   :  { %v1989_v53 = vpop.f32.mrb[24].mxu0 }
 0x79d   :  { %v1990_v54 = vadd.f32 %v1989_v53, %v1885_v51  ;;  %v1991_v55 = vpop.f32.mrb[25].mxu0 }
 0x79e   :  { %v1992_v56 = vadd.f32 %v1991_v55, %v1889_v52  ;;  %v1993_v57 = vpop.f32.mrb[26].mxu0 }
 0x79f   :  { %v1996_v58 = vmax.f32 %v1990_v54, 0.0  ;;  %v1994_v59 = vpop.f32.mrb[27].mxu0  ;;  %v6845_v57 = vld [vmem:[#allocation6 + $0x4] ss:$0 sm:$0xff] }
 0x7a0   :  { %v1997_v60 = vmax.f32 %v1992_v56, 0.0 }
 0x7a1   :  { %v1998_v63 = vpack.c.bf16 %v1996_v58, %v1996_v58 }
 0x7a2   :  { %v1999_v61 = vpack.c.bf16 %v1997_v60, %v1997_v60 }
 0x7a4   :  { %6843 = vmatprep.mubr.msk.bf16.mxu1 %vm611_vm5, %v1999_v61  ;;  %6844 = vmatprep.mubr.msk.bf16.mxu0 %vm611_vm5, %v1999_v61 }
 0x7a5   :  { %2295 = vmatmul.mubr.bf16.vlgmr.msra.gmra.mrb[28].mxu1 %v1998_v63  ;;  %2336 = vmatmul.mubr.bf16.vlgmr.msra.gmra.mrb[28].mxu0 %v1998_v63 }
 0x7a6   :  { %7628 = vmatpush3.bf16.msra.mxu1 %v7951_v62  ;;  %7631 = vmatprep.mubr.msk.bf16.mxu1 %vm8599_vm0, %v8598_v0 }
 0x7a7   :  { %7629 = vmatprep.subr.bf16.mxu1 %v8598_v0  ;;  %2812 = vmatpush1.bf16.msra.mxu0 %v7971_v21  ;;  %v8017_v21 = vld [vmem:[#allocation9 + $0x58c] ss:$12 sps:$4 sm:$0xff]  }
 0x7a8   :  { %2813 = vmatprep.subr.bf16.mxu0 %v7977_v26  ;;  %v8018_v26 = vld [vmem:[#allocation9 + $0x590] ss:$12 sps:$4 sm:$0xff]  }
 0x7aa   :  { %7630 = vmatpush3.bf16.msra.mxu1 %v2371_v2 }
 0x7ab   :  { %2504 = vmatprep.subr.bf16.mxu1 %v7955_v3  ;;  %2814 = vmatpush1.bf16.msra.mxu0 %v7975_v27  ;;  %v7978_v3 = vld [vmem:[#allocation9 + $0x4a0] ss:$12 sps:$4 sm:$0xff]   ;;  %v2429_v27 = vld [vmem:[#allocation7 + $0x8] sm:$0x3] }
 0x7ac   :  { %2815 = vmatprep.subr.bf16.mxu0 %v7981_v28  ;;  %v2434_v28 = vrot.slane %v2429_v27, %v8805_v23 }
 0x7ad   :  { %7632 = vmatmul.mubr.msk.bf16.vlgmr.msra.gmra.mrb[32].mxu1 %vm171_vm3, %v8756_v29 }
 0x7ae   :  { %2505 = vmatpush1.bf16.msra.mxu1 %v7953_v4  ;;  %2536 = vmatprep.mubr.bf16.mxu1 %v8600_v39  ;;  %v7982_v4 = vld [vmem:[#allocation9 + $0x4b8] ss:$12 sps:$4 sm:$0xff]  }
 0x7af   :  { %2506 = vmatprep.subr.bf16.mxu1 %v7958_v5  ;;  %2816 = vmatpush1.bf16.msra.mxu0 %v7979_v30  ;;  %v7986_v5 = vld [vmem:[#allocation9 + $0x4d0] ss:$12 sps:$4 sm:$0xff]   ;;  %v2438_v30 = vrot.slane %v2429_v27, %v8808_v25 }
 0x7b0   :  { %2817 = vmatprep.subr.bf16.mxu0 %v7985_v31  ;;  %v8077_v27 = vld [vmem:[#allocation9 + $0x67c] ss:$12 sps:$4 sm:$0xff]  }
 0x7b2   :  { %2507 = vmatpush1.bf16.msra.mxu1 %v7956_v6  ;;  %v7990_v6 = vld [vmem:[#allocation9 + $0x4e8] ss:$12 sps:$4 sm:$0xff]  }
 0x7b3   :  { %2508 = vmatprep.subr.bf16.mxu1 %v7961_v10  ;;  %2818 = vmatpush1.bf16.msra.mxu0 %v7983_v32  ;;  %v7994_v10 = vld [vmem:[#allocation9 + $0x500] ss:$12 sps:$4 sm:$0xff]  }
 0x7b4   :  { %2819 = vmatprep.subr.bf16.mxu0 %v7989_v33 }
 0x7b6   :  { %2509 = vmatpush1.bf16.msra.mxu1 %v7959_v11  ;;  %v7998_v11 = vld [vmem:[#allocation9 + $0x518] ss:$12 sps:$4 sm:$0xff]  }
 0x7b7   :  { %2510 = vmatprep.subr.bf16.mxu1 %v7964_v15  ;;  %2820 = vmatpush1.bf16.msra.mxu0 %v7987_v34  ;;  %v8002_v15 = vld [vmem:[#allocation9 + $0x530] ss:$12 sps:$4 sm:$0xff]  }
 0x7b8   :  { %2821 = vmatprep.subr.bf16.mxu0 %v7993_v35 }
 0x7ba   :  { %2511 = vmatpush1.bf16.msra.mxu1 %v7962_v16  ;;  %v8006_v16 = vld [vmem:[#allocation9 + $0x548] ss:$12 sps:$4 sm:$0xff]  }
 0x7bb   :  { %2512 = vmatprep.subr.bf16.mxu1 %v7967_v17  ;;  %2822 = vmatpush1.bf16.msra.mxu0 %v7991_v36  ;;  %v8010_v17 = vld [vmem:[#allocation9 + $0x560] ss:$12 sps:$4 sm:$0xff]  }
 0x7bc   :  { %2823 = vmatprep.subr.bf16.mxu0 %v7997_v37 }
 0x7be   :  { %2513 = vmatpush1.bf16.msra.mxu1 %v7965_v18  ;;  %v8013_v18 = vld [vmem:[#allocation9 + $0x574] ss:$12 sps:$4 sm:$0xff]  }
 0x7bf   :  { %2514 = vmatprep.subr.bf16.mxu1 %v7970_v19  ;;  %2824 = vmatpush1.bf16.msra.mxu0 %v7995_v38  ;;  %v8011_v19 = vld [vmem:[#allocation9 + $0x570] ss:$12 sps:$4 sm:$0xff]  }
 0x7c0   :  { %2825 = vmatprep.subr.bf16.mxu0 %v8001_v40 }
 0x7c2   :  { %2515 = vmatpush1.bf16.msra.mxu1 %v7968_v20  ;;  %v8014_v20 = vld [vmem:[#allocation9 + $0x578] ss:$12 sps:$4 sm:$0xff]  }
 0x7c3   :  { %2852 = vmatprep.subr.bf16.mxu1 %v8600_v39  ;;  %2826 = vmatpush1.bf16.msra.mxu0 %v7999_v41  ;;  %v8019_v41 = vld [vmem:[#allocation4 + $0x3c] sm:$0xff]  }
 0x7c4   :  { %2827 = vmatprep.subr.bf16.mxu0 %v8005_v45 }
 0x7c7   :  { %2828 = vmatpush1.bf16.msra.mxu0 %v8003_v46  ;;  %v8020_v46 = vld [vmem:[#allocation4 + $0x44] ss:$0 sps:$4 sm:$0xff]  }
 0x7c8   :  { %2829 = vmatprep.subr.bf16.mxu0 %v8009_v47  ;;  %v2920_v47 = vsel %vm175_vm2, %v8020_v46, 0 }
 0x7cb   :  { %2830 = vmatpush1.bf16.msra.mxu0 %v8007_v48  ;;  %v8023_v48 = vld [vmem:[%s9950_s3 + $0x1e4] ss:$8 sps:$4 sm:$0xff]  }
 0x7cc   :  { %2831 = vmatprep.subr.bf16.mxu0 %v8013_v18  ;;  %v8065_v18 = vld [vmem:[#allocation9 + $0x634] ss:$12 sps:$4 sm:$0xff]  }
 0x7cf   :  { %2832 = vmatpush1.bf16.msra.mxu0 %v8011_v19  ;;  %v8063_v19 = vld [vmem:[#allocation9 + $0x630] ss:$12 sps:$4 sm:$0xff]  }
 0x7d0   :  { %2833 = vmatprep.subr.bf16.mxu0 %v8017_v21  ;;  %v8067_v21 = vld [vmem:[#allocation9 + $0x648] ss:$12 sps:$4 sm:$0xff]  }
 0x7d3   :  { %2834 = vmatpush1.bf16.msra.mxu0 %v8015_v24  ;;  %v8073_v24 = vld [vmem:[#allocation9 + $0x664] ss:$12 sps:$4 sm:$0xff]  }
 0x7d4   :  { %7635 = vmatprep.subr.bf16.mxu0 %v8598_v0 }
 0x878   :  { %v9059_v49 = vpop.f32.mrb[28].mxu1  ;;  %v9061_v50 = vpop.f32.mrb[28].mxu0 }
 0x879   :  { %v9063_v51 = vpop.f32.mrb[29].mxu1  ;;  %v2339_v52 = vpop.f32.mrb[29].mxu0 }
 0x87a   :  { %v2300_v53 = vpop.f32.mrb[30].mxu1  ;;  %v2340_v54 = vpop.f32.mrb[30].mxu0  ;;  %v8021_v52 = vld [vmem:[%s9950_s3 + $0x1e0] ss:$8 sps:$4 sm:$0xff]  }
 0x87b   :  { %v2301_v55 = vpop.f32.mrb[31].mxu1  ;;  %v2341_v56 = vpop.f32.mrb[31].mxu0  ;;  %v8026_v53 = vld [vmem:[%s9950_s3 + $0x1f4] ss:$8 sps:$4 sm:$0xff]   ;;  %v8024_v54 = vld [vmem:[%s9950_s3 + $0x1f0] ss:$8 sps:$4 sm:$0xff]  }
 0x87c   :  { %v8029_v55 = vld [vmem:[%s9950_s3 + $0x204] ss:$8 sps:$4 sm:$0xff]   ;;  %v8027_v56 = vld [vmem:[%s9950_s3 + $0x200] ss:$8 sps:$4 sm:$0xff]  }
 0x880   :  { %v2407_v58 = vpop.f32.mrb[32].mxu1 }
 0x881   :  { %v2408_v59 = vadd.f32 %v6845_v57, %v2407_v58  ;;  %v7633_v60 = vpop.f32.mrb[33].mxu1  ;;  %v8032_v57 = vld [vmem:[%s9950_s3 + $0x214] ss:$8 sps:$4 sm:$0xff]   ;;  %v8030_v58 = vld [vmem:[%s9950_s3 + $0x210] ss:$8 sps:$4 sm:$0xff]  }
 0x882   :  { %v2410_v61 = vpop.f32.mrb[34].mxu1  ;;  %v8033_v60 = vld [vmem:[%s9950_s3 + $0x220] ss:$8 sps:$4 sm:$0xff]  }
 0x883   :  { %v2413_v62 = vmax.f32 %v2408_v59, 0.0  ;;  %v7634_v63 = vpop.f32.mrb[35].mxu1  ;;  %v8035_v59 = vld [vmem:[%s9950_s3 + $0x224] ss:$8 sps:$4 sm:$0xff]   ;;  %v8038_v61 = vld [vmem:[%s9950_s3 + $0x234] ss:$8 sps:$4 sm:$0xff]  }
 0x884   :  { %v8039_v63 = vld [vmem:[#allocation9 + $0x5a0] ss:$12 sps:$4 sm:$0xff]  }
 0x885   :  { %v2414_v2 = vpack.c.bf16 %v2413_v62, %v2413_v62  ;;  %v8036_v62 = vld [vmem:[%s9950_s3 + $0x230] ss:$8 sps:$4 sm:$0xff]  }
 0x887   :  { %6873 = vmatmul.mubr.msk.bf16.vlgmr.msra.gmra.mrb[36].mxu1 %vm305_vm4, %v2414_v2  ;;  %v8045_v2 = vld [vmem:[#allocation9 + $0x5bc] ss:$12 sps:$4 sm:$0xff]  }
 0x888   :  { %2853 = vmatpush1.bf16.msra.mxu1 %v7974_v1  ;;  %v8041_v1 = vld [vmem:[#allocation9 + $0x5a4] ss:$12 sps:$4 sm:$0xff]  }
 0x889   :  { %2854 = vmatprep.subr.bf16.mxu1 %v8600_v39 }
 0x88c   :  { %2855 = vmatpush1.bf16.msra.mxu1 %v7978_v3  ;;  %v8043_v3 = vld [vmem:[#allocation9 + $0x5b8] ss:$12 sps:$4 sm:$0xff]  }
 0x88d   :  { %2856 = vmatprep.subr.bf16.mxu1 %v8600_v39 }
 0x890   :  { %2857 = vmatpush1.bf16.msra.mxu1 %v7982_v4  ;;  %v8049_v4 = vld [vmem:[#allocation9 + $0x5d4] ss:$12 sps:$4 sm:$0xff]  }
 0x891   :  { %2858 = vmatprep.subr.bf16.mxu1 %v8600_v39 }
 0x894   :  { %2859 = vmatpush1.bf16.msra.mxu1 %v7986_v5  ;;  %v8047_v5 = vld [vmem:[#allocation9 + $0x5d0] ss:$12 sps:$4 sm:$0xff]  }
 0x895   :  { %2860 = vmatprep.subr.bf16.mxu1 %v8600_v39 }
 0x898   :  { %2861 = vmatpush1.bf16.msra.mxu1 %v7990_v6  ;;  %v8053_v6 = vld [vmem:[#allocation9 + $0x5ec] ss:$12 sps:$4 sm:$0xff]  }
 0x899   :  { %2862 = vmatprep.subr.bf16.mxu1 %v8600_v39 }
 0x89c   :  { %2863 = vmatpush1.bf16.msra.mxu1 %v7994_v10  ;;  %v8051_v10 = vld [vmem:[#allocation9 + $0x5e8] ss:$12 sps:$4 sm:$0xff]  }
 0x89d   :  { %2864 = vmatprep.subr.bf16.mxu1 %v8600_v39 }
 0x8a0   :  { %2865 = vmatpush1.bf16.msra.mxu1 %v7998_v11  ;;  %v8057_v11 = vld [vmem:[#allocation9 + $0x604] ss:$12 sps:$4 sm:$0xff]  }
 0x8a1   :  { %2866 = vmatprep.subr.bf16.mxu1 %v8600_v39 }
 0x8a4   :  { %2867 = vmatpush1.bf16.msra.mxu1 %v8002_v15  ;;  %v8055_v15 = vld [vmem:[#allocation9 + $0x600] ss:$12 sps:$4 sm:$0xff]  }
 0x8a5   :  { %2868 = vmatprep.subr.bf16.mxu1 %v8600_v39 }
 0x8a8   :  { %2869 = vmatpush1.bf16.msra.mxu1 %v8006_v16  ;;  %v8061_v16 = vld [vmem:[#allocation9 + $0x61c] ss:$12 sps:$4 sm:$0xff]  }
 0x8a9   :  { %2870 = vmatprep.subr.bf16.mxu1 %v8600_v39 }
 0x8ac   :  { %2871 = vmatpush1.bf16.msra.mxu1 %v8010_v17  ;;  %v8059_v17 = vld [vmem:[#allocation9 + $0x618] ss:$12 sps:$4 sm:$0xff]  }
 0x8ad   :  { %2872 = vmatprep.subr.bf16.mxu1 %v8600_v39 }
 0x8b0   :  { %2873 = vmatpush1.bf16.msra.mxu1 %v8014_v20  ;;  %v8069_v20 = vld [vmem:[#allocation9 + $0x64c] ss:$12 sps:$4 sm:$0xff]  }
 0x8b1   :  { %2874 = vmatprep.subr.bf16.mxu1 %v8600_v39 }
 0x8b4   :  { %2875 = vmatpush1.bf16.msra.mxu1 %v8018_v26  ;;  %v8071_v26 = vld [vmem:[#allocation9 + $0x660] ss:$12 sps:$4 sm:$0xff]  }
 0x8b5   :  { %3360 = vmatprep.subr.bf16.mxu1 %v8041_v1  ;;  %v8079_v1 = vld [vmem:[#allocation9 + $0x690] ss:$12 sps:$4 sm:$0xff]  }
 0x95a   :  { %v2538_v31 = vpop.f32.mrb[36].mxu1 }
 0x95b   :  { %v2539_v32 = vadd.f32 %v2538_v31, %v2434_v28  ;;  %v2540_v33 = vpop.f32.mrb[37].mxu1  ;;  %v8075_v28 = vld [vmem:[#allocation9 + $0x678] ss:$12 sps:$4 sm:$0xff]  }
 0x95c   :  { %v2541_v34 = vadd.f32 %v2540_v33, %v2438_v30  ;;  %v2542_v35 = vpop.f32.mrb[38].mxu1 }
 0x95d   :  { %v2545_v36 = vmax.f32 %v2539_v32, 0.0  ;;  %v2543_v37 = vpop.f32.mrb[39].mxu1 }
 0x95e   :  { %v2546_v38 = vmax.f32 %v2541_v34, 0.0 }
 0x95f   :  { %v2547_v45 = vpack.c.bf16 %v2545_v36, %v2545_v36 }
 0x960   :  { %v2548_v40 = vpack.c.bf16 %v2546_v38, %v2546_v38  ;;  %v6912_v38 = vld [vmem:[#allocation6 + $0x5] ss:$0 sm:$0xff] }
 0x962   :  { %6910 = vmatprep.mubr.msk.bf16.mxu0 %vm611_vm5, %v2548_v40  ;;  %6911 = vmatprep.mubr.msk.bf16.mxu1 %vm611_vm5, %v2548_v40 }
 0x963   :  { %2844 = vmatmul.mubr.bf16.vlgmr.msra.gmra.mrb[32].mxu0 %v2547_v45  ;;  %2885 = vmatmul.mubr.bf16.vlgmr.msra.gmra.mrb[40].mxu1 %v2547_v45 }
 0x964   :  { %7636 = vmatpush3.bf16.msra.mxu0 %v8019_v41  ;;  %7639 = vmatprep.mubr.msk.bf16.mxu0 %vm8599_vm0, %v8598_v0 }
 0x965   :  { %7637 = vmatprep.subr.bf16.mxu0 %v8598_v0  ;;  %3361 = vmatpush1.bf16.msra.mxu1 %v8039_v63  ;;  %v8081_v63 = vld [vmem:[#allocation9 + $0x694] ss:$12 sps:$4 sm:$0xff]  }
 0x966   :  { %3362 = vmatprep.subr.bf16.mxu1 %v8045_v2  ;;  %v8082_v2 = vld [vmem:[#allocation9 + $0x698] ss:$12 sps:$4 sm:$0xff]  }
 0x968   :  { %7638 = vmatpush3.bf16.msra.mxu0 %v2920_v47 }
 0x969   :  { %3053 = vmatprep.subr.bf16.mxu0 %v8023_v48  ;;  %3363 = vmatpush1.bf16.msra.mxu1 %v8043_v3  ;;  %v8085_v3 = vld [vmem:[#allocation9 + $0x6ac] ss:$12 sps:$4 sm:$0xff]  }
 0x96a   :  { %3364 = vmatprep.subr.bf16.mxu1 %v8049_v4  ;;  %v8083_v4 = vld [vmem:[#allocation9 + $0x6a8] ss:$12 sps:$4 sm:$0xff]  }
 0x96b   :  { %7640 = vmatmul.mubr.msk.bf16.vlgmr.msra.gmra.mrb[36].mxu0 %vm171_vm3, %v8756_v29 }
 0x96c   :  { %3054 = vmatpush1.bf16.msra.mxu0 %v8021_v52  ;;  %3085 = vmatprep.mubr.bf16.mxu0 %v8600_v39  ;;  %v8042_v52 = vld [vmem:[#allocation9 + $0x5a8] ss:$12 sps:$4 sm:$0xff]  }
 0x96d   :  { %3055 = vmatprep.subr.bf16.mxu0 %v8026_v53  ;;  %3365 = vmatpush1.bf16.msra.mxu1 %v8047_v5  ;;  %v8086_v5 = vld [vmem:[#allocation9 + $0x6b0] ss:$12 sps:$4 sm:$0xff]  }
 0x96e   :  { %3366 = vmatprep.subr.bf16.mxu1 %v8053_v6  ;;  %v2978_v6 = vld [vmem:[#allocation7 + $0xa] sm:$0x3] }
 0x970   :  { %3056 = vmatpush1.bf16.msra.mxu0 %v8024_v54  ;;  %v8046_v54 = vld [vmem:[#allocation9 + $0x5c0] ss:$12 sps:$4 sm:$0xff]  }
 0x971   :  { %3057 = vmatprep.subr.bf16.mxu0 %v8029_v55  ;;  %3367 = vmatpush1.bf16.msra.mxu1 %v8051_v10  ;;  %v8050_v55 = vld [vmem:[#allocation9 + $0x5d8] ss:$12 sps:$4 sm:$0xff]   ;;  %v2983_v10 = vrot.slane %v2978_v6, %v8805_v23 }
 0x972   :  { %3368 = vmatprep.subr.bf16.mxu1 %v8057_v11  ;;  %v2987_v11 = vrot.slane %v2978_v6, %v8808_v25  ;;  %v8135_v6 = vld [vmem:[#allocation9 + $0x768] ss:$12 sps:$4 sm:$0xff]  }
 0x974   :  { %3058 = vmatpush1.bf16.msra.mxu0 %v8027_v56  ;;  %v8054_v56 = vld [vmem:[#allocation9 + $0x5f0] ss:$12 sps:$4 sm:$0xff]  }
 0x975   :  { %3059 = vmatprep.subr.bf16.mxu0 %v8032_v57  ;;  %3369 = vmatpush1.bf16.msra.mxu1 %v8055_v15  ;;  %v8058_v57 = vld [vmem:[#allocation9 + $0x608] ss:$12 sps:$4 sm:$0xff]  }
 0x976   :  { %3370 = vmatprep.subr.bf16.mxu1 %v8061_v16 }
 0x978   :  { %3060 = vmatpush1.bf16.msra.mxu0 %v8030_v58  ;;  %v8062_v58 = vld [vmem:[#allocation9 + $0x620] ss:$12 sps:$4 sm:$0xff]  }
 0x979   :  { %3061 = vmatprep.subr.bf16.mxu0 %v8035_v59  ;;  %3371 = vmatpush1.bf16.msra.mxu1 %v8059_v17  ;;  %v8066_v59 = vld [vmem:[#allocation9 + $0x638] ss:$12 sps:$4 sm:$0xff]  }
 0x97a   :  { %3372 = vmatprep.subr.bf16.mxu1 %v8065_v18 }
 0x97c   :  { %3062 = vmatpush1.bf16.msra.mxu0 %v8033_v60  ;;  %v8070_v60 = vld [vmem:[#allocation9 + $0x650] ss:$12 sps:$4 sm:$0xff]  }
 0x97d   :  { %3063 = vmatprep.subr.bf16.mxu0 %v8038_v61  ;;  %3373 = vmatpush1.bf16.msra.mxu1 %v8063_v19  ;;  %v8074_v61 = vld [vmem:[#allocation9 + $0x668] ss:$12 sps:$4 sm:$0xff]  }
 0x97e   :  { %3374 = vmatprep.subr.bf16.mxu1 %v8069_v20 }
 0x980   :  { %3064 = vmatpush1.bf16.msra.mxu0 %v8036_v62  ;;  %v8078_v62 = vld [vmem:[#allocation9 + $0x680] ss:$12 sps:$4 sm:$0xff]  }
 0x981   :  { %3401 = vmatprep.subr.bf16.mxu0 %v8600_v39  ;;  %3375 = vmatpush1.bf16.msra.mxu1 %v8067_v21 }
 0x982   :  { %3376 = vmatprep.subr.bf16.mxu1 %v8073_v24 }
 0x985   :  { %3377 = vmatpush1.bf16.msra.mxu1 %v8071_v26 }
 0x986   :  { %3378 = vmatprep.subr.bf16.mxu1 %v8077_v27  ;;  %v8087_v27 = vld [vmem:[#allocation4 + $0x48] sm:$0xff]  }
 0x989   :  { %3379 = vmatpush1.bf16.msra.mxu1 %v8075_v28 }
 0x98a   :  { %3380 = vmatprep.subr.bf16.mxu1 %v8081_v63  ;;  %v8123_v63 = vld [vmem:[#allocation9 + $0x720] ss:$12 sps:$4 sm:$0xff]  }
 0x98d   :  { %3381 = vmatpush1.bf16.msra.mxu1 %v8079_v1  ;;  %v8129_v1 = vld [vmem:[#allocation9 + $0x73c] ss:$12 sps:$4 sm:$0xff]  }
 0x98e   :  { %3382 = vmatprep.subr.bf16.mxu1 %v8085_v3  ;;  %v8133_v3 = vld [vmem:[#allocation9 + $0x754] ss:$12 sps:$4 sm:$0xff]  }
 0x991   :  { %3383 = vmatpush1.bf16.msra.mxu1 %v8083_v4  ;;  %v8131_v4 = vld [vmem:[#allocation9 + $0x750] ss:$12 sps:$4 sm:$0xff]  }
 0x992   :  { %7643 = vmatprep.subr.bf16.mxu1 %v8598_v0 }
 0xa36   :  { %v9126_v30 = vpop.f32.mrb[32].mxu0  ;;  %v9128_v31 = vpop.f32.mrb[40].mxu1 }
 0xa37   :  { %v9130_v32 = vpop.f32.mrb[33].mxu0  ;;  %v2888_v33 = vpop.f32.mrb[41].mxu1 }
 0xa38   :  { %v2849_v34 = vpop.f32.mrb[34].mxu0  ;;  %v2889_v35 = vpop.f32.mrb[42].mxu1  ;;  %v8088_v33 = vld [vmem:[#allocation4 + $0x50] ss:$0 sps:$4 sm:$0xff]  }
 0xa39   :  { %v2850_v36 = vpop.f32.mrb[35].mxu0  ;;  %v2890_v37 = vpop.f32.mrb[43].mxu1  ;;  %v3469_v34 = vsel %vm175_vm2, %v8088_v33, 0  ;;  %v8091_v35 = vld [vmem:[%s9950_s3 + $0x244] ss:$8 sps:$4 sm:$0xff]  }
 0xa3a   :  { %v8089_v36 = vld [vmem:[%s9950_s3 + $0x240] ss:$8 sps:$4 sm:$0xff]   ;;  %v8094_v37 = vld [vmem:[%s9950_s3 + $0x254] ss:$8 sps:$4 sm:$0xff]  }
 0xa3e   :  { %v2956_v40 = vpop.f32.mrb[36].mxu0 }
 0xa3f   :  { %v2957_v41 = vadd.f32 %v6912_v38, %v2956_v40  ;;  %v7641_v45 = vpop.f32.mrb[37].mxu0  ;;  %v8092_v38 = vld [vmem:[%s9950_s3 + $0x250] ss:$8 sps:$4 sm:$0xff]   ;;  %v8097_v40 = vld [vmem:[%s9950_s3 + $0x264] ss:$8 sps:$4 sm:$0xff]  }
 0xa40   :  { %v2959_v46 = vpop.f32.mrb[38].mxu0  ;;  %v8100_v45 = vld [vmem:[%s9950_s3 + $0x274] ss:$8 sps:$4 sm:$0xff]  }
 0xa41   :  { %v2962_v47 = vmax.f32 %v2957_v41, 0.0  ;;  %v7642_v48 = vpop.f32.mrb[39].mxu0  ;;  %v8095_v41 = vld [vmem:[%s9950_s3 + $0x260] ss:$8 sps:$4 sm:$0xff]   ;;  %v8098_v46 = vld [vmem:[%s9950_s3 + $0x270] ss:$8 sps:$4 sm:$0xff]  }
 0xa42   :  { %v8101_v48 = vld [vmem:[%s9950_s3 + $0x280] ss:$8 sps:$4 sm:$0xff]  }
 0xa43   :  { %v2963_v53 = vpack.c.bf16 %v2962_v47, %v2962_v47  ;;  %v8103_v47 = vld [vmem:[%s9950_s3 + $0x284] ss:$8 sps:$4 sm:$0xff]  }
 0xa45   :  { %6940 = vmatmul.mubr.msk.bf16.vlgmr.msra.gmra.mrb[40].mxu0 %vm305_vm4, %v2963_v53  ;;  %v8104_v53 = vld [vmem:[%s9950_s3 + $0x290] ss:$8 sps:$4 sm:$0xff]  }
 0xa46   :  { %3402 = vmatpush1.bf16.msra.mxu0 %v8042_v52  ;;  %v8106_v52 = vld [vmem:[%s9950_s3 + $0x294] ss:$8 sps:$4 sm:$0xff]  }
 0xa47   :  { %3403 = vmatprep.subr.bf16.mxu0 %v8600_v39 }
 0xa4a   :  { %3404 = vmatpush1.bf16.msra.mxu0 %v8046_v54  ;;  %v8107_v54 = vld [vmem:[#allocation9 + $0x6c0] ss:$12 sps:$4 sm:$0xff]  }
 0xa4b   :  { %3405 = vmatprep.subr.bf16.mxu0 %v8600_v39 }
 0xa4e   :  { %3406 = vmatpush1.bf16.msra.mxu0 %v8050_v55  ;;  %v8109_v55 = vld [vmem:[#allocation9 + $0x6c4] ss:$12 sps:$4 sm:$0xff]  }
 0xa4f   :  { %3407 = vmatprep.subr.bf16.mxu0 %v8600_v39 }
 0xa52   :  { %3408 = vmatpush1.bf16.msra.mxu0 %v8054_v56  ;;  %v8113_v56 = vld [vmem:[#allocation9 + $0x6dc] ss:$12 sps:$4 sm:$0xff]  }
 0xa53   :  { %3409 = vmatprep.subr.bf16.mxu0 %v8600_v39 }
 0xa56   :  { %3410 = vmatpush1.bf16.msra.mxu0 %v8058_v57  ;;  %v8111_v57 = vld [vmem:[#allocation9 + $0x6d8] ss:$12 sps:$4 sm:$0xff]  }
 0xa57   :  { %3411 = vmatprep.subr.bf16.mxu0 %v8600_v39 }
 0xa5a   :  { %3412 = vmatpush1.bf16.msra.mxu0 %v8062_v58  ;;  %v8117_v58 = vld [vmem:[#allocation9 + $0x6f4] ss:$12 sps:$4 sm:$0xff]  }
 0xa5b   :  { %3413 = vmatprep.subr.bf16.mxu0 %v8600_v39 }
 0xa5e   :  { %3414 = vmatpush1.bf16.msra.mxu0 %v8066_v59  ;;  %v8115_v59 = vld [vmem:[#allocation9 + $0x6f0] ss:$12 sps:$4 sm:$0xff]  }
 0xa5f   :  { %3415 = vmatprep.subr.bf16.mxu0 %v8600_v39 }
 0xa62   :  { %3416 = vmatpush1.bf16.msra.mxu0 %v8070_v60  ;;  %v8121_v60 = vld [vmem:[#allocation9 + $0x70c] ss:$12 sps:$4 sm:$0xff]  }
 0xa63   :  { %3417 = vmatprep.subr.bf16.mxu0 %v8600_v39 }
 0xa66   :  { %3418 = vmatpush1.bf16.msra.mxu0 %v8074_v61  ;;  %v8119_v61 = vld [vmem:[#allocation9 + $0x708] ss:$12 sps:$4 sm:$0xff]  }
 0xa67   :  { %3419 = vmatprep.subr.bf16.mxu0 %v8600_v39 }
 0xa6a   :  { %3420 = vmatpush1.bf16.msra.mxu0 %v8078_v62  ;;  %v8125_v62 = vld [vmem:[#allocation9 + $0x724] ss:$12 sps:$4 sm:$0xff]  }
 0xa6b   :  { %3421 = vmatprep.subr.bf16.mxu0 %v8600_v39 }
 0xa6e   :  { %3422 = vmatpush1.bf16.msra.mxu0 %v8082_v2  ;;  %v8127_v2 = vld [vmem:[#allocation9 + $0x738] ss:$12 sps:$4 sm:$0xff]  }
 0xa6f   :  { %3423 = vmatprep.subr.bf16.mxu0 %v8600_v39 }
 0xa72   :  { %3424 = vmatpush1.bf16.msra.mxu0 %v8086_v5  ;;  %v8137_v5 = vld [vmem:[#allocation9 + $0x76c] ss:$12 sps:$4 sm:$0xff]  }
 0xa73   :  { %3909 = vmatprep.subr.bf16.mxu0 %v8109_v55  ;;  %v8142_v55 = vld [vmem:[#allocation9 + $0x788] ss:$12 sps:$4 sm:$0xff]  }
 0xb18   :  { %v3087_v15 = vpop.f32.mrb[40].mxu0 }
 0xb19   :  { %v3088_v16 = vadd.f32 %v3087_v15, %v2983_v10  ;;  %v3089_v17 = vpop.f32.mrb[41].mxu0  ;;  %v8141_v10 = vld [vmem:[#allocation9 + $0x784] ss:$12 sps:$4 sm:$0xff]   ;;  %v8145_v15 = vld [vmem:[#allocation9 + $0x79c] ss:$12 sps:$4 sm:$0xff]  }
 0xb1a   :  { %v3090_v18 = vadd.f32 %v3089_v17, %v2987_v11  ;;  %v3091_v19 = vpop.f32.mrb[42].mxu0  ;;  %v8139_v11 = vld [vmem:[#allocation9 + $0x780] ss:$12 sps:$4 sm:$0xff]  }
 0xb1b   :  { %v3094_v20 = vmax.f32 %v3088_v16, 0.0  ;;  %v3092_v21 = vpop.f32.mrb[43].mxu0  ;;  %v8143_v16 = vld [vmem:[#allocation9 + $0x798] ss:$12 sps:$4 sm:$0xff]  }
 0xb1c   :  { %v3095_v24 = vmax.f32 %v3090_v18, 0.0 }
 0xb1d   :  { %v3096_v28 = vpack.c.bf16 %v3094_v20, %v3094_v20 }
 0xb1e   :  { %v3097_v26 = vpack.c.bf16 %v3095_v24, %v3095_v24 }
 0xb20   :  { %6977 = vmatprep.mubr.msk.bf16.mxu1 %vm611_vm5, %v3097_v26  ;;  %6978 = vmatprep.mubr.msk.bf16.mxu0 %vm611_vm5, %v3097_v26 }
 0xb21   :  { %3393 = vmatmul.mubr.bf16.vlgmr.msra.gmra.mrb[44].mxu1 %v3096_v28  ;;  %3434 = vmatmul.mubr.bf16.vlgmr.msra.gmra.mrb[44].mxu0 %v3096_v28  ;;  %v6979_v28 = vld [vmem:[#allocation6 + $0x6] ss:$0 sm:$0xff] }
 0xb22   :  { %7644 = vmatpush3.bf16.msra.mxu1 %v8087_v27  ;;  %7647 = vmatprep.mubr.msk.bf16.mxu1 %vm8599_vm0, %v8598_v0 }
 0xb23   :  { %7645 = vmatprep.subr.bf16.mxu1 %v8598_v0  ;;  %3910 = vmatpush1.bf16.msra.mxu0 %v8107_v54  ;;  %v8138_v54 = vld [vmem:[#allocation9 + $0x770] ss:$12 sps:$4 sm:$0xff]  }
 0xb24   :  { %3911 = vmatprep.subr.bf16.mxu0 %v8113_v56  ;;  %v8146_v56 = vld [vmem:[#allocation9 + $0x7a0] ss:$12 sps:$4 sm:$0xff]  }
 0xb26   :  { %7646 = vmatpush3.bf16.msra.mxu1 %v3469_v34 }
 0xb27   :  { %3602 = vmatprep.subr.bf16.mxu1 %v8091_v35  ;;  %3912 = vmatpush1.bf16.msra.mxu0 %v8111_v57  ;;  %v8149_v57 = vld [vmem:[#allocation9 + $0x7b4] ss:$12 sps:$4 sm:$0xff]  }
 0xb28   :  { %3913 = vmatprep.subr.bf16.mxu0 %v8117_v58  ;;  %v8147_v58 = vld [vmem:[#allocation9 + $0x7b0] ss:$12 sps:$4 sm:$0xff]  }
 0xb29   :  { %7648 = vmatmul.mubr.msk.bf16.vlgmr.msra.gmra.mrb[48].mxu1 %vm171_vm3, %v8756_v29 }
 0xb2a   :  { %3603 = vmatpush1.bf16.msra.mxu1 %v8089_v36  ;;  %3634 = vmatprep.mubr.bf16.mxu1 %v8600_v39 }
 0xb2b   :  { %3604 = vmatprep.subr.bf16.mxu1 %v8094_v37  ;;  %3914 = vmatpush1.bf16.msra.mxu0 %v8115_v59  ;;  %v8150_v59 = vld [vmem:[#allocation9 + $0x7b8] ss:$12 sps:$4 sm:$0xff]  }
 0xb2c   :  { %3915 = vmatprep.subr.bf16.mxu0 %v8121_v60  ;;  %v8153_v60 = vld [vmem:[#allocation9 + $0x7cc] ss:$12 sps:$4 sm:$0xff]  }
 0xb2e   :  { %3605 = vmatpush1.bf16.msra.mxu1 %v8092_v38 }
 0xb2f   :  { %3606 = vmatprep.subr.bf16.mxu1 %v8097_v40  ;;  %3916 = vmatpush1.bf16.msra.mxu0 %v8119_v61  ;;  %v8110_v40 = vld [vmem:[#allocation9 + $0x6c8] ss:$12 sps:$4 sm:$0xff]  }
 0xb30   :  { %3917 = vmatprep.subr.bf16.mxu0 %v8125_v62  ;;  %v8151_v61 = vld [vmem:[#allocation9 + $0x7c8] ss:$12 sps:$4 sm:$0xff]   ;;  %v8154_v62 = vld [vmem:[#allocation9 + $0x7d0] ss:$12 sps:$4 sm:$0xff]  }
 0xb32   :  { %3607 = vmatpush1.bf16.msra.mxu1 %v8095_v41 }
 0xb33   :  { %3608 = vmatprep.subr.bf16.mxu1 %v8100_v45  ;;  %3918 = vmatpush1.bf16.msra.mxu0 %v8123_v63  ;;  %v8114_v45 = vld [vmem:[#allocation9 + $0x6e0] ss:$12 sps:$4 sm:$0xff]   ;;  %v3527_v63 = vld [vmem:[#allocation7 + $0xc] sm:$0x3] }
 0xb34   :  { %3919 = vmatprep.subr.bf16.mxu0 %v8129_v1  ;;  %v3532_v1 = vrot.slane %v3527_v63, %v8805_v23 }
 0xb36   :  { %3609 = vmatpush1.bf16.msra.mxu1 %v8098_v46  ;;  %v8118_v46 = vld [vmem:[#allocation9 + $0x6f8] ss:$12 sps:$4 sm:$0xff]  }
 0xb37   :  { %3610 = vmatprep.subr.bf16.mxu1 %v8103_v47  ;;  %3920 = vmatpush1.bf16.msra.mxu0 %v8127_v2  ;;  %v8122_v47 = vld [vmem:[#allocation9 + $0x710] ss:$12 sps:$4 sm:$0xff]   ;;  %v3536_v2 = vrot.slane %v3527_v63, %v8808_v25  ;;  %v8205_v63 = vld [vmem:[#allocation9 + $0x88c] ss:$12 sps:$4 sm:$0xff]  }
 0xb38   :  { %3921 = vmatprep.subr.bf16.mxu0 %v8133_v3 }
 0xb3a   :  { %3611 = vmatpush1.bf16.msra.mxu1 %v8101_v48  ;;  %v8126_v48 = vld [vmem:[#allocation9 + $0x728] ss:$12 sps:$4 sm:$0xff]  }
 0xb3b   :  { %3612 = vmatprep.subr.bf16.mxu1 %v8106_v52  ;;  %3922 = vmatpush1.bf16.msra.mxu0 %v8131_v4  ;;  %v8130_v52 = vld [vmem:[#allocation9 + $0x740] ss:$12 sps:$4 sm:$0xff]  }
 0xb3c   :  { %3923 = vmatprep.subr.bf16.mxu0 %v8137_v5 }
 0xb3e   :  { %3613 = vmatpush1.bf16.msra.mxu1 %v8104_v53  ;;  %v8134_v53 = vld [vmem:[#allocation9 + $0x758] ss:$12 sps:$4 sm:$0xff]  }
 0xb3f   :  { %3950 = vmatprep.subr.bf16.mxu1 %v8600_v39  ;;  %3924 = vmatpush1.bf16.msra.mxu0 %v8135_v6 }
 0xb40   :  { %3925 = vmatprep.subr.bf16.mxu0 %v8141_v10 }
 0xb43   :  { %3926 = vmatpush1.bf16.msra.mxu0 %v8139_v11 }
 0xb44   :  { %3927 = vmatprep.subr.bf16.mxu0 %v8145_v15 }
 0xb47   :  { %3928 = vmatpush1.bf16.msra.mxu0 %v8143_v16 }
 0xb48   :  { %3929 = vmatprep.subr.bf16.mxu0 %v8149_v57  ;;  %v8193_v57 = vld [vmem:[#allocation9 + $0x844] ss:$12 sps:$4 sm:$0xff]  }
 0xb4b   :  { %3930 = vmatpush1.bf16.msra.mxu0 %v8147_v58  ;;  %v8191_v58 = vld [vmem:[#allocation9 + $0x840] ss:$12 sps:$4 sm:$0xff]  }
 0xb4c   :  { %3931 = vmatprep.subr.bf16.mxu0 %v8153_v60  ;;  %v8195_v60 = vld [vmem:[#allocation9 + $0x858] ss:$12 sps:$4 sm:$0xff]  }
 0xb4f   :  { %3932 = vmatpush1.bf16.msra.mxu0 %v8151_v61  ;;  %v8201_v61 = vld [vmem:[#allocation9 + $0x874] ss:$12 sps:$4 sm:$0xff]  }
 0xb50   :  { %7651 = vmatprep.subr.bf16.mxu0 %v8598_v0 }
 0xbf4   :  { %v9193_v17 = vpop.f32.mrb[44].mxu1  ;;  %v9195_v18 = vpop.f32.mrb[44].mxu0 }
 0xbf5   :  { %v9197_v19 = vpop.f32.mrb[45].mxu1  ;;  %v3437_v20 = vpop.f32.mrb[45].mxu0 }
 0xbf6   :  { %v3398_v21 = vpop.f32.mrb[46].mxu1  ;;  %v3438_v24 = vpop.f32.mrb[46].mxu0 }
 0xbf7   :  { %v3399_v26 = vpop.f32.mrb[47].mxu1  ;;  %v3439_v27 = vpop.f32.mrb[47].mxu0  ;;  %v8155_v21 = vld [vmem:[#allocation4 + $0x54] sm:$0xff]  }
 0xbf8   :  { %v8156_v26 = vld [vmem:[#allocation4 + $0x5c] ss:$0 sps:$4 sm:$0xff]  }
 0xbf9   :  { %v4018_v27 = vsel %vm175_vm2, %v8156_v26, 0  ;;  %v7046_v26 = vld [vmem:[#allocation6 + $0x7] ss:$0 sm:$0xff] }
 0xbfc   :  { %v3505_v33 = vpop.f32.mrb[48].mxu1 }
 0xbfd   :  { %v3506_v34 = vadd.f32 %v6979_v28, %v3505_v33  ;;  %v7649_v35 = vpop.f32.mrb[49].mxu1  ;;  %v8159_v28 = vld [vmem:[%s9950_s3 + $0x2a4] ss:$8 sps:$4 sm:$0xff]   ;;  %v8157_v33 = vld [vmem:[%s9950_s3 + $0x2a0] ss:$8 sps:$4 sm:$0xff]  }
 0xbfe   :  { %v3508_v36 = vpop.f32.mrb[50].mxu1  ;;  %v8165_v35 = vld [vmem:[%s9950_s3 + $0x2c4] ss:$8 sps:$4 sm:$0xff]  }
 0xbff   :  { %v3511_v37 = vmax.f32 %v3506_v34, 0.0  ;;  %v7650_v38 = vpop.f32.mrb[51].mxu1  ;;  %v8162_v34 = vld [vmem:[%s9950_s3 + $0x2b4] ss:$8 sps:$4 sm:$0xff]   ;;  %v8163_v36 = vld [vmem:[%s9950_s3 + $0x2c0] ss:$8 sps:$4 sm:$0xff]  }
 0xc00   :  { %v8171_v38 = vld [vmem:[%s9950_s3 + $0x2e4] ss:$8 sps:$4 sm:$0xff]  }
 0xc01   :  { %v3512_v41 = vpack.c.bf16 %v3511_v37, %v3511_v37  ;;  %v8166_v37 = vld [vmem:[%s9950_s3 + $0x2d0] ss:$8 sps:$4 sm:$0xff]  }
 0xc03   :  { %7007 = vmatmul.mubr.msk.bf16.vlgmr.msra.gmra.mrb[52].mxu1 %vm305_vm4, %v3512_v41  ;;  %v8174_v41 = vld [vmem:[%s9950_s3 + $0x2f4] ss:$8 sps:$4 sm:$0xff]  }
 0xc04   :  { %3951 = vmatpush1.bf16.msra.mxu1 %v8110_v40  ;;  %v8169_v40 = vld [vmem:[%s9950_s3 + $0x2e0] ss:$8 sps:$4 sm:$0xff]  }
 0xc05   :  { %3952 = vmatprep.subr.bf16.mxu1 %v8600_v39 }
 0xc08   :  { %3953 = vmatpush1.bf16.msra.mxu1 %v8114_v45  ;;  %v8172_v45 = vld [vmem:[%s9950_s3 + $0x2f0] ss:$8 sps:$4 sm:$0xff]  }
 0xc09   :  { %3954 = vmatprep.subr.bf16.mxu1 %v8600_v39 }
 0xc0c   :  { %3955 = vmatpush1.bf16.msra.mxu1 %v8118_v46  ;;  %v8175_v46 = vld [vmem:[#allocation9 + $0x7e0] ss:$12 sps:$4 sm:$0xff]  }
 0xc0d   :  { %3956 = vmatprep.subr.bf16.mxu1 %v8600_v39 }
 0xc10   :  { %3957 = vmatpush1.bf16.msra.mxu1 %v8122_v47  ;;  %v8177_v47 = vld [vmem:[#allocation9 + $0x7e4] ss:$12 sps:$4 sm:$0xff]  }
 0xc11   :  { %3958 = vmatprep.subr.bf16.mxu1 %v8600_v39 }
 0xc14   :  { %3959 = vmatpush1.bf16.msra.mxu1 %v8126_v48  ;;  %v8181_v48 = vld [vmem:[#allocation9 + $0x7fc] ss:$12 sps:$4 sm:$0xff]  }
 0xc15   :  { %3960 = vmatprep.subr.bf16.mxu1 %v8600_v39 }
 0xc18   :  { %3961 = vmatpush1.bf16.msra.mxu1 %v8130_v52  ;;  %v8179_v52 = vld [vmem:[#allocation9 + $0x7f8] ss:$12 sps:$4 sm:$0xff]  }
 0xc19   :  { %3962 = vmatprep.subr.bf16.mxu1 %v8600_v39 }
 0xc1c   :  { %3963 = vmatpush1.bf16.msra.mxu1 %v8134_v53  ;;  %v8185_v53 = vld [vmem:[#allocation9 + $0x814] ss:$12 sps:$4 sm:$0xff]  }
 0xc1d   :  { %3964 = vmatprep.subr.bf16.mxu1 %v8600_v39 }
 0xc20   :  { %3965 = vmatpush1.bf16.msra.mxu1 %v8138_v54  ;;  %v8183_v54 = vld [vmem:[#allocation9 + $0x810] ss:$12 sps:$4 sm:$0xff]  }
 0xc21   :  { %3966 = vmatprep.subr.bf16.mxu1 %v8600_v39 }
 0xc24   :  { %3967 = vmatpush1.bf16.msra.mxu1 %v8142_v55  ;;  %v8189_v55 = vld [vmem:[#allocation9 + $0x82c] ss:$12 sps:$4 sm:$0xff]  }
 0xc25   :  { %3968 = vmatprep.subr.bf16.mxu1 %v8600_v39 }
 0xc28   :  { %3969 = vmatpush1.bf16.msra.mxu1 %v8146_v56  ;;  %v8187_v56 = vld [vmem:[#allocation9 + $0x828] ss:$12 sps:$4 sm:$0xff]  }
 0xc29   :  { %3970 = vmatprep.subr.bf16.mxu1 %v8600_v39 }
 0xc2c   :  { %3971 = vmatpush1.bf16.msra.mxu1 %v8150_v59  ;;  %v8197_v59 = vld [vmem:[#allocation9 + $0x85c] ss:$12 sps:$4 sm:$0xff]  }
 0xc2d   :  { %3972 = vmatprep.subr.bf16.mxu1 %v8600_v39 }
 0xc30   :  { %3973 = vmatpush1.bf16.msra.mxu1 %v8154_v62  ;;  %v8199_v62 = vld [vmem:[#allocation9 + $0x870] ss:$12 sps:$4 sm:$0xff]  }
 0xc31   :  { %4458 = vmatprep.subr.bf16.mxu1 %v8177_v47  ;;  %v8206_v47 = vld [vmem:[#allocation9 + $0x890] ss:$12 sps:$4 sm:$0xff]  }
 0xcd6   :  { %v3636_v3 = vpop.f32.mrb[52].mxu1 }
 0xcd7   :  { %v3637_v4 = vadd.f32 %v3636_v3, %v3532_v1  ;;  %v3638_v5 = vpop.f32.mrb[53].mxu1  ;;  %v8203_v1 = vld [vmem:[#allocation9 + $0x888] ss:$12 sps:$4 sm:$0xff]   ;;  %v8207_v3 = vld [vmem:[#allocation9 + $0x8a0] ss:$12 sps:$4 sm:$0xff]  }
 0xcd8   :  { %v3639_v6 = vadd.f32 %v3638_v5, %v3536_v2  ;;  %v3640_v10 = vpop.f32.mrb[54].mxu1  ;;  %v8209_v2 = vld [vmem:[#allocation9 + $0x8a4] ss:$12 sps:$4 sm:$0xff]  }
 0xcd9   :  { %v3643_v11 = vmax.f32 %v3637_v4, 0.0  ;;  %v3641_v15 = vpop.f32.mrb[55].mxu1  ;;  %v8213_v4 = vld [vmem:[#allocation9 + $0x8bc] ss:$12 sps:$4 sm:$0xff]   ;;  %v8211_v5 = vld [vmem:[#allocation9 + $0x8b8] ss:$12 sps:$4 sm:$0xff]  }
 0xcda   :  { %v3644_v16 = vmax.f32 %v3639_v6, 0.0 }
 0xcdb   :  { %v3645_v24 = vpack.c.bf16 %v3643_v11, %v3643_v11 }
 0xcdc   :  { %v3646_v20 = vpack.c.bf16 %v3644_v16, %v3644_v16 }
 0xcde   :  { %7044 = vmatprep.mubr.msk.bf16.mxu0 %vm611_vm5, %v3646_v20  ;;  %7045 = vmatprep.mubr.msk.bf16.mxu1 %vm611_vm5, %v3646_v20 }
 0xcdf   :  { %3942 = vmatmul.mubr.bf16.vlgmr.msra.gmra.mrb[48].mxu0 %v3645_v24  ;;  %3983 = vmatmul.mubr.bf16.vlgmr.msra.gmra.mrb[56].mxu1 %v3645_v24 }
 0xce0   :  { %7652 = vmatpush3.bf16.msra.mxu0 %v8155_v21  ;;  %7655 = vmatprep.mubr.msk.bf16.mxu0 %vm8599_vm0, %v8598_v0 }
 0xce1   :  { %7653 = vmatprep.subr.bf16.mxu0 %v8598_v0  ;;  %v8160_v0 = vld [vmem:[%s9950_s3 + $0x2b0] ss:$8 sps:$4 sm:$0xff]   ;;  %4459 = vmatpush1.bf16.msra.mxu1 %v8175_v46  ;;  %v8202_v46 = vld [vmem:[#allocation9 + $0x878] ss:$12 sps:$4 sm:$0xff]  }
 0xce2   :  { %4460 = vmatprep.subr.bf16.mxu1 %v8181_v48  ;;  %v8210_v48 = vld [vmem:[#allocation9 + $0x8a8] ss:$12 sps:$4 sm:$0xff]  }
 0xce4   :  { %7654 = vmatpush3.bf16.msra.mxu0 %v4018_v27 }
 0xce5   :  { %4151 = vmatprep.subr.bf16.mxu0 %v8159_v28  ;;  %4461 = vmatpush1.bf16.msra.mxu1 %v8179_v52  ;;  %v8214_v52 = vld [vmem:[#allocation9 + $0x8c0] ss:$12 sps:$4 sm:$0xff]  }
 0xce6   :  { %4462 = vmatprep.subr.bf16.mxu1 %v8185_v53  ;;  %v8217_v53 = vld [vmem:[#allocation9 + $0x8d4] ss:$12 sps:$4 sm:$0xff]  }
 0xce7   :  { %7656 = vmatmul.mubr.msk.bf16.vlgmr.msra.gmra.mrb[52].mxu0 %vm171_vm3, %v8756_v29  ;;  %v8168_v29 = vld [vmem:[%s9950_s3 + $0x2d4] ss:$8 sps:$4 sm:$0xff]  }
 0xce8   :  { %4152 = vmatpush1.bf16.msra.mxu0 %v8157_v33  ;;  %4183 = vmatprep.mubr.bf16.mxu0 %v8600_v39 }
 0xce9   :  { %4153 = vmatprep.subr.bf16.mxu0 %v8162_v34  ;;  %4463 = vmatpush1.bf16.msra.mxu1 %v8183_v54  ;;  %v8215_v54 = vld [vmem:[#allocation9 + $0x8d0] ss:$12 sps:$4 sm:$0xff]  }
 0xcea   :  { %4464 = vmatprep.subr.bf16.mxu1 %v8189_v55  ;;  %v8218_v55 = vld [vmem:[#allocation9 + $0x8d8] ss:$12 sps:$4 sm:$0xff]  }
 0xcec   :  { %4154 = vmatpush1.bf16.msra.mxu0 %v8160_v0 }
 0xced   :  { %4155 = vmatprep.subr.bf16.mxu0 %v8165_v35  ;;  %4465 = vmatpush1.bf16.msra.mxu1 %v8187_v56  ;;  %v8221_v56 = vld [vmem:[#allocation9 + $0x8ec] ss:$12 sps:$4 sm:$0xff]  }
 0xcee   :  { %4466 = vmatprep.subr.bf16.mxu1 %v8193_v57  ;;  %v8219_v57 = vld [vmem:[#allocation9 + $0x8e8] ss:$12 sps:$4 sm:$0xff]  }
 0xcf0   :  { %4156 = vmatpush1.bf16.msra.mxu0 %v8163_v36  ;;  %v8178_v36 = vld [vmem:[#allocation9 + $0x7e8] ss:$12 sps:$4 sm:$0xff]  }
 0xcf1   :  { %4157 = vmatprep.subr.bf16.mxu0 %v8168_v29  ;;  %4467 = vmatpush1.bf16.msra.mxu1 %v8191_v58  ;;  %v8222_v58 = vld [vmem:[#allocation9 + $0x8f0] ss:$12 sps:$4 sm:$0xff]  }
 0xcf2   :  { %4468 = vmatprep.subr.bf16.mxu1 %v8197_v59  ;;  %v8223_v59 = vld [vmem:[%s9954_s7 + $0x40] sm:$0xff]  }
 0xcf4   :  { %4158 = vmatpush1.bf16.msra.mxu0 %v8166_v37  ;;  %v8182_v37 = vld [vmem:[#allocation9 + $0x800] ss:$12 sps:$4 sm:$0xff]  }
 0xcf5   :  { %4159 = vmatprep.subr.bf16.mxu0 %v8171_v38  ;;  %4469 = vmatpush1.bf16.msra.mxu1 %v8195_v60  ;;  %v8186_v38 = vld [vmem:[#allocation9 + $0x818] ss:$12 sps:$4 sm:$0xff]  }
 0xcf6   :  { %4470 = vmatprep.subr.bf16.mxu1 %v8201_v61  ;;  %v8224_v60 = vld [vmem:[%s9954_s7 + $0xc0] sm:$0xff]   ;;  %v9284_v61 = vld [vmem:[#allocation10] sm:$0x7] }
 0xcf8   :  { %4160 = vmatpush1.bf16.msra.mxu0 %v8169_v40  ;;  %v8190_v40 = vld [vmem:[#allocation9 + $0x830] ss:$12 sps:$4 sm:$0xff]  }
 0xcf9   :  { %4161 = vmatprep.subr.bf16.mxu0 %v8174_v41  ;;  %4471 = vmatpush1.bf16.msra.mxu1 %v8199_v62  ;;  %v8194_v41 = vld [vmem:[#allocation9 + $0x848] ss:$12 sps:$4 sm:$0xff]   ;;  %v9286_v62 = vld [vmem:[#allocation10 + $0x3] sm:$0x7] }
 0xcfa   :  { %4472 = vmatprep.subr.bf16.mxu1 %v8205_v63  ;;  %v411_v63 = vrot.slane %v9284_v61, %v8808_v25 }
 0xcfc   :  { %4162 = vmatpush1.bf16.msra.mxu0 %v8172_v45  ;;  %v8198_v45 = vld [vmem:[#allocation9 + $0x860] ss:$12 sps:$4 sm:$0xff]  }
 0xcfd   :  { %4499 = vmatprep.subr.bf16.mxu0 %v8600_v39  ;;  %4473 = vmatpush1.bf16.msra.mxu1 %v8203_v1  ;;  %v957_v1 = vrot.slane %v9286_v62, %v8805_v23 }
 0xcfe   :  { %4474 = vmatprep.subr.bf16.mxu1 %v8209_v2 }
 0xd01   :  { %4475 = vmatpush1.bf16.msra.mxu1 %v8207_v3 }
 0xd02   :  { %4476 = vmatprep.subr.bf16.mxu1 %v8213_v4 }
 0xd05   :  { %4477 = vmatpush1.bf16.msra.mxu1 %v8211_v5  ;;  %v652_v5 = vadd.f32 %v8862_v14, %v411_v63  ;;  %v8226_v14 = vld [vmem:[%s9954_s7 + $0x80] sm:$0xff]   ;;  %v8244_v63 = vld [vmem:[%s9954_s7 + $0xe8] sm:$0xff]  }
 0xd06   :  { %4478 = vmatprep.subr.bf16.mxu1 %v8217_v53  ;;  %v8236_v53 = vld [vmem:[%s9954_s7 + $0xd8] sm:$0xff]  }
 0xd09   :  { %4479 = vmatpush1.bf16.msra.mxu1 %v8215_v54  ;;  %v8237_v54 = vld [vmem:[%s9954_s7 + $0x18] sm:$0xff]  }
 0xd0a   :  { %4480 = vmatprep.subr.bf16.mxu1 %v8221_v56  ;;  %v8239_v56 = vld [vmem:[%s9954_s7 + $0x60] sm:$0xff]  }
 0xd0d   :  { %4481 = vmatpush1.bf16.msra.mxu1 %v8219_v57  ;;  %v8240_v57 = vld [vmem:[%s9954_s7 + $0xe0] sm:$0xff]  }
 0xd0e   :  { %7331 = vmatprep.subr.bf16.mxu1 %v8223_v59  ;;  %v8242_v59 = vld [vmem:[%s9954_s7 + $0xa0] sm:$0xff]  }
 0xdb2   :  { %v9260_v6 = vpop.f32.mrb[48].mxu0  ;;  %v9262_v10 = vpop.f32.mrb[56].mxu1 }
 0xdb3   :  { %v9264_v11 = vpop.f32.mrb[49].mxu0  ;;  %v3986_v15 = vpop.f32.mrb[57].mxu1 }
 0xdb4   :  { %v3947_v16 = vpop.f32.mrb[50].mxu0  ;;  %v3987_v20 = vpop.f32.mrb[58].mxu1  ;;  %v1199_v15 = vadd.f32 %v8925_v42, %v957_v1  ;;  %v8227_v42 = vld [vmem:[%s9954_s7 + $0x48] sm:$0xff]   ;;  %v9361_v1 = vld [vmem:[#allocation10 + $0x6] sm:$0x7] }
 0xdb5   :  { %v3948_v21 = vpop.f32.mrb[51].mxu0  ;;  %v3988_v24 = vpop.f32.mrb[59].mxu1 }
 0xdba   :  { %v4054_v27 = vpop.f32.mrb[52].mxu0 }
 0xdbb   :  { %v4055_v28 = vadd.f32 %v7046_v26, %v4054_v27  ;;  %v7657_v33 = vpop.f32.mrb[53].mxu0 }
 0xdbc   :  { %v4057_v34 = vpop.f32.mrb[54].mxu0  ;;  %v697_v33 = vmax.f32 %v652_v5, 0.0  ;;  %v8247_v5 = vld [vmem:[%s9954_s7 + $0x70] sm:$0xff]  }
 0xdbd   :  { %v4060_v0 = vmax.f32 %v4055_v28, 0.0  ;;  %v7658_v35 = vpop.f32.mrb[55].mxu0  ;;  %v1245_v34 = vmax.f32 %v1199_v15, 0.0  ;;  %v8248_v15 = vld [vmem:[%s9954_s7 + $0xf0] sm:$0xff]  }
 0xdbe   :  { %v8225_v35 = vld [vmem:[%s9954_s7] sm:$0xff]  }
 0xdbf   :  { %v4061_v29 = vpack.c.bf16 %v4060_v0, %v4060_v0 }
 0xdc1   :  { %7074 = vmatmul.mubr.msk.bf16.vlgmr.msra.gmra.mrb[56].mxu0 %vm305_vm4, %v4061_v29  ;;  %v8228_v29 = vld [vmem:[%s9954_s7 + $0xc8] sm:$0xff]  }
 0xdc2   :  { %4500 = vmatpush1.bf16.msra.mxu0 %v8178_v36 }
 0xdc3   :  { %4501 = vmatprep.subr.bf16.mxu0 %v8600_v39 }
 0xdc6   :  { %4502 = vmatpush1.bf16.msra.mxu0 %v8182_v37  ;;  %v700_v37 = vpack.c.bf16 %v697_v33, %v697_v33 }
 0xdc7   :  { %4503 = vmatprep.subr.bf16.mxu0 %v8600_v39 }
 0xdca   :  { %4504 = vmatpush1.bf16.msra.mxu0 %v8186_v38  ;;  %v1248_v38 = vpack.c.bf16 %v1245_v34, %v1245_v34 }
 0xdcb   :  { %4505 = vmatprep.subr.bf16.mxu0 %v8600_v39 }
 0xdce   :  { %4506 = vmatpush1.bf16.msra.mxu0 %v8190_v40  ;;  %v8229_v40 = vld [vmem:[%s9954_s7 + $0x8] sm:$0xff]  }
 0xdcf   :  { %4507 = vmatprep.subr.bf16.mxu0 %v8600_v39 }
 0xdd2   :  { %4508 = vmatpush1.bf16.msra.mxu0 %v8194_v41  ;;  %v8230_v41 = vld [vmem:[%s9954_s7 + $0x88] sm:$0xff]  }
 0xdd3   :  { %4509 = vmatprep.subr.bf16.mxu0 %v8600_v39 }
 0xdd6   :  { %4510 = vmatpush1.bf16.msra.mxu0 %v8198_v45  ;;  %v8231_v45 = vld [vmem:[%s9954_s7 + $0x50] sm:$0xff]  }
 0xdd7   :  { %4511 = vmatprep.subr.bf16.mxu0 %v8600_v39 }
 0xdda   :  { %4512 = vmatpush1.bf16.msra.mxu0 %v8202_v46  ;;  %v8232_v46 = vld [vmem:[%s9954_s7 + $0xd0] sm:$0xff]  }
 0xddb   :  { %4513 = vmatprep.subr.bf16.mxu0 %v8600_v39 }
 0xdde   :  { %4514 = vmatpush1.bf16.msra.mxu0 %v8206_v47  ;;  %v8233_v47 = vld [vmem:[%s9954_s7 + $0x10] sm:$0xff]  }
 0xddf   :  { %4515 = vmatprep.subr.bf16.mxu0 %v8600_v39 }
 0xde2   :  { %4516 = vmatpush1.bf16.msra.mxu0 %v8210_v48  ;;  %v8234_v48 = vld [vmem:[%s9954_s7 + $0x90] sm:$0xff]  }
 0xde3   :  { %4517 = vmatprep.subr.bf16.mxu0 %v8600_v39 }
 0xde6   :  { %4518 = vmatpush1.bf16.msra.mxu0 %v8214_v52  ;;  %v8235_v52 = vld [vmem:[%s9954_s7 + $0x58] sm:$0xff]  }
 0xde7   :  { %4519 = vmatprep.subr.bf16.mxu0 %v8600_v39 }
 0xdea   :  { %4520 = vmatpush1.bf16.msra.mxu0 %v8218_v55  ;;  %v8238_v55 = vld [vmem:[%s9954_s7 + $0x98] sm:$0xff]  }
 0xdeb   :  { %4521 = vmatprep.subr.bf16.mxu0 %v8600_v39  ;;  %v4076_v39 = vld [vmem:[#allocation7 + $0xe] sm:$0x3] }
 0xdec   :  { %v4081_v2 = vrot.slane %v4076_v39, %v8805_v23  ;;  %v4085_v3 = vrot.slane %v4076_v39, %v8808_v25  ;;  %v8243_v39 = vld [vmem:[%s9954_s7 + $0x68] sm:$0xff]  }
 0xdee   :  { %4522 = vmatpush1.bf16.msra.mxu0 %v8222_v58  ;;  %v8241_v58 = vld [vmem:[%s9954_s7 + $0x20] sm:$0xff]  }
 0xdef   :  { %7353 = vmatprep.subr.bf16.mxu0 %v8224_v60  ;;  %v9353_v60 = vsub.s32 2, %v8802_v22  ;;  %v8246_v22 = vld [vmem:[%s9954_s7 + $0xa8] sm:$0xff]  }
 0xe94   :  { %v4185_v4 = vpop.f32.mrb[56].mxu0 }
 0xe95   :  { %v4186_v16 = vadd.f32 %v4185_v4, %v4081_v2  ;;  %v4187_v20 = vpop.f32.mrb[57].mxu0  ;;  %v8245_v2 = vld [vmem:[%s9954_s7 + $0x28] sm:$0xff]   ;;  %v415_v4 = vrot.slane %v9284_v61, %v9353_v60 }
 0xe96   :  { %v4188_v21 = vadd.f32 %v4187_v20, %v4085_v3  ;;  %v4189_v24 = vpop.f32.mrb[58].mxu0  ;;  %v407_v3 = vrot.slane %v9284_v61, %v8805_v23  ;;  %v1510_v20 = vrot.slane %v9361_v1, %v8808_v25  ;;  %v8249_v61 = vld [vmem:[%s9954_s7 + $0x30] sm:$0xff]  }
 0xe97   :  { %v4192_v26 = vmax.f32 %v4186_v16, 0.0  ;;  %v4190_v27 = vpop.f32.mrb[59].mxu0  ;;  %v965_v16 = vrot.slane %v9286_v62, %v9353_v60 }
 0xe98   :  { %v4193_v28 = vmax.f32 %v4188_v21, 0.0  ;;  %v8250_v21 = vld [vmem:[%s9954_s7 + $0xb0] sm:$0xff]   ;;  %v650_v24 = vadd.f32 %v8858_v12, %v407_v3  ;;  %v8251_v27 = vld [vmem:[%s9954_s7 + $0x78] sm:$0xff]   ;;  %v1750_v34 = vadd.f32 %v8996_v9, %v1510_v20  ;;  %v8256_v9 = vld [vmem:[%s9954_s7 + $0x1c0] sm:$0xff]  }
 0xe99   :  { %v4194_v36 = vpack.c.bf16 %v4192_v26, %v4192_v26  ;;  %v691_v26 = vadd.f32 %v8860_v13, %v415_v4  ;;  %v1240_v33 = vadd.f32 %v8927_v43, %v965_v16  ;;  %v8253_v12 = vld [vmem:[%s9954_s7 + $0x38] sm:$0xff]   ;;  %v8255_v43 = vld [vmem:[%s9954_s7 + $0x140] sm:$0xff]   ;;  %v8275_v3 = vld [vmem:[%s9954_s7 + $0x168] sm:$0xff]   ;;  %v961_v16 = vrot.slane %v9286_v62, %v8808_v25 }
 0xe9a   :  { %v4195_v0 = vpack.c.bf16 %v4193_v28, %v4193_v28  ;;  %v8252_v28 = vld [vmem:[%s9954_s7 + $0xf8] sm:$0xff]   ;;  %v8276_v4 = vld [vmem:[%s9954_s7 + $0x1e8] sm:$0xff]  }
 0xe9b   :  { %v8254_v13 = vld [vmem:[%s9954_s7 + $0xb8] sm:$0xff]   ;;  %v8278_v20 = vld [vmem:[%s9954_s7 + $0x1a8] sm:$0xff]  }
 0xe9c   :  { %7111 = vmatprep.mubr.msk.bf16.mxu1 %vm611_vm5, %v4195_v0  ;;  %7112 = vmatprep.mubr.msk.bf16.mxu0 %vm611_vm5, %v4195_v0  ;;  %v696_v0 = vmax.f32 %v650_v24, 0.0  ;;  %v8280_v24 = vld [vmem:[%s9954_s7 + $0x1f0] sm:$0xff]  }
 0xe9d   :  { %4491 = vmatmul.mubr.bf16.vlgmr.msra.gmra.mrb[60].mxu1 %v4194_v36  ;;  %4532 = vmatmul.mubr.bf16.vlgmr.msra.gmra.mrb[60].mxu0 %v4194_v36  ;;  %v1795_v36 = vmax.f32 %v1750_v34, 0.0  ;;  %v8283_v34 = vld [vmem:[%s9954_s7 + $0x178] sm:$0xff]  }
 0xe9e   :  { %7332 = vmatpush3.bf16.msra.mxu1 %v8225_v35  ;;  %7354 = vmatpush3.bf16.msra.mxu0 %v8226_v14  ;;  %v698_v35 = vmax.f32 %v691_v26, 0.0  ;;  %v1247_v14 = vmax.f32 %v1240_v33, 0.0  ;;  %v8282_v33 = vld [vmem:[%s9954_s7 + $0x1b0] sm:$0xff]  }
 0xe9f   :  { %6120 = vmatprep.mubr.bf16.mxu1 %v700_v37  ;;  %6160 = vmatprep.mubr.bf16.mxu0 %v1248_v38  ;;  %v8258_v38 = vld [vmem:[%s9954_s7 + $0x180] sm:$0xff]  }
 0xea0   :  { %7333 = vmatprep.subr.bf16.mxu1 %v8227_v42  ;;  %7355 = vmatprep.subr.bf16.mxu0 %v8228_v29  ;;  %v8257_v42 = vld [vmem:[%s9954_s7 + $0x100] sm:$0xff]   ;;  %v699_v29 = vpack.c.bf16 %v696_v0, %v696_v0  ;;  %v701_v37 = vpack.c.bf16 %v698_v35, %v698_v35  ;;  %v8285_v35 = vld [vmem:[%s9954_s7 + $0x138] sm:$0xff]  }
 0xea2   :  { %7334 = vmatpush3.bf16.msra.mxu1 %v8229_v40  ;;  %7356 = vmatpush3.bf16.msra.mxu0 %v8230_v41  ;;  %v1250_v40 = vpack.c.bf16 %v1247_v14, %v1247_v14  ;;  %v8259_v41 = vld [vmem:[%s9954_s7 + $0x148] sm:$0xff]  }
 0xea3   :  { %7335 = vmatprep.subr.bf16.mxu1 %v8231_v45  ;;  %7357 = vmatprep.subr.bf16.mxu0 %v8232_v46  ;;  %v8260_v45 = vld [vmem:[%s9954_s7 + $0x1c8] sm:$0xff]   ;;  %v1798_v46 = vpack.c.bf16 %v1795_v36, %v1795_v36 }
 0xea6   :  { %7336 = vmatpush3.bf16.msra.mxu1 %v8233_v47  ;;  %7358 = vmatpush3.bf16.msra.mxu0 %v8234_v48  ;;  %v8261_v47 = vld [vmem:[%s9954_s7 + $0x108] sm:$0xff]  }
 0xea7   :  { %7337 = vmatprep.subr.bf16.mxu1 %v8235_v52  ;;  %7359 = vmatprep.subr.bf16.mxu0 %v8236_v53  ;;  %v8262_v48 = vld [vmem:[%s9954_s7 + $0x188] sm:$0xff]   ;;  %v8263_v52 = vld [vmem:[%s9954_s7 + $0x150] sm:$0xff]  }
 0xea8   :  { %v8264_v53 = vld [vmem:[%s9954_s7 + $0x1d0] sm:$0xff]  }
 0xeaa   :  { %7338 = vmatpush3.bf16.msra.mxu1 %v8237_v54  ;;  %7360 = vmatpush3.bf16.msra.mxu0 %v8238_v55  ;;  %v8265_v54 = vld [vmem:[%s9954_s7 + $0x110] sm:$0xff]  }
 0xeab   :  { %7339 = vmatprep.subr.bf16.mxu1 %v8239_v56  ;;  %7361 = vmatprep.subr.bf16.mxu0 %v8240_v57  ;;  %v8266_v55 = vld [vmem:[%s9954_s7 + $0x190] sm:$0xff]   ;;  %v8267_v56 = vld [vmem:[%s9954_s7 + $0x158] sm:$0xff]  }
 0xeac   :  { %v8268_v57 = vld [vmem:[%s9954_s7 + $0x1d8] sm:$0xff]  }
 0xeae   :  { %7340 = vmatpush3.bf16.msra.mxu1 %v8241_v58  ;;  %7362 = vmatpush3.bf16.msra.mxu0 %v8242_v59  ;;  %v8269_v58 = vld [vmem:[%s9954_s7 + $0x118] sm:$0xff]  }
 0xeaf   :  { %7341 = vmatprep.subr.bf16.mxu1 %v8243_v39  ;;  %7363 = vmatprep.subr.bf16.mxu0 %v8244_v63  ;;  %v8270_v59 = vld [vmem:[%s9954_s7 + $0x198] sm:$0xff]   ;;  %v8271_v39 = vld [vmem:[%s9954_s7 + $0x160] sm:$0xff]  }
 0xeb0   :  { %v8272_v63 = vld [vmem:[%s9954_s7 + $0x1e0] sm:$0xff]  }
 0xeb2   :  { %7342 = vmatpush3.bf16.msra.mxu1 %v8245_v2  ;;  %7364 = vmatpush3.bf16.msra.mxu0 %v8246_v22  ;;  %v8273_v2 = vld [vmem:[%s9954_s7 + $0x120] sm:$0xff]  }
 0xeb3   :  { %7343 = vmatprep.subr.bf16.mxu1 %v8247_v5  ;;  %7365 = vmatprep.subr.bf16.mxu0 %v8248_v15  ;;  %v8274_v22 = vld [vmem:[%s9954_s7 + $0x1a0] sm:$0xff]   ;;  %v8277_v15 = vld [vmem:[%s9954_s7 + $0x128] sm:$0xff]  }
 0xeb4   :  { %v9471_v5 = vld [vmem:[#allocation10 + $0x9] sm:$0x7] }
 0xeb5   :  { %v2055_v62 = vrot.slane %v9471_v5, %v8805_v23  ;;  %v2063_v26 = vrot.slane %v9471_v5, %v9353_v60 }
 0xeb6   :  { %7344 = vmatpush3.bf16.msra.mxu1 %v8249_v61  ;;  %7366 = vmatpush3.bf16.msra.mxu0 %v8250_v21  ;;  %v8279_v61 = vld [vmem:[%s9954_s7 + $0x170] sm:$0xff]   ;;  %v1506_v21 = vrot.slane %v9361_v1, %v8805_v23 }
 0xeb7   :  { %7345 = vmatprep.subr.bf16.mxu1 %v8251_v27  ;;  %7367 = vmatprep.subr.bf16.mxu0 %v8252_v28  ;;  %v8281_v27 = vld [vmem:[%s9954_s7 + $0x130] sm:$0xff]   ;;  %v1201_v28 = vadd.f32 %v8929_v44, %v961_v16  ;;  %v2297_v0 = vadd.f32 %v9059_v49, %v2055_v62  ;;  %v2338_v44 = vadd.f32 %v9061_v50, %v2063_v26  ;;  %v8288_v49 = vld [vmem:[%s9954_s7 + $0x2c0] sm:$0xff]   ;;  %v8309_v16 = vld [vmem:[%s9954_s7 + $0x228] sm:$0xff]  }
 0xeb8   :  { %v2059_v62 = vrot.slane %v9471_v5, %v8808_v25  ;;  %v8314_v5 = vld [vmem:[%s9954_s7 + $0x2b0] sm:$0xff]  }
 0xeb9   :  { %v2343_v50 = vmax.f32 %v2297_v0, 0.0  ;;  %v2345_v36 = vmax.f32 %v2338_v44, 0.0  ;;  %v8317_v44 = vld [vmem:[%s9954_s7 + $0x238] sm:$0xff]  }
 0xeba   :  { %7346 = vmatpush3.bf16.msra.mxu1 %v8253_v12  ;;  %7368 = vmatpush3.bf16.msra.mxu0 %v8254_v13  ;;  %v1748_v12 = vadd.f32 %v8992_v7, %v1506_v21  ;;  %v8284_v13 = vld [vmem:[%s9954_s7 + $0x1f8] sm:$0xff]   ;;  %v8310_v21 = vld [vmem:[%s9954_s7 + $0x2a8] sm:$0xff]  }
 0xebb   :  { %7375 = vmatprep.subr.bf16.mxu1 %v8255_v43  ;;  %7397 = vmatprep.subr.bf16.mxu0 %v8256_v9  ;;  %v1246_v43 = vmax.f32 %v1201_v28, 0.0  ;;  %v8286_v7 = vld [vmem:[%s9954_s7 + $0x1b8] sm:$0xff]   ;;  %v8287_v9 = vld [vmem:[%s9954_s7 + $0x240] sm:$0xff]   ;;  %v8313_v28 = vld [vmem:[%s9954_s7 + $0x230] sm:$0xff]  }
 0xebc   :  { %v1794_v14 = vmax.f32 %v1748_v12, 0.0  ;;  %v2299_v12 = vadd.f32 %v9063_v51, %v2059_v62  ;;  %v8318_v51 = vld [vmem:[%s9954_s7 + $0x2b8] sm:$0xff]  }
 0xebd   :  { %6121 = vmatmul.mubr.bf16.vlgmr.msra.gmra.mrb[64].mxu1 %v699_v29  ;;  %6161 = vmatmul.mubr.bf16.vlgmr.msra.gmra.mrb[64].mxu0 %v701_v37  ;;  %v1249_v29 = vpack.c.bf16 %v1246_v43, %v1246_v43  ;;  %v8290_v37 = vld [vmem:[%s9954_s7 + $0x280] sm:$0xff]  }
 0xebe   :  { %7376 = vmatpush3.bf16.msra.mxu1 %v8257_v42  ;;  %6200 = vmatprep.mubr.bf16.mxu1 %v1250_v40  ;;  %v8289_v42 = vld [vmem:[%s9954_s7 + $0x200] sm:$0xff]   ;;  %v8291_v40 = vld [vmem:[%s9954_s7 + $0x248] sm:$0xff]  }
 0xebf   :  { %7398 = vmatpush3.bf16.msra.mxu0 %v8258_v38  ;;  %6240 = vmatprep.mubr.bf16.mxu0 %v1798_v46  ;;  %v1797_v38 = vpack.c.bf16 %v1794_v14, %v1794_v14  ;;  %v2348_v46 = vpack.c.bf16 %v2345_v36, %v2345_v36  ;;  %v8319_v43 = vld [vmem:[%s9954_s7 + $0x340] sm:$0xff]  }
 0xec0   :  { %7377 = vmatprep.subr.bf16.mxu1 %v8259_v41  ;;  %7399 = vmatprep.subr.bf16.mxu0 %v8260_v45  ;;  %v2346_v41 = vpack.c.bf16 %v2343_v50, %v2343_v50  ;;  %v8292_v45 = vld [vmem:[%s9954_s7 + $0x2c8] sm:$0xff]   ;;  %v8321_v14 = vld [vmem:[%s9954_s7 + $0x300] sm:$0xff]  }
 0xec1   :  { %v8322_v50 = vld [vmem:[%s9954_s7 + $0x380] sm:$0xff]  }
 0xec2   :  { %7378 = vmatpush3.bf16.msra.mxu1 %v8261_v47  ;;  %v8293_v47 = vld [vmem:[%s9954_s7 + $0x208] sm:$0xff]  }
 0xec3   :  { %7400 = vmatpush3.bf16.msra.mxu0 %v8262_v48  ;;  %7379 = vmatprep.subr.bf16.mxu1 %v8263_v52  ;;  %v8294_v48 = vld [vmem:[%s9954_s7 + $0x288] sm:$0xff]   ;;  %v8295_v52 = vld [vmem:[%s9954_s7 + $0x250] sm:$0xff]  }
 0xec4   :  { %7401 = vmatprep.subr.bf16.mxu0 %v8264_v53  ;;  %v8296_v53 = vld [vmem:[%s9954_s7 + $0x2d0] sm:$0xff]  }
 0xec6   :  { %7380 = vmatpush3.bf16.msra.mxu1 %v8265_v54  ;;  %v8297_v54 = vld [vmem:[%s9954_s7 + $0x210] sm:$0xff]  }
 0xec7   :  { %7402 = vmatpush3.bf16.msra.mxu0 %v8266_v55  ;;  %7381 = vmatprep.subr.bf16.mxu1 %v8267_v56  ;;  %v8298_v55 = vld [vmem:[%s9954_s7 + $0x290] sm:$0xff]   ;;  %v8299_v56 = vld [vmem:[%s9954_s7 + $0x258] sm:$0xff]  }
 0xec8   :  { %7403 = vmatprep.subr.bf16.mxu0 %v8268_v57  ;;  %v8300_v57 = vld [vmem:[%s9954_s7 + $0x2d8] sm:$0xff]  }
 0xeca   :  { %7382 = vmatpush3.bf16.msra.mxu1 %v8269_v58  ;;  %v8301_v58 = vld [vmem:[%s9954_s7 + $0x218] sm:$0xff]  }
 0xecb   :  { %7404 = vmatpush3.bf16.msra.mxu0 %v8270_v59  ;;  %7383 = vmatprep.subr.bf16.mxu1 %v8271_v39  ;;  %v8302_v59 = vld [vmem:[%s9954_s7 + $0x298] sm:$0xff]   ;;  %v8303_v39 = vld [vmem:[%s9954_s7 + $0x260] sm:$0xff]  }
 0xecc   :  { %7405 = vmatprep.subr.bf16.mxu0 %v8272_v63  ;;  %v8304_v63 = vld [vmem:[%s9954_s7 + $0x2e0] sm:$0xff]  }
 0xece   :  { %7384 = vmatpush3.bf16.msra.mxu1 %v8273_v2  ;;  %v8305_v2 = vld [vmem:[%s9954_s7 + $0x220] sm:$0xff]  }
 0xecf   :  { %7406 = vmatpush3.bf16.msra.mxu0 %v8274_v22  ;;  %7385 = vmatprep.subr.bf16.mxu1 %v8275_v3  ;;  %v8306_v22 = vld [vmem:[%s9954_s7 + $0x2a0] sm:$0xff]   ;;  %v8307_v3 = vld [vmem:[%s9954_s7 + $0x268] sm:$0xff]  }
 0xed0   :  { %7407 = vmatprep.subr.bf16.mxu0 %v8276_v4  ;;  %v8308_v4 = vld [vmem:[%s9954_s7 + $0x2e8] sm:$0xff]  }
 0xed2   :  { %7386 = vmatpush3.bf16.msra.mxu1 %v8277_v15  ;;  %v9581_v15 = vld [vmem:[#allocation10 + $0xc] sm:$0x7] }
 0xed3   :  { %7408 = vmatpush3.bf16.msra.mxu0 %v8278_v20  ;;  %7387 = vmatprep.subr.bf16.mxu1 %v8279_v61  ;;  %v1514_v20 = vrot.slane %v9361_v1, %v9353_v60  ;;  %v9588_v61 = vld [vmem:[#allocation10 + $0xf] sm:$0x7]  ;;  %v8312_v1 = vld [vmem:[%s9954_s7 + $0x2f0] sm:$0xff]   ;;  %v2608_v26 = vrot.slane %v9581_v15, %v8808_v25 }
 0xed4   :  { %7409 = vmatprep.subr.bf16.mxu0 %v8280_v24  ;;  %v8311_v24 = vld [vmem:[%s9954_s7 + $0x270] sm:$0xff]  }
 0xed5   :  { %v2848_v0 = vadd.f32 %v9130_v32, %v2608_v26  ;;  %v8320_v32 = vld [vmem:[%s9954_s7 + $0x3c0] sm:$0xff]  }
 0xed6   :  { %7388 = vmatpush3.bf16.msra.mxu1 %v8281_v27  ;;  %v3153_v27 = vrot.slane %v9588_v61, %v8805_v23 }
 0xed7   :  { %7410 = vmatpush3.bf16.msra.mxu0 %v8282_v33  ;;  %7389 = vmatprep.subr.bf16.mxu1 %v8283_v34  ;;  %v1789_v33 = vadd.f32 %v8994_v8, %v1514_v20  ;;  %v8315_v34 = vld [vmem:[%s9954_s7 + $0x278] sm:$0xff]   ;;  %v2612_v20 = vrot.slane %v9581_v15, %v9353_v60 }
 0xed8   :  { %7411 = vmatprep.subr.bf16.mxu0 %v8284_v13  ;;  %v8316_v13 = vld [vmem:[%s9954_s7 + $0x2f8] sm:$0xff]   ;;  %v3395_v8 = vadd.f32 %v9193_v17, %v3153_v27  ;;  %v2893_v17 = vmax.f32 %v2848_v0, 0.0 }
 0xed9   :  { %v8347_v27 = vld [vmem:[%s9954_s7 + $0x378] sm:$0xff]  }
 0xeda   :  { %7390 = vmatpush3.bf16.msra.mxu1 %v8285_v35  ;;  %v1796_v35 = vmax.f32 %v1789_v33, 0.0  ;;  %v8348_v33 = vld [vmem:[%s9954_s7 + $0x3f8] sm:$0xff]  }
 0xedb   :  { %7412 = vmatpush3.bf16.msra.mxu0 %v8286_v7  ;;  %7419 = vmatprep.subr.bf16.mxu1 %v8287_v9  ;;  %v2344_v7 = vmax.f32 %v2299_v12, 0.0  ;;  %v3441_v9 = vmax.f32 %v3395_v8, 0.0 }
 0xedc   :  { %7441 = vmatprep.subr.bf16.mxu0 %v8288_v49  ;;  %v1799_v49 = vpack.c.bf16 %v1796_v35, %v1796_v35 }
 0xedd   :  { %6201 = vmatmul.mubr.bf16.vlgmr.msra.gmra.mrb[68].mxu1 %v1249_v29  ;;  %v2347_v36 = vpack.c.bf16 %v2344_v7, %v2344_v7  ;;  %v2896_v29 = vpack.c.bf16 %v2893_v17, %v2893_v17  ;;  %v8355_v7 = vld [vmem:[%s9954_s7 + $0x448] sm:$0xff]  }
 0xede   :  { %6241 = vmatmul.mubr.bf16.vlgmr.msra.gmra.mrb[68].mxu0 %v1797_v38  ;;  %7420 = vmatpush3.bf16.msra.mxu1 %v8289_v42  ;;  %v8323_v42 = vld [vmem:[%s9954_s7 + $0x348] sm:$0xff]   ;;  %v3444_v38 = vpack.c.bf16 %v3441_v9, %v3441_v9 }
 0xedf   :  { %6280 = vmatprep.mubr.bf16.mxu1 %v2346_v41  ;;  %7442 = vmatpush3.bf16.msra.mxu0 %v8290_v37  ;;  %v8324_v37 = vld [vmem:[%s9954_s7 + $0x3c8] sm:$0xff]  }
 0xee0   :  { %6320 = vmatprep.mubr.bf16.mxu0 %v2348_v46  ;;  %7421 = vmatprep.subr.bf16.mxu1 %v8291_v40  ;;  %v8325_v40 = vld [vmem:[%s9954_s7 + $0x308] sm:$0xff]   ;;  %v8328_v46 = vld [vmem:[%s9954_s7 + $0x3d0] sm:$0xff]  }
 0xee1   :  { %7443 = vmatprep.subr.bf16.mxu0 %v8292_v45  ;;  %v8326_v41 = vld [vmem:[%s9954_s7 + $0x388] sm:$0xff]   ;;  %v8327_v45 = vld [vmem:[%s9954_s7 + $0x350] sm:$0xff]  }
 0xee2   :  { %7422 = vmatpush3.bf16.msra.mxu1 %v8293_v47  ;;  %v8329_v47 = vld [vmem:[%s9954_s7 + $0x310] sm:$0xff]   ;;  %v8356_v17 = vld [vmem:[%s9954_s7 + $0x4c8] sm:$0xff]  }
 0xee3   :  { %7444 = vmatpush3.bf16.msra.mxu0 %v8294_v48  ;;  %7423 = vmatprep.subr.bf16.mxu1 %v8295_v52  ;;  %v8330_v48 = vld [vmem:[%s9954_s7 + $0x390] sm:$0xff]   ;;  %v8331_v52 = vld [vmem:[%s9954_s7 + $0x358] sm:$0xff]  }
 0xee4   :  { %7445 = vmatprep.subr.bf16.mxu0 %v8296_v53  ;;  %v8332_v53 = vld [vmem:[%s9954_s7 + $0x3d8] sm:$0xff]  }
 0xee6   :  { %7424 = vmatpush3.bf16.msra.mxu1 %v8297_v54  ;;  %v8333_v54 = vld [vmem:[%s9954_s7 + $0x318] sm:$0xff]  }
 0xee7   :  { %7446 = vmatpush3.bf16.msra.mxu0 %v8298_v55  ;;  %7425 = vmatprep.subr.bf16.mxu1 %v8299_v56  ;;  %v8334_v55 = vld [vmem:[%s9954_s7 + $0x398] sm:$0xff]   ;;  %v8335_v56 = vld [vmem:[%s9954_s7 + $0x360] sm:$0xff]  }
 0xee8   :  { %7447 = vmatprep.subr.bf16.mxu0 %v8300_v57  ;;  %v8336_v57 = vld [vmem:[%s9954_s7 + $0x3e0] sm:$0xff]  }
 0xeea   :  { %7426 = vmatpush3.bf16.msra.mxu1 %v8301_v58  ;;  %v8337_v58 = vld [vmem:[%s9954_s7 + $0x320] sm:$0xff]  }
 0xeeb   :  { %7448 = vmatpush3.bf16.msra.mxu0 %v8302_v59  ;;  %7427 = vmatprep.subr.bf16.mxu1 %v8303_v39  ;;  %v8338_v59 = vld [vmem:[%s9954_s7 + $0x3a0] sm:$0xff]   ;;  %v8339_v39 = vld [vmem:[%s9954_s7 + $0x368] sm:$0xff]  }
 0xeec   :  { %7449 = vmatprep.subr.bf16.mxu0 %v8304_v63  ;;  %v8340_v63 = vld [vmem:[%s9954_s7 + $0x3e8] sm:$0xff]  }
 0xeee   :  { %7428 = vmatpush3.bf16.msra.mxu1 %v8305_v2  ;;  %v8341_v2 = vld [vmem:[%s9954_s7 + $0x328] sm:$0xff]  }
 0xeef   :  { %7450 = vmatpush3.bf16.msra.mxu0 %v8306_v22  ;;  %7429 = vmatprep.subr.bf16.mxu1 %v8307_v3  ;;  %v2604_v22 = vrot.slane %v9581_v15, %v8805_v23  ;;  %v9698_v3 = vld [vmem:[#allocation10 + $0x12] sm:$0x7] }
 0xef0   :  { %7451 = vmatprep.subr.bf16.mxu0 %v8308_v4  ;;  %v8342_v4 = vld [vmem:[%s9954_s7 + $0x3a8] sm:$0xff]   ;;  %v3706_v62 = vrot.slane %v9698_v3, %v8808_v25  ;;  %v8346_v15 = vld [vmem:[%s9954_s7 + $0x3b0] sm:$0xff]  }
 0xef1   :  { %v2846_v26 = vadd.f32 %v9126_v30, %v2604_v22 }
 0xef2   :  { %7430 = vmatpush3.bf16.msra.mxu1 %v8309_v16  ;;  %v8343_v16 = vld [vmem:[%s9954_s7 + $0x370] sm:$0xff]   ;;  %v3946_v30 = vadd.f32 %v9264_v11, %v3706_v62  ;;  %v8385_v62 = vld [vmem:[%s9954_s7 + $0x500] sm:$0xff]  }
 0xef3   :  { %7452 = vmatpush3.bf16.msra.mxu0 %v8310_v21  ;;  %7431 = vmatprep.subr.bf16.mxu1 %v8311_v24  ;;  %v8344_v21 = vld [vmem:[%s9954_s7 + $0x3f0] sm:$0xff]   ;;  %v3161_v24 = vrot.slane %v9588_v61, %v9353_v60  ;;  %v2892_v12 = vmax.f32 %v2846_v26, 0.0  ;;  %v8386_v26 = vld [vmem:[%s9954_s7 + $0x580] sm:$0xff]  }
 0xef4   :  { %7453 = vmatprep.subr.bf16.mxu0 %v8312_v1  ;;  %v8345_v1 = vld [vmem:[%s9954_s7 + $0x330] sm:$0xff]   ;;  %v3991_v8 = vmax.f32 %v3946_v30, 0.0 }
 0xef5   :  { %v2895_v35 = vpack.c.bf16 %v2892_v12, %v2892_v12  ;;  %v8391_v30 = vld [vmem:[%s9954_s7 + $0x550] sm:$0xff]  }
 0xef6   :  { %7432 = vmatpush3.bf16.msra.mxu1 %v8313_v28  ;;  %v2887_v28 = vadd.f32 %v9128_v31, %v2612_v20  ;;  %v8350_v31 = vld [vmem:[%s9954_s7 + $0x3b8] sm:$0xff]   ;;  %v3994_v9 = vpack.c.bf16 %v3991_v8, %v3991_v8  ;;  %v8393_v12 = vld [vmem:[%s9954_s7 + $0x510] sm:$0xff]   ;;  %v8399_v8 = vld [vmem:[%s9954_s7 + $0x560] sm:$0xff]  }
 0xef7   :  { %7454 = vmatpush3.bf16.msra.mxu0 %v8314_v5  ;;  %7433 = vmatprep.subr.bf16.mxu1 %v8315_v34  ;;  %v3436_v5 = vadd.f32 %v9195_v18, %v3161_v24  ;;  %v8349_v34 = vld [vmem:[%s9954_s7 + $0x338] sm:$0xff]   ;;  %v8352_v18 = vld [vmem:[%s9954_s7 + $0x4c0] sm:$0xff]  }
 0xef8   :  { %7455 = vmatprep.subr.bf16.mxu0 %v8316_v13  ;;  %v8351_v13 = vld [vmem:[%s9954_s7 + $0x440] sm:$0xff]   ;;  %v2894_v0 = vmax.f32 %v2887_v28, 0.0  ;;  %v8382_v20 = vld [vmem:[%s9954_s7 + $0x4b8] sm:$0xff]   ;;  %v8388_v28 = vld [vmem:[%s9954_s7 + $0x5c8] sm:$0xff]  }
 0xef9   :  { %v3443_v11 = vmax.f32 %v3436_v5, 0.0  ;;  %v8384_v24 = vld [vmem:[%s9954_s7 + $0x5c0] sm:$0xff]   ;;  %v8390_v5 = vld [vmem:[%s9954_s7 + $0x588] sm:$0xff]  }
 0xefa   :  { %7434 = vmatpush3.bf16.msra.mxu1 %v8317_v44  ;;  %v8353_v44 = vld [vmem:[%s9954_s7 + $0x400] sm:$0xff]  }
 0xefb   :  { %7456 = vmatpush3.bf16.msra.mxu0 %v8318_v51  ;;  %7463 = vmatprep.subr.bf16.mxu1 %v8319_v43  ;;  %v8354_v51 = vld [vmem:[%s9954_s7 + $0x480] sm:$0xff]   ;;  %v2897_v43 = vpack.c.bf16 %v2894_v0, %v2894_v0  ;;  %v8396_v0 = vld [vmem:[%s9954_s7 + $0x5d8] sm:$0xff]  }
 0xefc   :  { %7485 = vmatprep.subr.bf16.mxu0 %v8320_v32  ;;  %v3446_v32 = vpack.c.bf16 %v3443_v11, %v3443_v11  ;;  %v8398_v11 = vld [vmem:[%s9954_s7 + $0x598] sm:$0xff]  }
 0xefd   :  { %6281 = vmatmul.mubr.bf16.vlgmr.msra.gmra.mrb[72].mxu1 %v1799_v49  ;;  %v8358_v49 = vld [vmem:[%s9954_s7 + $0x488] sm:$0xff]  }
 0xefe   :  { %6321 = vmatmul.mubr.bf16.vlgmr.msra.gmra.mrb[72].mxu0 %v2347_v36  ;;  %7464 = vmatpush3.bf16.msra.mxu1 %v8321_v14  ;;  %v8357_v14 = vld [vmem:[%s9954_s7 + $0x408] sm:$0xff]   ;;  %v8360_v36 = vld [vmem:[%s9954_s7 + $0x4d0] sm:$0xff]  }
 0xeff   :  { %6360 = vmatprep.mubr.bf16.mxu1 %v2896_v29  ;;  %7486 = vmatpush3.bf16.msra.mxu0 %v8322_v50  ;;  %v8359_v50 = vld [vmem:[%s9954_s7 + $0x450] sm:$0xff]  }
 0xf00   :  { %6400 = vmatprep.mubr.bf16.mxu0 %v3444_v38  ;;  %7465 = vmatprep.subr.bf16.mxu1 %v8323_v42  ;;  %v8361_v42 = vld [vmem:[%s9954_s7 + $0x410] sm:$0xff]   ;;  %v8364_v38 = vld [vmem:[%s9954_s7 + $0x4d8] sm:$0xff]  }
 0xf01   :  { %7487 = vmatprep.subr.bf16.mxu0 %v8324_v37  ;;  %v8362_v29 = vld [vmem:[%s9954_s7 + $0x490] sm:$0xff]   ;;  %v8363_v37 = vld [vmem:[%s9954_s7 + $0x458] sm:$0xff]  }
 0xf02   :  { %7466 = vmatpush3.bf16.msra.mxu1 %v8325_v40  ;;  %v8365_v40 = vld [vmem:[%s9954_s7 + $0x418] sm:$0xff]  }
 0xf03   :  { %7488 = vmatpush3.bf16.msra.mxu0 %v8326_v41  ;;  %7467 = vmatprep.subr.bf16.mxu1 %v8327_v45  ;;  %v8366_v41 = vld [vmem:[%s9954_s7 + $0x498] sm:$0xff]   ;;  %v8367_v45 = vld [vmem:[%s9954_s7 + $0x460] sm:$0xff]  }
 0xf04   :  { %7489 = vmatprep.subr.bf16.mxu0 %v8328_v46  ;;  %v8368_v46 = vld [vmem:[%s9954_s7 + $0x4e0] sm:$0xff]  }
 0xf06   :  { %7468 = vmatpush3.bf16.msra.mxu1 %v8329_v47  ;;  %v8369_v47 = vld [vmem:[%s9954_s7 + $0x420] sm:$0xff]  }
 0xf07   :  { %7490 = vmatpush3.bf16.msra.mxu0 %v8330_v48  ;;  %7469 = vmatprep.subr.bf16.mxu1 %v8331_v52  ;;  %v8370_v48 = vld [vmem:[%s9954_s7 + $0x4a0] sm:$0xff]   ;;  %v8371_v52 = vld [vmem:[%s9954_s7 + $0x468] sm:$0xff]  }
 0xf08   :  { %7491 = vmatprep.subr.bf16.mxu0 %v8332_v53  ;;  %v8372_v53 = vld [vmem:[%s9954_s7 + $0x4e8] sm:$0xff]  }
 0xf0a   :  { %7470 = vmatpush3.bf16.msra.mxu1 %v8333_v54  ;;  %v8373_v54 = vld [vmem:[%s9954_s7 + $0x428] sm:$0xff]  }
 0xf0b   :  { %7492 = vmatpush3.bf16.msra.mxu0 %v8334_v55  ;;  %7471 = vmatprep.subr.bf16.mxu1 %v8335_v56  ;;  %v3157_v55 = vrot.slane %v9588_v61, %v8808_v25  ;;  %v8374_v56 = vld [vmem:[%s9954_s7 + $0x4a8] sm:$0xff]   ;;  %v8377_v61 = vld [vmem:[%s9954_s7 + $0x430] sm:$0xff]  }
 0xf0c   :  { %7493 = vmatprep.subr.bf16.mxu0 %v8336_v57  ;;  %v8375_v57 = vld [vmem:[%s9954_s7 + $0x470] sm:$0xff]  }
 0xf0e   :  { %7472 = vmatpush3.bf16.msra.mxu1 %v8337_v58  ;;  %v3702_v58 = vrot.slane %v9698_v3, %v8805_v23 }
 0xf0f   :  { %7494 = vmatpush3.bf16.msra.mxu0 %v8338_v59  ;;  %7473 = vmatprep.subr.bf16.mxu1 %v8339_v39  ;;  %v8376_v59 = vld [vmem:[%s9954_s7 + $0x4f0] sm:$0xff]   ;;  %v3397_v39 = vadd.f32 %v9197_v19, %v3157_v55  ;;  %v8381_v19 = vld [vmem:[%s9954_s7 + $0x438] sm:$0xff]  }
 0xf10   :  { %7495 = vmatprep.subr.bf16.mxu0 %v8340_v63  ;;  %v8378_v63 = vld [vmem:[%s9954_s7 + $0x4b0] sm:$0xff]   ;;  %v3944_v22 = vadd.f32 %v9260_v6, %v3702_v58  ;;  %v8383_v6 = vld [vmem:[%s9954_s7 + $0x540] sm:$0xff]  }
 0xf12   :  { %7474 = vmatpush3.bf16.msra.mxu1 %v8341_v2  ;;  %v8379_v2 = vld [vmem:[%s9954_s7 + $0x478] sm:$0xff]  }
 0xf13   :  { %7496 = vmatpush3.bf16.msra.mxu0 %v8342_v4  ;;  %7475 = vmatprep.subr.bf16.mxu1 %v8343_v16  ;;  %v8380_v4 = vld [vmem:[%s9954_s7 + $0x4f8] sm:$0xff]   ;;  %v3442_v16 = vmax.f32 %v3397_v39, 0.0 }
 0xf14   :  { %7497 = vmatprep.subr.bf16.mxu0 %v8344_v21  ;;  %v3990_v21 = vmax.f32 %v3944_v22, 0.0 }
 0xf16   :  { %7476 = vmatpush3.bf16.msra.mxu1 %v8345_v1  ;;  %v3445_v1 = vpack.c.bf16 %v3442_v16, %v3442_v16  ;;  %v7113_v16 = vld [vmem:[#allocation12] ss:$0 sm:$0xff] }
 0xf17   :  { %7498 = vmatpush3.bf16.msra.mxu0 %v8346_v15  ;;  %7477 = vmatprep.subr.bf16.mxu1 %v8347_v27  ;;  %v8387_v15 = vld [vmem:[%s9954_s7 + $0x548] sm:$0xff]   ;;  %v3993_v27 = vpack.c.bf16 %v3990_v21, %v3990_v21 }
 0xf18   :  { %7499 = vmatprep.subr.bf16.mxu0 %v8348_v33  ;;  %v8389_v33 = vld [vmem:[%s9954_s7 + $0x508] sm:$0xff]  }
 0xf1a   :  { %7478 = vmatpush3.bf16.msra.mxu1 %v8349_v34  ;;  %v8392_v34 = vld [vmem:[%s9954_s7 + $0x5d0] sm:$0xff]  }
 0xf1b   :  { %7500 = vmatpush3.bf16.msra.mxu0 %v8350_v31  ;;  %7507 = vmatprep.subr.bf16.mxu1 %v8351_v13  ;;  %v8394_v31 = vld [vmem:[%s9954_s7 + $0x590] sm:$0xff]   ;;  %v8395_v13 = vld [vmem:[%s9954_s7 + $0x558] sm:$0xff]  }
 0xf1c   :  { %7529 = vmatprep.subr.bf16.mxu0 %v8352_v18  ;;  %v8397_v18 = vld [vmem:[%s9954_s7 + $0x518] sm:$0xff]  }
 0xf1d   :  { %6361 = vmatmul.mubr.bf16.vlgmr.msra.gmra.mrb[76].mxu1 %v2895_v35  ;;  %v8401_v35 = vld [vmem:[%s9954_s7 + $0x520] sm:$0xff]  }
 0xf1e   :  { %6401 = vmatmul.mubr.bf16.vlgmr.msra.gmra.mrb[76].mxu0 %v2897_v43  ;;  %7508 = vmatpush3.bf16.msra.mxu1 %v8353_v44  ;;  %v8400_v44 = vld [vmem:[%s9954_s7 + $0x5e0] sm:$0xff]   ;;  %v8403_v43 = vld [vmem:[%s9954_s7 + $0x568] sm:$0xff]  }
 0xf1f   :  { %6440 = vmatprep.mubr.bf16.mxu1 %v3446_v32  ;;  %7530 = vmatpush3.bf16.msra.mxu0 %v8354_v51  ;;  %v8402_v51 = vld [vmem:[%s9954_s7 + $0x5a0] sm:$0xff]   ;;  %v8405_v32 = vld [vmem:[%s9954_s7 + $0x528] sm:$0xff]  }
 0xf20   :  { %6480 = vmatprep.mubr.bf16.mxu0 %v3994_v9  ;;  %7509 = vmatprep.subr.bf16.mxu1 %v8355_v7  ;;  %v8404_v7 = vld [vmem:[%s9954_s7 + $0x5e8] sm:$0xff]   ;;  %v8407_v9 = vld [vmem:[%s9954_s7 + $0x570] sm:$0xff]  }
 0xf21   :  { %7531 = vmatprep.subr.bf16.mxu0 %v8356_v17  ;;  %v8406_v17 = vld [vmem:[%s9954_s7 + $0x5a8] sm:$0xff]  }
 0xf22   :  { %7510 = vmatpush3.bf16.msra.mxu1 %v8357_v14  ;;  %v8408_v14 = vld [vmem:[%s9954_s7 + $0x5f0] sm:$0xff]  }
 0xf23   :  { %7532 = vmatpush3.bf16.msra.mxu0 %v8358_v49  ;;  %7511 = vmatprep.subr.bf16.mxu1 %v8359_v50  ;;  %v8409_v49 = vld [vmem:[%s9954_s7 + $0x530] sm:$0xff]  }
 0xf24   :  { %7533 = vmatprep.subr.bf16.mxu0 %v8360_v36  ;;  %v8410_v50 = vld [vmem:[%s9954_s7 + $0x5b0] sm:$0xff]   ;;  %v8411_v36 = vld [vmem:[%s9954_s7 + $0x578] sm:$0xff]  }
 0xf26   :  { %7512 = vmatpush3.bf16.msra.mxu1 %v8361_v42  ;;  %v8412_v42 = vld [vmem:[%s9954_s7 + $0x5f8] sm:$0xff]  }
 0xf27   :  { %7534 = vmatpush3.bf16.msra.mxu0 %v8362_v29  ;;  %7513 = vmatprep.subr.bf16.mxu1 %v8363_v37  ;;  %v8413_v29 = vld [vmem:[%s9954_s7 + $0x538] sm:$0xff]  }
 0xf28   :  { %7535 = vmatprep.subr.bf16.mxu0 %v8364_v38  ;;  %v8414_v37 = vld [vmem:[%s9954_s7 + $0x5b8] sm:$0xff]   ;;  %v3710_v38 = vrot.slane %v9698_v3, %v9353_v60 }
 0xf2a   :  { %7514 = vmatpush3.bf16.msra.mxu1 %v8365_v40  ;;  %v4246_v40 = vld [vmem:[#allocation10 + $0x15] sm:$0x7] }
 0xf2b   :  { %7536 = vmatpush3.bf16.msra.mxu0 %v8366_v41  ;;  %7515 = vmatprep.subr.bf16.mxu1 %v8367_v45  ;;  %v4251_v41 = vrot.slane %v4246_v40, %v8805_v23  ;;  %v4259_v45 = vrot.slane %v4246_v40, %v9353_v60 }
 0xf2c   :  { %7537 = vmatprep.subr.bf16.mxu0 %v8368_v46  ;;  %v3985_v46 = vadd.f32 %v9262_v10, %v3710_v38 }
 0xf2e   :  { %7516 = vmatpush3.bf16.msra.mxu1 %v8369_v47  ;;  %v4255_v47 = vrot.slane %v4246_v40, %v8808_v25 }
 0xf2f   :  { %7538 = vmatpush3.bf16.msra.mxu0 %v8370_v48  ;;  %7517 = vmatprep.subr.bf16.mxu1 %v8371_v52 }
 0xf30   :  { %7539 = vmatprep.subr.bf16.mxu0 %v8372_v53 }
 0xf32   :  { %7518 = vmatpush3.bf16.msra.mxu1 %v8373_v54 }
 0xf33   :  { %7540 = vmatpush3.bf16.msra.mxu0 %v8374_v56  ;;  %7519 = vmatprep.subr.bf16.mxu1 %v8375_v57  ;;  %v3992_v57 = vmax.f32 %v3985_v46, 0.0 }
 0xf34   :  { %7541 = vmatprep.subr.bf16.mxu0 %v8376_v59 }
 0xf35   :  { %v3995_v10 = vpack.c.bf16 %v3992_v57, %v3992_v57 }
 0xf36   :  { %7520 = vmatpush3.bf16.msra.mxu1 %v8377_v61 }
 0xf37   :  { %7542 = vmatpush3.bf16.msra.mxu0 %v8378_v63  ;;  %7521 = vmatprep.subr.bf16.mxu1 %v8379_v2 }
 0xf38   :  { %7543 = vmatprep.subr.bf16.mxu0 %v8380_v4 }
 0xf3a   :  { %7522 = vmatpush3.bf16.msra.mxu1 %v8381_v19 }
 0xf3b   :  { %7544 = vmatpush3.bf16.msra.mxu0 %v8382_v20  ;;  %7551 = vmatprep.subr.bf16.mxu1 %v8383_v6 }
 0xf3c   :  { %7573 = vmatprep.subr.bf16.mxu0 %v8384_v24 }
 0xf3d   :  { %6441 = vmatmul.mubr.bf16.vlgmr.msra.gmra.mrb[80].mxu1 %v3445_v1 }
 0xf3e   :  { %6481 = vmatmul.mubr.bf16.vlgmr.msra.gmra.mrb[80].mxu0 %v3993_v27  ;;  %7552 = vmatpush3.bf16.msra.mxu1 %v8385_v62 }
 0xf3f   :  { %7574 = vmatpush3.bf16.msra.mxu0 %v8386_v26  ;;  %7553 = vmatprep.subr.bf16.mxu1 %v8387_v15 }
 0xf40   :  { %7575 = vmatprep.subr.bf16.mxu0 %v8388_v28 }
 0xf42   :  { %7554 = vmatpush3.bf16.msra.mxu1 %v8389_v33 }
 0xf43   :  { %7576 = vmatpush3.bf16.msra.mxu0 %v8390_v5  ;;  %7555 = vmatprep.subr.bf16.mxu1 %v8391_v30 }
 0xf44   :  { %7577 = vmatprep.subr.bf16.mxu0 %v8392_v34 }
 0xf46   :  { %7556 = vmatpush3.bf16.msra.mxu1 %v8393_v12 }
 0xf47   :  { %7578 = vmatpush3.bf16.msra.mxu0 %v8394_v31  ;;  %7557 = vmatprep.subr.bf16.mxu1 %v8395_v13 }
 0xf48   :  { %7579 = vmatprep.subr.bf16.mxu0 %v8396_v0 }
 0xf4a   :  { %7558 = vmatpush3.bf16.msra.mxu1 %v8397_v18 }
 0xf4b   :  { %7580 = vmatpush3.bf16.msra.mxu0 %v8398_v11  ;;  %7559 = vmatprep.subr.bf16.mxu1 %v8399_v8 }
 0xf4c   :  { %7581 = vmatprep.subr.bf16.mxu0 %v8400_v44 }
 0xf4e   :  { %7560 = vmatpush3.bf16.msra.mxu1 %v8401_v35 }
 0xf4f   :  { %7582 = vmatpush3.bf16.msra.mxu0 %v8402_v51  ;;  %7561 = vmatprep.subr.bf16.mxu1 %v8403_v43 }
 0xf50   :  { %7583 = vmatprep.subr.bf16.mxu0 %v8404_v7 }
 0xf52   :  { %7562 = vmatpush3.bf16.msra.mxu1 %v8405_v32 }
 0xf53   :  { %7584 = vmatpush3.bf16.msra.mxu0 %v8406_v17  ;;  %7563 = vmatprep.subr.bf16.mxu1 %v8407_v9 }
 0xf54   :  { %7585 = vmatprep.subr.bf16.mxu0 %v8408_v14 }
 0xf56   :  { %7564 = vmatpush3.bf16.msra.mxu1 %v8409_v49 }
 0xf57   :  { %7586 = vmatpush3.bf16.msra.mxu0 %v8410_v50  ;;  %7565 = vmatprep.subr.bf16.mxu1 %v8411_v36 }
 0xf58   :  { %7587 = vmatprep.subr.bf16.mxu0 %v8412_v42 }
 0xf5a   :  { %7566 = vmatpush3.bf16.msra.mxu1 %v8413_v29 }
 0xf5b   :  { %7588 = vmatpush3.bf16.msra.mxu0 %v8414_v37 }
 0xf70   :  { %v4492_v48 = vpop.f32.mrb[60].mxu1  ;;  %v4533_v52 = vpop.f32.mrb[60].mxu0 }
 0xf71   :  { %v4493_v53 = vadd.f32 %v4492_v48, %v4251_v41  ;;  %v4534_v54 = vadd.f32 %v4533_v52, %v4259_v45  ;;  %v4494_v55 = vpop.f32.mrb[61].mxu1  ;;  %v4535_v56 = vpop.f32.mrb[61].mxu0 }
 0xf72   :  { %v4495_v58 = vadd.f32 %v4494_v55, %v4255_v47  ;;  %v4496_v59 = vpop.f32.mrb[62].mxu1  ;;  %v4536_v61 = vpop.f32.mrb[62].mxu0 }
 0xf73   :  { %v4539_v3 = vmax.f32 %v4493_v53, 0.0  ;;  %v4541_v39 = vmax.f32 %v4534_v54, 0.0  ;;  %v4497_v63 = vpop.f32.mrb[63].mxu1  ;;  %v4537_v23 = vpop.f32.mrb[63].mxu0 }
 0xf74   :  { %v4540_v2 = vmax.f32 %v4495_v58, 0.0 }
 0xf75   :  { %v4542_v60 = vpack.c.bf16 %v4539_v3, %v4539_v3  ;;  %v4544_v22 = vpack.c.bf16 %v4541_v39, %v4541_v39 }
 0xf76   :  { %v4543_v4 = vpack.c.bf16 %v4540_v2, %v4540_v2 }
 0xf77   :  { %6520 = vmatprep.mubr.bf16.mxu1 %v4542_v60  ;;  %6560 = vmatprep.mubr.bf16.mxu0 %v4544_v22 }
 0xf78   :  { %6521 = vmatmul.mubr.bf16.vlgmr.msra.gmra.mrb[84].mxu1 %v3995_v10  ;;  %6561 = vmatmul.mubr.bf16.vlgmr.msra.gmra.mrb[84].mxu0 %v4543_v4 }
 0xf90   :  { %v7347_v25 = vpop.f32.mrb[64].mxu1  ;;  %v7369_v19 = vpop.f32.mrb[64].mxu0 }
 0xf91   :  { %v7348_v20 = vpop.f32.mrb[65].mxu1  ;;  %v7370_v6 = vpop.f32.mrb[65].mxu0 }
 0xf92   :  { %v7349_v21 = vadd.f32 %v7348_v20, %v7347_v25  ;;  %v7371_v24 = vadd.f32 %v7370_v6, %v7369_v19  ;;  %v7350_v62 = vpop.f32.mrb[66].mxu1  ;;  %v7372_v1 = vpop.f32.mrb[66].mxu0 }
 0xf93   :  { %v7351_v26 = vpop.f32.mrb[67].mxu1  ;;  %v7373_v15 = vpop.f32.mrb[67].mxu0 }
 0xf94   :  { %v6123_v27 = vadd.f32 %v7349_v21, %v7113_v16  ;;  %v7306_v15 = vld [vmem:[%s9956_s9] ss:$0 sm:$0xff] }
 0xf96   :  { %v6163_v28 = vadd.f32 %v7371_v24, %v6123_v27 }
 0xfb0   :  { %v7391_v33 = vpop.f32.mrb[68].mxu1 }
 0xfb1   :  { %v7413_v5 = vpop.f32.mrb[68].mxu0  ;;  %v7392_v30 = vpop.f32.mrb[69].mxu1 }
 0xfb2   :  { %v7393_v34 = vadd.f32 %v7392_v30, %v7391_v33  ;;  %v7414_v12 = vpop.f32.mrb[69].mxu0  ;;  %v7394_v31 = vpop.f32.mrb[70].mxu1 }
 0xfb3   :  { %v7415_v13 = vadd.f32 %v7414_v12, %v7413_v5  ;;  %v7416_v0 = vpop.f32.mrb[70].mxu0  ;;  %v7395_v18 = vpop.f32.mrb[71].mxu1 }
 0xfb4   :  { %v6203_v11 = vadd.f32 %v7393_v34, %v6163_v28  ;;  %v7417_v8 = vpop.f32.mrb[71].mxu0 }
 0xfb6   :  { %v6243_v44 = vadd.f32 %v7415_v13, %v6203_v11 }
 0xfd0   :  { %v7435_v35 = vpop.f32.mrb[72].mxu1 }
 0xfd1   :  { %v7457_v51 = vpop.f32.mrb[72].mxu0  ;;  %v7436_v43 = vpop.f32.mrb[73].mxu1 }
 0xfd2   :  { %v7437_v7 = vadd.f32 %v7436_v43, %v7435_v35  ;;  %v7458_v32 = vpop.f32.mrb[73].mxu0  ;;  %v7438_v17 = vpop.f32.mrb[74].mxu1 }
 0xfd3   :  { %v7459_v9 = vadd.f32 %v7458_v32, %v7457_v51  ;;  %v7460_v14 = vpop.f32.mrb[74].mxu0  ;;  %v7439_v49 = vpop.f32.mrb[75].mxu1 }
 0xfd4   :  { %v6283_v50 = vadd.f32 %v7437_v7, %v6243_v44  ;;  %v7461_v36 = vpop.f32.mrb[75].mxu0 }
 0xfd6   :  { %v6323_v42 = vadd.f32 %v7459_v9, %v6283_v50 }
 0xff0   :  { %v7479_v29 = vpop.f32.mrb[76].mxu1 }
 0xff1   :  { %v7501_v37 = vpop.f32.mrb[76].mxu0  ;;  %v7480_v38 = vpop.f32.mrb[77].mxu1 }
 0xff2   :  { %v7481_v40 = vadd.f32 %v7480_v38, %v7479_v29  ;;  %v7502_v41 = vpop.f32.mrb[77].mxu0  ;;  %v7482_v45 = vpop.f32.mrb[78].mxu1 }
 0xff3   :  { %v7503_v46 = vadd.f32 %v7502_v41, %v7501_v37  ;;  %v7504_v47 = vpop.f32.mrb[78].mxu0  ;;  %v7483_v48 = vpop.f32.mrb[79].mxu1 }
 0xff4   :  { %v6363_v52 = vadd.f32 %v7481_v40, %v6323_v42  ;;  %v7505_v53 = vpop.f32.mrb[79].mxu0 }
 0xff6   :  { %v6403_v54 = vadd.f32 %v7503_v46, %v6363_v52 }
0x1010   :  { %v7523_v55 = vpop.f32.mrb[80].mxu1 }
0x1011   :  { %v7545_v56 = vpop.f32.mrb[80].mxu0  ;;  %v7524_v57 = vpop.f32.mrb[81].mxu1 }
0x1012   :  { %v7525_v58 = vadd.f32 %v7524_v57, %v7523_v55  ;;  %v7546_v59 = vpop.f32.mrb[81].mxu0  ;;  %v7526_v61 = vpop.f32.mrb[82].mxu1 }
0x1013   :  { %v7547_v3 = vadd.f32 %v7546_v59, %v7545_v56  ;;  %v7548_v39 = vpop.f32.mrb[82].mxu0  ;;  %v7527_v63 = vpop.f32.mrb[83].mxu1 }
0x1014   :  { %v6443_v23 = vadd.f32 %v7525_v58, %v6403_v54  ;;  %v7549_v2 = vpop.f32.mrb[83].mxu0 }
0x1016   :  { %v6483_v60 = vadd.f32 %v7547_v3, %v6443_v23 }
0x104b   :  { %v7567_v22 = vpop.f32.mrb[84].mxu1  ;;  %v7589_v10 = vpop.f32.mrb[84].mxu0 }
0x104c   :  { %v7568_v4 = vpop.f32.mrb[85].mxu1  ;;  %v7590_v25 = vpop.f32.mrb[85].mxu0 }
0x104d   :  { %v7569_v19 = vadd.f32 %v7568_v4, %v7567_v22  ;;  %v7591_v16 = vadd.f32 %v7590_v25, %v7589_v10  ;;  %v7570_v20 = vpop.f32.mrb[86].mxu1  ;;  %v7592_v6 = vpop.f32.mrb[86].mxu0 }
0x104e   :  { %v7571_v21 = vpop.f32.mrb[87].mxu1  ;;  %v7593_v24 = vpop.f32.mrb[87].mxu0 }
0x104f   :  { %v6523_v62 = vadd.f32 %v7569_v19, %v6483_v60 }
0x1051   :  { %v6563_v1 = vadd.f32 %v7591_v16, %v6523_v62 }
0x1053   :  { %8417 = vtanh.f32 %v6563_v1 }
0x105d   :  { %v8418_v26 = vpop.eup %8417 }
0x105e   :  { %v6569_v27 = vmul.f32 10.0, %v8418_v26 }
0x1060   :  { %v6577_v28 = vadd.f32 %v7306_v15, %v6569_v27 }
0x1062   :  { %v6579_v33 = vsel %vm6578_vm6, %v6577_v28, 0.0 }
0x1063   :  { %6580 = vst [vmem:[%s9957_s10] sm:$0xf] %v6579_v33 }
0x1064   :  { %6585 = vsyncpa [#allocation3], 1 }
0x1065   :  { %6586 = vsyncpa [#allocation5], 1 }
0x1066   :  { %6587 = vsyncpa [#allocation8], 1 }
0x1067   :  { %6588 = vsyncpa [#allocation11], 1 }

</bundles_post_ra>
